<compile_context>
chip_gen: v5e
topology: v5e:2x2
jax: 0.10.0
libtpu: 0.0.40
codegen_flags: <defaults>
</compile_context>

<pallas_src>
import functools

import jax
import jax.numpy as jnp
from jax.experimental import pallas as pl
from jax.experimental.pallas import tpu as pltpu

# ---- model config (small, consistent with a TransformerDecoderLayer) ----
D = 32            # d_model
H = 4             # nhead
DH = D // H       # head dim
DFF = 64          # dim_feedforward
NUM_LAYERS = 2    # num_layers (shared weights, see note above)
EPS = 1e-5        # LayerNorm eps (PyTorch default)

# bias/LN pack rows (shape (14, 3D)):
#  0: self-attn in-proj bias (3D)       1: cross-attn in-proj bias (3D)
#  2: self-attn out bias (:D)           3: cross-attn out bias (:D)
#  4: ffn bias1 (:DFF)                  5: ffn bias2 (:D)
#  6..9:  ln gamma  (norm1, norm2, norm3, final)   (:D)
# 10..13: ln beta   (norm1, norm2, norm3, final)   (:D)


# -------------------- math helpers (shared by kernel and pure-JAX reference) --------------------
def _layernorm(x, g, b):
    """One-pass LayerNorm: var = E[x^2] - mu^2 (single pair of cross-lane reductions)."""
    n = x.shape[-1]
    s1 = jnp.sum(x, axis=-1, keepdims=True)
    s2 = jnp.sum(x * x, axis=-1, keepdims=True)
    mu = s1 * (1.0 / n)
    var = s2 * (1.0 / n) - mu * mu
    return (x - mu) * jax.lax.rsqrt(var + EPS) * g + b


def _attend(q, k, v, bb, sq, sk, w_out, b_out):
    """MHA core on a folded batch-block.

    q: (bb*sq, D) already scaled by 1/sqrt(DH); k, v: (bb*sk, D).
    Heads are contiguous DH-wide lane groups.  The per-(batch, head) softmax stays a small
    static unrolled loop (bb*H <= 8): batching it with an einsum would need
    (S, H, DH) -> (H, S, DH) relayouts that cost more than they save at DH=8.
    """
    outs = []
    for b in range(bb):
        qb = q[b * sq:(b + 1) * sq]          # sublane slices (8-aligned, cheap)
        kb = k[b * sk:(b + 1) * sk]
        vb = v[b * sk:(b + 1) * sk]
        heads = []
        for h in range(H):
            qh = qb[:, h * DH:(h + 1) * DH]
            kh = kb[:, h * DH:(h + 1) * DH]
            vh = vb[:, h * DH:(h + 1) * DH]
            s = jnp.dot(qh, kh.T, preferred_element_type=jnp.float32)    # (sq, sk)
            s = s - jnp.max(s, axis=-1, keepdims=True)
            p = jnp.exp(s)
            l = jnp.sum(p, axis=-1, keepdims=True)
            oh = jnp.dot(p, vh, preferred_element_type=jnp.float32)      # (sq, DH)
            heads.append(oh * (1.0 / l))     # deferred softmax normalization (small tensor)
        outs.append(jnp.concatenate(heads, axis=-1))                      # contiguous (sq, D)
    o = outs[0] if bb == 1 else jnp.concatenate(outs, axis=0)             # (bb*sq, D)
    # single output-projection dot instead of per-head accumulation
    return jnp.dot(o, w_out, preferred_element_type=jnp.float32) + b_out


def _forward_block(x, mem, bb, st, sm, w_in, w_out, ff_w1, ff_w2, bias):
    """x: (bb*st, D) folded targets, mem: (bb*sm, D) folded memory."""
    # ---- unpack packed small params ----
    sa_in_b = bias[0]                 # (3D,)
    ca_in_b = bias[1]                 # (3D,)
    sa_out_b = bias[2, :D]
    ca_out_b = bias[3, :D]
    ff_b1 = bias[4, :DFF]
    ff_b2 = bias[5, :D]
    ln_g = bias[6:10, :D]             # (4, D)
    ln_b = bias[10:14, :D]            # (4, D)

    w_sa_in = w_in[:D]                # (D, 3D) packed [Wq|Wk|Wv], x @ W orientation
    w_ca_q = w_in[D:, :D]             # (D, D)
    w_ca_kv = w_in[D:, D:]            # (D, 2D)
    w_sa_out = w_out[:D]              # (D, D)
    w_ca_out = w_out[D:]              # (D, D)

    scale = 1.0 / (DH ** 0.5)

    # Cross-attention K/V depend only on memory + shared weights -> hoist out of the layer loop.
    kv_mem = jnp.dot(mem, w_ca_kv, preferred_element_type=jnp.float32) + ca_in_b[D:]
    k_ca = kv_mem[:, :D]
    v_ca = kv_mem[:, D:]

    # Static layer loop: NUM_LAYERS=2 is tiny; switch to lax.fori_loop if it grows.
    for _ in range(NUM_LAYERS):
        # --- self-attention block (fused QKV projection) ---
        qkv = jnp.dot(x, w_sa_in, preferred_element_type=jnp.float32) + sa_in_b   # (bb*st, 3D)
        q = qkv[:, :D] * scale
        k = qkv[:, D:2 * D]
        v = qkv[:, 2 * D:]
        x = x + _attend(q, k, v, bb, st, st, w_sa_out, sa_out_b)
        x = _layernorm(x, ln_g[0], ln_b[0])

        # --- cross-attention block ---
        q = (jnp.dot(x, w_ca_q, preferred_element_type=jnp.float32) + ca_in_b[:D]) * scale
        x = x + _attend(q, k_ca, v_ca, bb, st, sm, w_ca_out, ca_out_b)
        x = _layernorm(x, ln_g[1], ln_b[1])

        # --- feed-forward block ---
        h1 = jnp.maximum(jnp.dot(x, ff_w1, preferred_element_type=jnp.float32) + ff_b1, 0.0)
        x = x + jnp.dot(h1, ff_w2, preferred_element_type=jnp.float32) + ff_b2
        x = _layernorm(x, ln_g[2], ln_b[2])

    # MyTransformerDecoder.norm
    return _layernorm(x, ln_g[3], ln_b[3])


# -------------------------------- Pallas kernel --------------------------------
def _decoder_kernel(bb, st, sm,
                    tgt_ref, mem_ref, w_in_ref, w_out_ref, ff_w1_ref, ff_w2_ref, bias_ref,
                    out_ref):
    out_ref[...] = _forward_block(
        tgt_ref[...], mem_ref[...], bb, st, sm,
        w_in_ref[...], w_out_ref[...], ff_w1_ref[...], ff_w2_ref[...], bias_ref[...])


def _default_batch_block(batch):
    # v7x has 2 TensorCores per chip -> split the batch across cores via the grid.
    # v5e/v6e have a single TC, so a >1 grid is just serial per-step overhead -> fold it all.
    try:
        kind = jax.devices()[0].device_kind.lower()
    except Exception:
        kind = ""
    if ("v7" in kind or "7x" in kind) and batch % 2 == 0:
        return batch // 2
    return batch


def my_transformer_decoder(tgt, memory, params, *, batch_block=None):
    """tgt: (B, St, D), memory: (B, Sm, D) float32 -> (B, St, D)."""
    B, St, _ = tgt.shape
    _, Sm, _ = memory.shape
    bb = _default_batch_block(B) if batch_block is None else batch_block
    assert B % bb == 0, "batch must be divisible by the batch block"
    grid = (B // bb,)

    w_in, w_out, ff_w1, ff_w2, bias = params

    # Fold batch into the sublane dim (free: St, Sm are multiples of 8).
    tgt_f = tgt.reshape(B * St, D)
    mem_f = memory.reshape(B * Sm, D)

    kernel = functools.partial(_decoder_kernel, bb, St, Sm)
    out = pl.pallas_call(
        kernel,
        grid=grid,
        in_specs=[
            pl.BlockSpec((bb * St, D), lambda g: (g, 0)),
            pl.BlockSpec((bb * Sm, D), lambda g: (g, 0)),
            pl.BlockSpec(w_in.shape, lambda g: (0, 0)),
            pl.BlockSpec(w_out.shape, lambda g: (0, 0)),
            pl.BlockSpec(ff_w1.shape, lambda g: (0, 0)),
            pl.BlockSpec(ff_w2.shape, lambda g: (0, 0)),
            pl.BlockSpec(bias.shape, lambda g: (0, 0)),
        ],
        out_specs=pl.BlockSpec((bb * St, D), lambda g: (g, 0)),
        out_shape=jax.ShapeDtypeStruct((B * St, D), jnp.float32),
        compiler_params=pltpu.CompilerParams(dimension_semantics=("parallel",)),
    )(tgt_f, mem_f, w_in, w_out, ff_w1, ff_w2, bias)
    return out.reshape(B, St, D)


# ----------------------------- deterministic packed params -----------------------------
def init_params(key):
    ks = jax.random.split(key, 14)
    s = 0.05
    sa_in_w = s * jax.random.normal(ks[0], (D, 3 * D), jnp.float32)
    sa_in_b = s * jax.random.normal(ks[1], (3 * D,), jnp.float32)
    sa_out_w = s * jax.random.normal(ks[2], (D, D), jnp.float32)
    sa_out_b = s * jax.random.normal(ks[3], (D,), jnp.float32)
    ca_in_w = s * jax.random.normal(ks[4], (D, 3 * D), jnp.float32)
    ca_in_b = s * jax.random.normal(ks[5], (3 * D,), jnp.float32)
    ca_out_w = s * jax.random.normal(ks[6], (D, D), jnp.float32)
    ca_out_b = s * jax.random.normal(ks[7], (D,), jnp.float32)
    ff_w1 = s * jax.random.normal(ks[8], (D, DFF), jnp.float32)
    ff_b1 = s * jax.random.normal(ks[9], (DFF,), jnp.float32)
    ff_w2 = s * jax.random.normal(ks[10], (DFF, D), jnp.float32)
    ff_b2 = s * jax.random.normal(ks[11], (D,), jnp.float32)
    ln_g = 1.0 + 0.1 * jax.random.normal(ks[12], (4, D), jnp.float32)   # norm1, norm2, norm3, final
    ln_b = 0.05 * jax.random.normal(ks[13], (4, D), jnp.float32)

    # ---- pack into few, larger arrays ----
    w_in = jnp.concatenate([sa_in_w, ca_in_w], axis=0)      # (2D, 3D)
    w_out = jnp.concatenate([sa_out_w, ca_out_w], axis=0)   # (2D, D)
    bias = jnp.zeros((14, 3 * D), jnp.float32)
    bias = bias.at[0].set(sa_in_b)
    bias = bias.at[1].set(ca_in_b)
    bias = bias.at[2, :D].set(sa_out_b)
    bias = bias.at[3, :D].set(ca_out_b)
    bias = bias.at[4, :DFF].set(ff_b1)
    bias = bias.at[5, :D].set(ff_b2)
    bias = bias.at[6:10, :D].set(ln_g)
    bias = bias.at[10:14, :D].set(ln_b)
    return (w_in, w_out, ff_w1, ff_w2, bias)


# --------------------------------- pure-JAX reference ---------------------------------
def decoder_ref(tgt, memory, params):
    B, St, _ = tgt.shape
    _, Sm, _ = memory.shape
    w_in, w_out, ff_w1, ff_w2, bias = params
    x = _forward_block(tgt.reshape(B * St, D), memory.reshape(B * Sm, D),
                       B, St, Sm, w_in, w_out, ff_w1, ff_w2, bias)
    return x.reshape(B, St, D)


if __name__ == "__main__":
    key = jax.random.PRNGKey(0)
    k_t, k_m, k_p = jax.random.split(key, 3)

    B, St, Sm = 2, 8, 16
    tgt = jax.random.normal(k_t, (B, St, D), jnp.float32)
    memory = jax.random.normal(k_m, (B, Sm, D), jnp.float32)
    params = init_params(k_p)

    out = my_transformer_decoder(tgt, memory, params)
    out = jax.block_until_ready(out)

    ref = jax.block_until_ready(decoder_ref(tgt, memory, params))
    assert out.shape == (B, St, D)
    assert bool(jnp.all(jnp.isfinite(out)))
    assert bool(jnp.allclose(out, ref, atol=2e-4, rtol=2e-4)), "mismatch vs JAX reference"

    print("KERNEL_OK")
</pallas_src>

<mosaic_0001>
module attributes {stable_mosaic.version = 11 : i64} {
  func.func @_decoder_kernel(%arg0: i32, %arg1: memref<16x32xf32, #tpu.memory_space<vmem>>, %arg2: memref<32x32xf32, #tpu.memory_space<vmem>>, %arg3: memref<64x96xf32, #tpu.memory_space<vmem>>, %arg4: memref<64x32xf32, #tpu.memory_space<vmem>>, %arg5: memref<32x64xf32, #tpu.memory_space<vmem>>, %arg6: memref<64x32xf32, #tpu.memory_space<vmem>>, %arg7: memref<14x96xf32, #tpu.memory_space<vmem>>, %arg8: memref<16x32xf32, #tpu.memory_space<vmem>>) attributes {dimension_semantics = [#tpu.dimension_semantics<parallel>], iteration_bounds = array<i64: 1>, scalar_prefetch = 0 : i64, scratch_operands = 0 : i64, tpu.core_type = #tpu.core_type<tc>, window_params = [{transform_indices = @transform_0, window_bounds = array<i64: 16, 32>}, {transform_indices = @transform_1, window_bounds = array<i64: 32, 32>}, {pipeline_mode = #tpu.pipeline_mode<synchronous>, transform_indices = @transform_2, window_bounds = array<i64: 64, 96>}, {pipeline_mode = #tpu.pipeline_mode<synchronous>, transform_indices = @transform_3, window_bounds = array<i64: 64, 32>}, {pipeline_mode = #tpu.pipeline_mode<synchronous>, transform_indices = @transform_4, window_bounds = array<i64: 32, 64>}, {pipeline_mode = #tpu.pipeline_mode<synchronous>, transform_indices = @transform_5, window_bounds = array<i64: 64, 32>}, {pipeline_mode = #tpu.pipeline_mode<synchronous>, transform_indices = @transform_6, window_bounds = array<i64: 14, 96>}, {transform_indices = @transform_7, window_bounds = array<i64: 16, 32>}]} {
    %c0 = arith.constant 0 : index
    %c0_0 = arith.constant 0 : index
    %0 = vector.load %arg1[%c0, %c0_0] : memref<16x32xf32, #tpu.memory_space<vmem>>, vector<16x32xf32>
    %c0_1 = arith.constant 0 : index
    %c0_2 = arith.constant 0 : index
    %1 = vector.load %arg2[%c0_1, %c0_2] : memref<32x32xf32, #tpu.memory_space<vmem>>, vector<32x32xf32>
    %c0_3 = arith.constant 0 : index
    %c0_4 = arith.constant 0 : index
    %2 = vector.load %arg3[%c0_3, %c0_4] : memref<64x96xf32, #tpu.memory_space<vmem>>, vector<64x96xf32>
    %c0_5 = arith.constant 0 : index
    %c0_6 = arith.constant 0 : index
    %3 = vector.load %arg4[%c0_5, %c0_6] : memref<64x32xf32, #tpu.memory_space<vmem>>, vector<64x32xf32>
    %c0_7 = arith.constant 0 : index
    %c0_8 = arith.constant 0 : index
    %4 = vector.load %arg5[%c0_7, %c0_8] : memref<32x64xf32, #tpu.memory_space<vmem>>, vector<32x64xf32>
    %c0_9 = arith.constant 0 : index
    %c0_10 = arith.constant 0 : index
    %5 = vector.load %arg6[%c0_9, %c0_10] : memref<64x32xf32, #tpu.memory_space<vmem>>, vector<64x32xf32>
    %c0_11 = arith.constant 0 : index
    %c0_12 = arith.constant 0 : index
    %6 = vector.load %arg7[%c0_11, %c0_12] : memref<14x96xf32, #tpu.memory_space<vmem>>, vector<14x96xf32>
    %7 = vector.extract_strided_slice %6 {offsets = [0, 0], sizes = [1, 96], strides = [1, 1]} : vector<14x96xf32> to vector<1x96xf32>
    %8 = vector.shape_cast %7 : vector<1x96xf32> to vector<96xf32>
    %9 = vector.extract_strided_slice %6 {offsets = [1, 0], sizes = [1, 96], strides = [1, 1]} : vector<14x96xf32> to vector<1x96xf32>
    %10 = vector.shape_cast %9 : vector<1x96xf32> to vector<96xf32>
    %11 = vector.extract_strided_slice %6 {offsets = [2, 0], sizes = [1, 32], strides = [1, 1]} : vector<14x96xf32> to vector<1x32xf32>
    %12 = vector.shape_cast %11 : vector<1x32xf32> to vector<32xf32>
    %13 = vector.extract_strided_slice %6 {offsets = [3, 0], sizes = [1, 32], strides = [1, 1]} : vector<14x96xf32> to vector<1x32xf32>
    %14 = vector.shape_cast %13 : vector<1x32xf32> to vector<32xf32>
    %15 = vector.extract_strided_slice %6 {offsets = [4, 0], sizes = [1, 64], strides = [1, 1]} : vector<14x96xf32> to vector<1x64xf32>
    %16 = vector.shape_cast %15 : vector<1x64xf32> to vector<64xf32>
    %17 = vector.extract_strided_slice %6 {offsets = [5, 0], sizes = [1, 32], strides = [1, 1]} : vector<14x96xf32> to vector<1x32xf32>
    %18 = vector.shape_cast %17 : vector<1x32xf32> to vector<32xf32>
    %19 = vector.extract_strided_slice %6 {offsets = [6, 0], sizes = [4, 32], strides = [1, 1]} : vector<14x96xf32> to vector<4x32xf32>
    %20 = vector.extract_strided_slice %6 {offsets = [10, 0], sizes = [4, 32], strides = [1, 1]} : vector<14x96xf32> to vector<4x32xf32>
    %21 = vector.extract_strided_slice %2 {offsets = [0, 0], sizes = [32, 96], strides = [1, 1]} : vector<64x96xf32> to vector<32x96xf32>
    %22 = vector.extract_strided_slice %2 {offsets = [32, 0], sizes = [32, 32], strides = [1, 1]} : vector<64x96xf32> to vector<32x32xf32>
    %23 = vector.extract_strided_slice %2 {offsets = [32, 32], sizes = [32, 64], strides = [1, 1]} : vector<64x96xf32> to vector<32x64xf32>
    %24 = vector.extract_strided_slice %3 {offsets = [0, 0], sizes = [32, 32], strides = [1, 1]} : vector<64x32xf32> to vector<32x32xf32>
    %25 = vector.extract_strided_slice %3 {offsets = [32, 0], sizes = [32, 32], strides = [1, 1]} : vector<64x32xf32> to vector<32x32xf32>
    %cst = arith.constant dense<0.000000e+00> : vector<32x64xf32>
    %26 = tpu.matmul %1, %23, %cst {dimension_numbers = #tpu.dot_dimension_numbers<[1], [0], [0], [1], [0, 0, 1, 1], [], []>} : vector<32x32xf32>, vector<32x64xf32>, vector<32x64xf32> -> vector<32x64xf32>
    %27 = vector.extract_strided_slice %10 {offsets = [32], sizes = [64], strides = [1]} : vector<96xf32> to vector<64xf32>
    %28 = vector.shape_cast %27 : vector<64xf32> to vector<1x64xf32>
    %29 = vector.broadcast %28 : vector<1x64xf32> to vector<32x64xf32>
    %30 = arith.addf %26, %29 : vector<32x64xf32>
    %31 = vector.extract_strided_slice %30 {offsets = [0, 0], sizes = [32, 32], strides = [1, 1]} : vector<32x64xf32> to vector<32x32xf32>
    %32 = vector.extract_strided_slice %30 {offsets = [0, 32], sizes = [32, 32], strides = [1, 1]} : vector<32x64xf32> to vector<32x32xf32>
    %cst_13 = arith.constant dense<0.000000e+00> : vector<16x96xf32>
    %33 = tpu.matmul %0, %21, %cst_13 {dimension_numbers = #tpu.dot_dimension_numbers<[1], [0], [0], [1], [0, 0, 1, 1], [], []>} : vector<16x32xf32>, vector<32x96xf32>, vector<16x96xf32> -> vector<16x96xf32>
    %34 = vector.shape_cast %8 : vector<96xf32> to vector<1x96xf32>
    %35 = vector.broadcast %34 : vector<1x96xf32> to vector<16x96xf32>
    %36 = arith.addf %33, %35 : vector<16x96xf32>
    %37 = vector.extract_strided_slice %36 {offsets = [0, 0], sizes = [16, 32], strides = [1, 1]} : vector<16x96xf32> to vector<16x32xf32>
    %cst_14 = arith.constant 0.353553385 : f32
    %38 = vector.broadcast %cst_14 : f32 to vector<16x32xf32>
    %39 = arith.mulf %37, %38 : vector<16x32xf32>
    %40 = vector.extract_strided_slice %36 {offsets = [0, 32], sizes = [16, 32], strides = [1, 1]} : vector<16x96xf32> to vector<16x32xf32>
    %41 = vector.extract_strided_slice %36 {offsets = [0, 64], sizes = [16, 32], strides = [1, 1]} : vector<16x96xf32> to vector<16x32xf32>
    %42 = vector.extract_strided_slice %39 {offsets = [0, 0], sizes = [8, 32], strides = [1, 1]} : vector<16x32xf32> to vector<8x32xf32>
    %43 = vector.extract_strided_slice %40 {offsets = [0, 0], sizes = [8, 32], strides = [1, 1]} : vector<16x32xf32> to vector<8x32xf32>
    %44 = vector.extract_strided_slice %41 {offsets = [0, 0], sizes = [8, 32], strides = [1, 1]} : vector<16x32xf32> to vector<8x32xf32>
    %45 = vector.extract_strided_slice %42 {offsets = [0, 0], sizes = [8, 8], strides = [1, 1]} : vector<8x32xf32> to vector<8x8xf32>
    %46 = vector.extract_strided_slice %43 {offsets = [0, 0], sizes = [8, 8], strides = [1, 1]} : vector<8x32xf32> to vector<8x8xf32>
    %47 = vector.extract_strided_slice %44 {offsets = [0, 0], sizes = [8, 8], strides = [1, 1]} : vector<8x32xf32> to vector<8x8xf32>
    %48 = tpu.transpose %46, [1, 0] : vector<8x8xf32> -> vector<8x8xf32>
    %cst_15 = arith.constant dense<0.000000e+00> : vector<8x8xf32>
    %49 = tpu.matmul %45, %48, %cst_15 {dimension_numbers = #tpu.dot_dimension_numbers<[1], [0], [0], [1], [0, 0, 1, 1], [], []>} : vector<8x8xf32>, vector<8x8xf32>, vector<8x8xf32> -> vector<8x8xf32>
    %cst_16 = arith.constant dense<0xFF800000> : vector<8xf32>
    %50 = vector.multi_reduction <maximumf>, %49, %cst_16 [1] : vector<8x8xf32> to vector<8xf32>
    %51 = vector.shape_cast %50 : vector<8xf32> to vector<8x1xf32>
    %52 = vector.broadcast %51 : vector<8x1xf32> to vector<8x8xf32>
    %53 = arith.subf %49, %52 : vector<8x8xf32>
    %54 = math.exp %53 : vector<8x8xf32>
    %cst_17 = arith.constant dense<0.000000e+00> : vector<8xf32>
    %55 = vector.multi_reduction <add>, %54, %cst_17 [1] : vector<8x8xf32> to vector<8xf32>
    %56 = vector.shape_cast %55 : vector<8xf32> to vector<8x1xf32>
    %cst_18 = arith.constant dense<0.000000e+00> : vector<8x8xf32>
    %57 = tpu.matmul %54, %47, %cst_18 {dimension_numbers = #tpu.dot_dimension_numbers<[1], [0], [0], [1], [0, 0, 1, 1], [], []>} : vector<8x8xf32>, vector<8x8xf32>, vector<8x8xf32> -> vector<8x8xf32>
    %cst_19 = arith.constant 1.000000e+00 : f32
    %58 = vector.broadcast %cst_19 : f32 to vector<8x1xf32>
    %59 = arith.divf %58, %56 : vector<8x1xf32>
    %60 = vector.broadcast %59 : vector<8x1xf32> to vector<8x8xf32>
    %61 = arith.mulf %57, %60 : vector<8x8xf32>
    %62 = vector.extract_strided_slice %42 {offsets = [0, 8], sizes = [8, 8], strides = [1, 1]} : vector<8x32xf32> to vector<8x8xf32>
    %63 = vector.extract_strided_slice %43 {offsets = [0, 8], sizes = [8, 8], strides = [1, 1]} : vector<8x32xf32> to vector<8x8xf32>
    %64 = vector.extract_strided_slice %44 {offsets = [0, 8], sizes = [8, 8], strides = [1, 1]} : vector<8x32xf32> to vector<8x8xf32>
    %65 = tpu.transpose %63, [1, 0] : vector<8x8xf32> -> vector<8x8xf32>
    %cst_20 = arith.constant dense<0.000000e+00> : vector<8x8xf32>
    %66 = tpu.matmul %62, %65, %cst_20 {dimension_numbers = #tpu.dot_dimension_numbers<[1], [0], [0], [1], [0, 0, 1, 1], [], []>} : vector<8x8xf32>, vector<8x8xf32>, vector<8x8xf32> -> vector<8x8xf32>
    %cst_21 = arith.constant dense<0xFF800000> : vector<8xf32>
    %67 = vector.multi_reduction <maximumf>, %66, %cst_21 [1] : vector<8x8xf32> to vector<8xf32>
    %68 = vector.shape_cast %67 : vector<8xf32> to vector<8x1xf32>
    %69 = vector.broadcast %68 : vector<8x1xf32> to vector<8x8xf32>
    %70 = arith.subf %66, %69 : vector<8x8xf32>
    %71 = math.exp %70 : vector<8x8xf32>
    %cst_22 = arith.constant dense<0.000000e+00> : vector<8xf32>
    %72 = vector.multi_reduction <add>, %71, %cst_22 [1] : vector<8x8xf32> to vector<8xf32>
    %73 = vector.shape_cast %72 : vector<8xf32> to vector<8x1xf32>
    %cst_23 = arith.constant dense<0.000000e+00> : vector<8x8xf32>
    %74 = tpu.matmul %71, %64, %cst_23 {dimension_numbers = #tpu.dot_dimension_numbers<[1], [0], [0], [1], [0, 0, 1, 1], [], []>} : vector<8x8xf32>, vector<8x8xf32>, vector<8x8xf32> -> vector<8x8xf32>
    %cst_24 = arith.constant 1.000000e+00 : f32
    %75 = vector.broadcast %cst_24 : f32 to vector<8x1xf32>
    %76 = arith.divf %75, %73 : vector<8x1xf32>
    %77 = vector.broadcast %76 : vector<8x1xf32> to vector<8x8xf32>
    %78 = arith.mulf %74, %77 : vector<8x8xf32>
    %79 = vector.extract_strided_slice %42 {offsets = [0, 16], sizes = [8, 8], strides = [1, 1]} : vector<8x32xf32> to vector<8x8xf32>
    %80 = vector.extract_strided_slice %43 {offsets = [0, 16], sizes = [8, 8], strides = [1, 1]} : vector<8x32xf32> to vector<8x8xf32>
    %81 = vector.extract_strided_slice %44 {offsets = [0, 16], sizes = [8, 8], strides = [1, 1]} : vector<8x32xf32> to vector<8x8xf32>
    %82 = tpu.transpose %80, [1, 0] : vector<8x8xf32> -> vector<8x8xf32>
    %cst_25 = arith.constant dense<0.000000e+00> : vector<8x8xf32>
    %83 = tpu.matmul %79, %82, %cst_25 {dimension_numbers = #tpu.dot_dimension_numbers<[1], [0], [0], [1], [0, 0, 1, 1], [], []>} : vector<8x8xf32>, vector<8x8xf32>, vector<8x8xf32> -> vector<8x8xf32>
    %cst_26 = arith.constant dense<0xFF800000> : vector<8xf32>
    %84 = vector.multi_reduction <maximumf>, %83, %cst_26 [1] : vector<8x8xf32> to vector<8xf32>
    %85 = vector.shape_cast %84 : vector<8xf32> to vector<8x1xf32>
    %86 = vector.broadcast %85 : vector<8x1xf32> to vector<8x8xf32>
    %87 = arith.subf %83, %86 : vector<8x8xf32>
    %88 = math.exp %87 : vector<8x8xf32>
    %cst_27 = arith.constant dense<0.000000e+00> : vector<8xf32>
    %89 = vector.multi_reduction <add>, %88, %cst_27 [1] : vector<8x8xf32> to vector<8xf32>
    %90 = vector.shape_cast %89 : vector<8xf32> to vector<8x1xf32>
    %cst_28 = arith.constant dense<0.000000e+00> : vector<8x8xf32>
    %91 = tpu.matmul %88, %81, %cst_28 {dimension_numbers = #tpu.dot_dimension_numbers<[1], [0], [0], [1], [0, 0, 1, 1], [], []>} : vector<8x8xf32>, vector<8x8xf32>, vector<8x8xf32> -> vector<8x8xf32>
    %cst_29 = arith.constant 1.000000e+00 : f32
    %92 = vector.broadcast %cst_29 : f32 to vector<8x1xf32>
    %93 = arith.divf %92, %90 : vector<8x1xf32>
    %94 = vector.broadcast %93 : vector<8x1xf32> to vector<8x8xf32>
    %95 = arith.mulf %91, %94 : vector<8x8xf32>
    %96 = vector.extract_strided_slice %42 {offsets = [0, 24], sizes = [8, 8], strides = [1, 1]} : vector<8x32xf32> to vector<8x8xf32>
    %97 = vector.extract_strided_slice %43 {offsets = [0, 24], sizes = [8, 8], strides = [1, 1]} : vector<8x32xf32> to vector<8x8xf32>
    %98 = vector.extract_strided_slice %44 {offsets = [0, 24], sizes = [8, 8], strides = [1, 1]} : vector<8x32xf32> to vector<8x8xf32>
    %99 = tpu.transpose %97, [1, 0] : vector<8x8xf32> -> vector<8x8xf32>
    %cst_30 = arith.constant dense<0.000000e+00> : vector<8x8xf32>
    %100 = tpu.matmul %96, %99, %cst_30 {dimension_numbers = #tpu.dot_dimension_numbers<[1], [0], [0], [1], [0, 0, 1, 1], [], []>} : vector<8x8xf32>, vector<8x8xf32>, vector<8x8xf32> -> vector<8x8xf32>
    %cst_31 = arith.constant dense<0xFF800000> : vector<8xf32>
    %101 = vector.multi_reduction <maximumf>, %100, %cst_31 [1] : vector<8x8xf32> to vector<8xf32>
    %102 = vector.shape_cast %101 : vector<8xf32> to vector<8x1xf32>
    %103 = vector.broadcast %102 : vector<8x1xf32> to vector<8x8xf32>
    %104 = arith.subf %100, %103 : vector<8x8xf32>
    %105 = math.exp %104 : vector<8x8xf32>
    %cst_32 = arith.constant dense<0.000000e+00> : vector<8xf32>
    %106 = vector.multi_reduction <add>, %105, %cst_32 [1] : vector<8x8xf32> to vector<8xf32>
    %107 = vector.shape_cast %106 : vector<8xf32> to vector<8x1xf32>
    %cst_33 = arith.constant dense<0.000000e+00> : vector<8x8xf32>
    %108 = tpu.matmul %105, %98, %cst_33 {dimension_numbers = #tpu.dot_dimension_numbers<[1], [0], [0], [1], [0, 0, 1, 1], [], []>} : vector<8x8xf32>, vector<8x8xf32>, vector<8x8xf32> -> vector<8x8xf32>
    %cst_34 = arith.constant 1.000000e+00 : f32
    %109 = vector.broadcast %cst_34 : f32 to vector<8x1xf32>
    %110 = arith.divf %109, %107 : vector<8x1xf32>
    %111 = vector.broadcast %110 : vector<8x1xf32> to vector<8x8xf32>
    %112 = arith.mulf %108, %111 : vector<8x8xf32>
    %113 = tpu.concatenate %61, %78, %95, %112 in 1 : vector<8x8xf32>, vector<8x8xf32>, vector<8x8xf32>, vector<8x8xf32> -> vector<8x32xf32>
    %114 = vector.extract_strided_slice %39 {offsets = [8, 0], sizes = [8, 32], strides = [1, 1]} : vector<16x32xf32> to vector<8x32xf32>
    %115 = vector.extract_strided_slice %40 {offsets = [8, 0], sizes = [8, 32], strides = [1, 1]} : vector<16x32xf32> to vector<8x32xf32>
    %116 = vector.extract_strided_slice %41 {offsets = [8, 0], sizes = [8, 32], strides = [1, 1]} : vector<16x32xf32> to vector<8x32xf32>
    %117 = vector.extract_strided_slice %114 {offsets = [0, 0], sizes = [8, 8], strides = [1, 1]} : vector<8x32xf32> to vector<8x8xf32>
    %118 = vector.extract_strided_slice %115 {offsets = [0, 0], sizes = [8, 8], strides = [1, 1]} : vector<8x32xf32> to vector<8x8xf32>
    %119 = vector.extract_strided_slice %116 {offsets = [0, 0], sizes = [8, 8], strides = [1, 1]} : vector<8x32xf32> to vector<8x8xf32>
    %120 = tpu.transpose %118, [1, 0] : vector<8x8xf32> -> vector<8x8xf32>
    %cst_35 = arith.constant dense<0.000000e+00> : vector<8x8xf32>
    %121 = tpu.matmul %117, %120, %cst_35 {dimension_numbers = #tpu.dot_dimension_numbers<[1], [0], [0], [1], [0, 0, 1, 1], [], []>} : vector<8x8xf32>, vector<8x8xf32>, vector<8x8xf32> -> vector<8x8xf32>
    %cst_36 = arith.constant dense<0xFF800000> : vector<8xf32>
    %122 = vector.multi_reduction <maximumf>, %121, %cst_36 [1] : vector<8x8xf32> to vector<8xf32>
    %123 = vector.shape_cast %122 : vector<8xf32> to vector<8x1xf32>
    %124 = vector.broadcast %123 : vector<8x1xf32> to vector<8x8xf32>
    %125 = arith.subf %121, %124 : vector<8x8xf32>
    %126 = math.exp %125 : vector<8x8xf32>
    %cst_37 = arith.constant dense<0.000000e+00> : vector<8xf32>
    %127 = vector.multi_reduction <add>, %126, %cst_37 [1] : vector<8x8xf32> to vector<8xf32>
    %128 = vector.shape_cast %127 : vector<8xf32> to vector<8x1xf32>
    %cst_38 = arith.constant dense<0.000000e+00> : vector<8x8xf32>
    %129 = tpu.matmul %126, %119, %cst_38 {dimension_numbers = #tpu.dot_dimension_numbers<[1], [0], [0], [1], [0, 0, 1, 1], [], []>} : vector<8x8xf32>, vector<8x8xf32>, vector<8x8xf32> -> vector<8x8xf32>
    %cst_39 = arith.constant 1.000000e+00 : f32
    %130 = vector.broadcast %cst_39 : f32 to vector<8x1xf32>
    %131 = arith.divf %130, %128 : vector<8x1xf32>
    %132 = vector.broadcast %131 : vector<8x1xf32> to vector<8x8xf32>
    %133 = arith.mulf %129, %132 : vector<8x8xf32>
    %134 = vector.extract_strided_slice %114 {offsets = [0, 8], sizes = [8, 8], strides = [1, 1]} : vector<8x32xf32> to vector<8x8xf32>
    %135 = vector.extract_strided_slice %115 {offsets = [0, 8], sizes = [8, 8], strides = [1, 1]} : vector<8x32xf32> to vector<8x8xf32>
    %136 = vector.extract_strided_slice %116 {offsets = [0, 8], sizes = [8, 8], strides = [1, 1]} : vector<8x32xf32> to vector<8x8xf32>
    %137 = tpu.transpose %135, [1, 0] : vector<8x8xf32> -> vector<8x8xf32>
    %cst_40 = arith.constant dense<0.000000e+00> : vector<8x8xf32>
    %138 = tpu.matmul %134, %137, %cst_40 {dimension_numbers = #tpu.dot_dimension_numbers<[1], [0], [0], [1], [0, 0, 1, 1], [], []>} : vector<8x8xf32>, vector<8x8xf32>, vector<8x8xf32> -> vector<8x8xf32>
    %cst_41 = arith.constant dense<0xFF800000> : vector<8xf32>
    %139 = vector.multi_reduction <maximumf>, %138, %cst_41 [1] : vector<8x8xf32> to vector<8xf32>
    %140 = vector.shape_cast %139 : vector<8xf32> to vector<8x1xf32>
    %141 = vector.broadcast %140 : vector<8x1xf32> to vector<8x8xf32>
    %142 = arith.subf %138, %141 : vector<8x8xf32>
    %143 = math.exp %142 : vector<8x8xf32>
    %cst_42 = arith.constant dense<0.000000e+00> : vector<8xf32>
    %144 = vector.multi_reduction <add>, %143, %cst_42 [1] : vector<8x8xf32> to vector<8xf32>
    %145 = vector.shape_cast %144 : vector<8xf32> to vector<8x1xf32>
    %cst_43 = arith.constant dense<0.000000e+00> : vector<8x8xf32>
    %146 = tpu.matmul %143, %136, %cst_43 {dimension_numbers = #tpu.dot_dimension_numbers<[1], [0], [0], [1], [0, 0, 1, 1], [], []>} : vector<8x8xf32>, vector<8x8xf32>, vector<8x8xf32> -> vector<8x8xf32>
    %cst_44 = arith.constant 1.000000e+00 : f32
    %147 = vector.broadcast %cst_44 : f32 to vector<8x1xf32>
    %148 = arith.divf %147, %145 : vector<8x1xf32>
    %149 = vector.broadcast %148 : vector<8x1xf32> to vector<8x8xf32>
    %150 = arith.mulf %146, %149 : vector<8x8xf32>
    %151 = vector.extract_strided_slice %114 {offsets = [0, 16], sizes = [8, 8], strides = [1, 1]} : vector<8x32xf32> to vector<8x8xf32>
    %152 = vector.extract_strided_slice %115 {offsets = [0, 16], sizes = [8, 8], strides = [1, 1]} : vector<8x32xf32> to vector<8x8xf32>
    %153 = vector.extract_strided_slice %116 {offsets = [0, 16], sizes = [8, 8], strides = [1, 1]} : vector<8x32xf32> to vector<8x8xf32>
    %154 = tpu.transpose %152, [1, 0] : vector<8x8xf32> -> vector<8x8xf32>
    %cst_45 = arith.constant dense<0.000000e+00> : vector<8x8xf32>
    %155 = tpu.matmul %151, %154, %cst_45 {dimension_numbers = #tpu.dot_dimension_numbers<[1], [0], [0], [1], [0, 0, 1, 1], [], []>} : vector<8x8xf32>, vector<8x8xf32>, vector<8x8xf32> -> vector<8x8xf32>
    %cst_46 = arith.constant dense<0xFF800000> : vector<8xf32>
    %156 = vector.multi_reduction <maximumf>, %155, %cst_46 [1] : vector<8x8xf32> to vector<8xf32>
    %157 = vector.shape_cast %156 : vector<8xf32> to vector<8x1xf32>
    %158 = vector.broadcast %157 : vector<8x1xf32> to vector<8x8xf32>
    %159 = arith.subf %155, %158 : vector<8x8xf32>
    %160 = math.exp %159 : vector<8x8xf32>
    %cst_47 = arith.constant dense<0.000000e+00> : vector<8xf32>
    %161 = vector.multi_reduction <add>, %160, %cst_47 [1] : vector<8x8xf32> to vector<8xf32>
    %162 = vector.shape_cast %161 : vector<8xf32> to vector<8x1xf32>
    %cst_48 = arith.constant dense<0.000000e+00> : vector<8x8xf32>
    %163 = tpu.matmul %160, %153, %cst_48 {dimension_numbers = #tpu.dot_dimension_numbers<[1], [0], [0], [1], [0, 0, 1, 1], [], []>} : vector<8x8xf32>, vector<8x8xf32>, vector<8x8xf32> -> vector<8x8xf32>
    %cst_49 = arith.constant 1.000000e+00 : f32
    %164 = vector.broadcast %cst_49 : f32 to vector<8x1xf32>
    %165 = arith.divf %164, %162 : vector<8x1xf32>
    %166 = vector.broadcast %165 : vector<8x1xf32> to vector<8x8xf32>
    %167 = arith.mulf %163, %166 : vector<8x8xf32>
    %168 = vector.extract_strided_slice %114 {offsets = [0, 24], sizes = [8, 8], strides = [1, 1]} : vector<8x32xf32> to vector<8x8xf32>
    %169 = vector.extract_strided_slice %115 {offsets = [0, 24], sizes = [8, 8], strides = [1, 1]} : vector<8x32xf32> to vector<8x8xf32>
    %170 = vector.extract_strided_slice %116 {offsets = [0, 24], sizes = [8, 8], strides = [1, 1]} : vector<8x32xf32> to vector<8x8xf32>
    %171 = tpu.transpose %169, [1, 0] : vector<8x8xf32> -> vector<8x8xf32>
    %cst_50 = arith.constant dense<0.000000e+00> : vector<8x8xf32>
    %172 = tpu.matmul %168, %171, %cst_50 {dimension_numbers = #tpu.dot_dimension_numbers<[1], [0], [0], [1], [0, 0, 1, 1], [], []>} : vector<8x8xf32>, vector<8x8xf32>, vector<8x8xf32> -> vector<8x8xf32>
    %cst_51 = arith.constant dense<0xFF800000> : vector<8xf32>
    %173 = vector.multi_reduction <maximumf>, %172, %cst_51 [1] : vector<8x8xf32> to vector<8xf32>
    %174 = vector.shape_cast %173 : vector<8xf32> to vector<8x1xf32>
    %175 = vector.broadcast %174 : vector<8x1xf32> to vector<8x8xf32>
    %176 = arith.subf %172, %175 : vector<8x8xf32>
    %177 = math.exp %176 : vector<8x8xf32>
    %cst_52 = arith.constant dense<0.000000e+00> : vector<8xf32>
    %178 = vector.multi_reduction <add>, %177, %cst_52 [1] : vector<8x8xf32> to vector<8xf32>
    %179 = vector.shape_cast %178 : vector<8xf32> to vector<8x1xf32>
    %cst_53 = arith.constant dense<0.000000e+00> : vector<8x8xf32>
    %180 = tpu.matmul %177, %170, %cst_53 {dimension_numbers = #tpu.dot_dimension_numbers<[1], [0], [0], [1], [0, 0, 1, 1], [], []>} : vector<8x8xf32>, vector<8x8xf32>, vector<8x8xf32> -> vector<8x8xf32>
    %cst_54 = arith.constant 1.000000e+00 : f32
    %181 = vector.broadcast %cst_54 : f32 to vector<8x1xf32>
    %182 = arith.divf %181, %179 : vector<8x1xf32>
    %183 = vector.broadcast %182 : vector<8x1xf32> to vector<8x8xf32>
    %184 = arith.mulf %180, %183 : vector<8x8xf32>
    %185 = tpu.concatenate %133, %150, %167, %184 in 1 : vector<8x8xf32>, vector<8x8xf32>, vector<8x8xf32>, vector<8x8xf32> -> vector<8x32xf32>
    %186 = tpu.concatenate %113, %185 in 0 : vector<8x32xf32>, vector<8x32xf32> -> vector<16x32xf32>
    %cst_55 = arith.constant dense<0.000000e+00> : vector<16x32xf32>
    %187 = tpu.matmul %186, %24, %cst_55 {dimension_numbers = #tpu.dot_dimension_numbers<[1], [0], [0], [1], [0, 0, 1, 1], [], []>} : vector<16x32xf32>, vector<32x32xf32>, vector<16x32xf32> -> vector<16x32xf32>
    %188 = vector.shape_cast %12 : vector<32xf32> to vector<1x32xf32>
    %189 = vector.broadcast %188 : vector<1x32xf32> to vector<16x32xf32>
    %190 = arith.addf %187, %189 : vector<16x32xf32>
    %191 = arith.addf %0, %190 : vector<16x32xf32>
    %192 = vector.extract_strided_slice %19 {offsets = [0, 0], sizes = [1, 32], strides = [1, 1]} : vector<4x32xf32> to vector<1x32xf32>
    %193 = vector.shape_cast %192 : vector<1x32xf32> to vector<32xf32>
    %194 = vector.extract_strided_slice %20 {offsets = [0, 0], sizes = [1, 32], strides = [1, 1]} : vector<4x32xf32> to vector<1x32xf32>
    %195 = vector.shape_cast %194 : vector<1x32xf32> to vector<32xf32>
    %cst_56 = arith.constant dense<0.000000e+00> : vector<16xf32>
    %196 = vector.multi_reduction <add>, %191, %cst_56 [1] : vector<16x32xf32> to vector<16xf32>
    %197 = vector.shape_cast %196 : vector<16xf32> to vector<16x1xf32>
    %198 = arith.mulf %191, %191 : vector<16x32xf32>
    %cst_57 = arith.constant dense<0.000000e+00> : vector<16xf32>
    %199 = vector.multi_reduction <add>, %198, %cst_57 [1] : vector<16x32xf32> to vector<16xf32>
    %200 = vector.shape_cast %199 : vector<16xf32> to vector<16x1xf32>
    %cst_58 = arith.constant 3.125000e-02 : f32
    %201 = vector.broadcast %cst_58 : f32 to vector<16x1xf32>
    %202 = arith.mulf %197, %201 : vector<16x1xf32>
    %cst_59 = arith.constant 3.125000e-02 : f32
    %203 = vector.broadcast %cst_59 : f32 to vector<16x1xf32>
    %204 = arith.mulf %200, %203 : vector<16x1xf32>
    %205 = arith.mulf %202, %202 : vector<16x1xf32>
    %206 = arith.subf %204, %205 : vector<16x1xf32>
    %207 = vector.broadcast %202 : vector<16x1xf32> to vector<16x32xf32>
    %208 = arith.subf %191, %207 : vector<16x32xf32>
    %cst_60 = arith.constant 9.99999974E-6 : f32
    %209 = vector.broadcast %cst_60 : f32 to vector<16x1xf32>
    %210 = arith.addf %206, %209 : vector<16x1xf32>
    %211 = math.rsqrt %210 : vector<16x1xf32>
    %212 = vector.broadcast %211 : vector<16x1xf32> to vector<16x32xf32>
    %213 = arith.mulf %208, %212 : vector<16x32xf32>
    %214 = vector.shape_cast %193 : vector<32xf32> to vector<1x32xf32>
    %215 = vector.broadcast %214 : vector<1x32xf32> to vector<16x32xf32>
    %216 = arith.mulf %213, %215 : vector<16x32xf32>
    %217 = vector.shape_cast %195 : vector<32xf32> to vector<1x32xf32>
    %218 = vector.broadcast %217 : vector<1x32xf32> to vector<16x32xf32>
    %219 = arith.addf %216, %218 : vector<16x32xf32>
    %cst_61 = arith.constant dense<0.000000e+00> : vector<16x32xf32>
    %220 = tpu.matmul %219, %22, %cst_61 {dimension_numbers = #tpu.dot_dimension_numbers<[1], [0], [0], [1], [0, 0, 1, 1], [], []>} : vector<16x32xf32>, vector<32x32xf32>, vector<16x32xf32> -> vector<16x32xf32>
    %221 = vector.extract_strided_slice %10 {offsets = [0], sizes = [32], strides = [1]} : vector<96xf32> to vector<32xf32>
    %222 = vector.shape_cast %221 : vector<32xf32> to vector<1x32xf32>
    %223 = vector.broadcast %222 : vector<1x32xf32> to vector<16x32xf32>
    %224 = arith.addf %220, %223 : vector<16x32xf32>
    %cst_62 = arith.constant 0.353553385 : f32
    %225 = vector.broadcast %cst_62 : f32 to vector<16x32xf32>
    %226 = arith.mulf %224, %225 : vector<16x32xf32>
    %227 = vector.extract_strided_slice %226 {offsets = [0, 0], sizes = [8, 32], strides = [1, 1]} : vector<16x32xf32> to vector<8x32xf32>
    %228 = vector.extract_strided_slice %31 {offsets = [0, 0], sizes = [16, 32], strides = [1, 1]} : vector<32x32xf32> to vector<16x32xf32>
    %229 = vector.extract_strided_slice %32 {offsets = [0, 0], sizes = [16, 32], strides = [1, 1]} : vector<32x32xf32> to vector<16x32xf32>
    %230 = vector.extract_strided_slice %227 {offsets = [0, 0], sizes = [8, 8], strides = [1, 1]} : vector<8x32xf32> to vector<8x8xf32>
    %231 = vector.extract_strided_slice %228 {offsets = [0, 0], sizes = [16, 8], strides = [1, 1]} : vector<16x32xf32> to vector<16x8xf32>
    %232 = vector.extract_strided_slice %229 {offsets = [0, 0], sizes = [16, 8], strides = [1, 1]} : vector<16x32xf32> to vector<16x8xf32>
    %233 = tpu.transpose %231, [1, 0] : vector<16x8xf32> -> vector<8x16xf32>
    %cst_63 = arith.constant dense<0.000000e+00> : vector<8x16xf32>
    %234 = tpu.matmul %230, %233, %cst_63 {dimension_numbers = #tpu.dot_dimension_numbers<[1], [0], [0], [1], [0, 0, 1, 1], [], []>} : vector<8x8xf32>, vector<8x16xf32>, vector<8x16xf32> -> vector<8x16xf32>
    %cst_64 = arith.constant dense<0xFF800000> : vector<8xf32>
    %235 = vector.multi_reduction <maximumf>, %234, %cst_64 [1] : vector<8x16xf32> to vector<8xf32>
    %236 = vector.shape_cast %235 : vector<8xf32> to vector<8x1xf32>
    %237 = vector.broadcast %236 : vector<8x1xf32> to vector<8x16xf32>
    %238 = arith.subf %234, %237 : vector<8x16xf32>
    %239 = math.exp %238 : vector<8x16xf32>
    %cst_65 = arith.constant dense<0.000000e+00> : vector<8xf32>
    %240 = vector.multi_reduction <add>, %239, %cst_65 [1] : vector<8x16xf32> to vector<8xf32>
    %241 = vector.shape_cast %240 : vector<8xf32> to vector<8x1xf32>
    %cst_66 = arith.constant dense<0.000000e+00> : vector<8x8xf32>
    %242 = tpu.matmul %239, %232, %cst_66 {dimension_numbers = #tpu.dot_dimension_numbers<[1], [0], [0], [1], [0, 0, 1, 1], [], []>} : vector<8x16xf32>, vector<16x8xf32>, vector<8x8xf32> -> vector<8x8xf32>
    %cst_67 = arith.constant 1.000000e+00 : f32
    %243 = vector.broadcast %cst_67 : f32 to vector<8x1xf32>
    %244 = arith.divf %243, %241 : vector<8x1xf32>
    %245 = vector.broadcast %244 : vector<8x1xf32> to vector<8x8xf32>
    %246 = arith.mulf %242, %245 : vector<8x8xf32>
    %247 = vector.extract_strided_slice %227 {offsets = [0, 8], sizes = [8, 8], strides = [1, 1]} : vector<8x32xf32> to vector<8x8xf32>
    %248 = vector.extract_strided_slice %228 {offsets = [0, 8], sizes = [16, 8], strides = [1, 1]} : vector<16x32xf32> to vector<16x8xf32>
    %249 = vector.extract_strided_slice %229 {offsets = [0, 8], sizes = [16, 8], strides = [1, 1]} : vector<16x32xf32> to vector<16x8xf32>
    %250 = tpu.transpose %248, [1, 0] : vector<16x8xf32> -> vector<8x16xf32>
    %cst_68 = arith.constant dense<0.000000e+00> : vector<8x16xf32>
    %251 = tpu.matmul %247, %250, %cst_68 {dimension_numbers = #tpu.dot_dimension_numbers<[1], [0], [0], [1], [0, 0, 1, 1], [], []>} : vector<8x8xf32>, vector<8x16xf32>, vector<8x16xf32> -> vector<8x16xf32>
    %cst_69 = arith.constant dense<0xFF800000> : vector<8xf32>
    %252 = vector.multi_reduction <maximumf>, %251, %cst_69 [1] : vector<8x16xf32> to vector<8xf32>
    %253 = vector.shape_cast %252 : vector<8xf32> to vector<8x1xf32>
    %254 = vector.broadcast %253 : vector<8x1xf32> to vector<8x16xf32>
    %255 = arith.subf %251, %254 : vector<8x16xf32>
    %256 = math.exp %255 : vector<8x16xf32>
    %cst_70 = arith.constant dense<0.000000e+00> : vector<8xf32>
    %257 = vector.multi_reduction <add>, %256, %cst_70 [1] : vector<8x16xf32> to vector<8xf32>
    %258 = vector.shape_cast %257 : vector<8xf32> to vector<8x1xf32>
    %cst_71 = arith.constant dense<0.000000e+00> : vector<8x8xf32>
    %259 = tpu.matmul %256, %249, %cst_71 {dimension_numbers = #tpu.dot_dimension_numbers<[1], [0], [0], [1], [0, 0, 1, 1], [], []>} : vector<8x16xf32>, vector<16x8xf32>, vector<8x8xf32> -> vector<8x8xf32>
    %cst_72 = arith.constant 1.000000e+00 : f32
    %260 = vector.broadcast %cst_72 : f32 to vector<8x1xf32>
    %261 = arith.divf %260, %258 : vector<8x1xf32>
    %262 = vector.broadcast %261 : vector<8x1xf32> to vector<8x8xf32>
    %263 = arith.mulf %259, %262 : vector<8x8xf32>
    %264 = vector.extract_strided_slice %227 {offsets = [0, 16], sizes = [8, 8], strides = [1, 1]} : vector<8x32xf32> to vector<8x8xf32>
    %265 = vector.extract_strided_slice %228 {offsets = [0, 16], sizes = [16, 8], strides = [1, 1]} : vector<16x32xf32> to vector<16x8xf32>
    %266 = vector.extract_strided_slice %229 {offsets = [0, 16], sizes = [16, 8], strides = [1, 1]} : vector<16x32xf32> to vector<16x8xf32>
    %267 = tpu.transpose %265, [1, 0] : vector<16x8xf32> -> vector<8x16xf32>
    %cst_73 = arith.constant dense<0.000000e+00> : vector<8x16xf32>
    %268 = tpu.matmul %264, %267, %cst_73 {dimension_numbers = #tpu.dot_dimension_numbers<[1], [0], [0], [1], [0, 0, 1, 1], [], []>} : vector<8x8xf32>, vector<8x16xf32>, vector<8x16xf32> -> vector<8x16xf32>
    %cst_74 = arith.constant dense<0xFF800000> : vector<8xf32>
    %269 = vector.multi_reduction <maximumf>, %268, %cst_74 [1] : vector<8x16xf32> to vector<8xf32>
    %270 = vector.shape_cast %269 : vector<8xf32> to vector<8x1xf32>
    %271 = vector.broadcast %270 : vector<8x1xf32> to vector<8x16xf32>
    %272 = arith.subf %268, %271 : vector<8x16xf32>
    %273 = math.exp %272 : vector<8x16xf32>
    %cst_75 = arith.constant dense<0.000000e+00> : vector<8xf32>
    %274 = vector.multi_reduction <add>, %273, %cst_75 [1] : vector<8x16xf32> to vector<8xf32>
    %275 = vector.shape_cast %274 : vector<8xf32> to vector<8x1xf32>
    %cst_76 = arith.constant dense<0.000000e+00> : vector<8x8xf32>
    %276 = tpu.matmul %273, %266, %cst_76 {dimension_numbers = #tpu.dot_dimension_numbers<[1], [0], [0], [1], [0, 0, 1, 1], [], []>} : vector<8x16xf32>, vector<16x8xf32>, vector<8x8xf32> -> vector<8x8xf32>
    %cst_77 = arith.constant 1.000000e+00 : f32
    %277 = vector.broadcast %cst_77 : f32 to vector<8x1xf32>
    %278 = arith.divf %277, %275 : vector<8x1xf32>
    %279 = vector.broadcast %278 : vector<8x1xf32> to vector<8x8xf32>
    %280 = arith.mulf %276, %279 : vector<8x8xf32>
    %281 = vector.extract_strided_slice %227 {offsets = [0, 24], sizes = [8, 8], strides = [1, 1]} : vector<8x32xf32> to vector<8x8xf32>
    %282 = vector.extract_strided_slice %228 {offsets = [0, 24], sizes = [16, 8], strides = [1, 1]} : vector<16x32xf32> to vector<16x8xf32>
    %283 = vector.extract_strided_slice %229 {offsets = [0, 24], sizes = [16, 8], strides = [1, 1]} : vector<16x32xf32> to vector<16x8xf32>
    %284 = tpu.transpose %282, [1, 0] : vector<16x8xf32> -> vector<8x16xf32>
    %cst_78 = arith.constant dense<0.000000e+00> : vector<8x16xf32>
    %285 = tpu.matmul %281, %284, %cst_78 {dimension_numbers = #tpu.dot_dimension_numbers<[1], [0], [0], [1], [0, 0, 1, 1], [], []>} : vector<8x8xf32>, vector<8x16xf32>, vector<8x16xf32> -> vector<8x16xf32>
    %cst_79 = arith.constant dense<0xFF800000> : vector<8xf32>
    %286 = vector.multi_reduction <maximumf>, %285, %cst_79 [1] : vector<8x16xf32> to vector<8xf32>
    %287 = vector.shape_cast %286 : vector<8xf32> to vector<8x1xf32>
    %288 = vector.broadcast %287 : vector<8x1xf32> to vector<8x16xf32>
    %289 = arith.subf %285, %288 : vector<8x16xf32>
    %290 = math.exp %289 : vector<8x16xf32>
    %cst_80 = arith.constant dense<0.000000e+00> : vector<8xf32>
    %291 = vector.multi_reduction <add>, %290, %cst_80 [1] : vector<8x16xf32> to vector<8xf32>
    %292 = vector.shape_cast %291 : vector<8xf32> to vector<8x1xf32>
    %cst_81 = arith.constant dense<0.000000e+00> : vector<8x8xf32>
    %293 = tpu.matmul %290, %283, %cst_81 {dimension_numbers = #tpu.dot_dimension_numbers<[1], [0], [0], [1], [0, 0, 1, 1], [], []>} : vector<8x16xf32>, vector<16x8xf32>, vector<8x8xf32> -> vector<8x8xf32>
    %cst_82 = arith.constant 1.000000e+00 : f32
    %294 = vector.broadcast %cst_82 : f32 to vector<8x1xf32>
    %295 = arith.divf %294, %292 : vector<8x1xf32>
    %296 = vector.broadcast %295 : vector<8x1xf32> to vector<8x8xf32>
    %297 = arith.mulf %293, %296 : vector<8x8xf32>
    %298 = tpu.concatenate %246, %263, %280, %297 in 1 : vector<8x8xf32>, vector<8x8xf32>, vector<8x8xf32>, vector<8x8xf32> -> vector<8x32xf32>
    %299 = vector.extract_strided_slice %226 {offsets = [8, 0], sizes = [8, 32], strides = [1, 1]} : vector<16x32xf32> to vector<8x32xf32>
    %300 = vector.extract_strided_slice %31 {offsets = [16, 0], sizes = [16, 32], strides = [1, 1]} : vector<32x32xf32> to vector<16x32xf32>
    %301 = vector.extract_strided_slice %32 {offsets = [16, 0], sizes = [16, 32], strides = [1, 1]} : vector<32x32xf32> to vector<16x32xf32>
    %302 = vector.extract_strided_slice %299 {offsets = [0, 0], sizes = [8, 8], strides = [1, 1]} : vector<8x32xf32> to vector<8x8xf32>
    %303 = vector.extract_strided_slice %300 {offsets = [0, 0], sizes = [16, 8], strides = [1, 1]} : vector<16x32xf32> to vector<16x8xf32>
    %304 = vector.extract_strided_slice %301 {offsets = [0, 0], sizes = [16, 8], strides = [1, 1]} : vector<16x32xf32> to vector<16x8xf32>
    %305 = tpu.transpose %303, [1, 0] : vector<16x8xf32> -> vector<8x16xf32>
    %cst_83 = arith.constant dense<0.000000e+00> : vector<8x16xf32>
    %306 = tpu.matmul %302, %305, %cst_83 {dimension_numbers = #tpu.dot_dimension_numbers<[1], [0], [0], [1], [0, 0, 1, 1], [], []>} : vector<8x8xf32>, vector<8x16xf32>, vector<8x16xf32> -> vector<8x16xf32>
    %cst_84 = arith.constant dense<0xFF800000> : vector<8xf32>
    %307 = vector.multi_reduction <maximumf>, %306, %cst_84 [1] : vector<8x16xf32> to vector<8xf32>
    %308 = vector.shape_cast %307 : vector<8xf32> to vector<8x1xf32>
    %309 = vector.broadcast %308 : vector<8x1xf32> to vector<8x16xf32>
    %310 = arith.subf %306, %309 : vector<8x16xf32>
    %311 = math.exp %310 : vector<8x16xf32>
    %cst_85 = arith.constant dense<0.000000e+00> : vector<8xf32>
    %312 = vector.multi_reduction <add>, %311, %cst_85 [1] : vector<8x16xf32> to vector<8xf32>
    %313 = vector.shape_cast %312 : vector<8xf32> to vector<8x1xf32>
    %cst_86 = arith.constant dense<0.000000e+00> : vector<8x8xf32>
    %314 = tpu.matmul %311, %304, %cst_86 {dimension_numbers = #tpu.dot_dimension_numbers<[1], [0], [0], [1], [0, 0, 1, 1], [], []>} : vector<8x16xf32>, vector<16x8xf32>, vector<8x8xf32> -> vector<8x8xf32>
    %cst_87 = arith.constant 1.000000e+00 : f32
    %315 = vector.broadcast %cst_87 : f32 to vector<8x1xf32>
    %316 = arith.divf %315, %313 : vector<8x1xf32>
    %317 = vector.broadcast %316 : vector<8x1xf32> to vector<8x8xf32>
    %318 = arith.mulf %314, %317 : vector<8x8xf32>
    %319 = vector.extract_strided_slice %299 {offsets = [0, 8], sizes = [8, 8], strides = [1, 1]} : vector<8x32xf32> to vector<8x8xf32>
    %320 = vector.extract_strided_slice %300 {offsets = [0, 8], sizes = [16, 8], strides = [1, 1]} : vector<16x32xf32> to vector<16x8xf32>
    %321 = vector.extract_strided_slice %301 {offsets = [0, 8], sizes = [16, 8], strides = [1, 1]} : vector<16x32xf32> to vector<16x8xf32>
    %322 = tpu.transpose %320, [1, 0] : vector<16x8xf32> -> vector<8x16xf32>
    %cst_88 = arith.constant dense<0.000000e+00> : vector<8x16xf32>
    %323 = tpu.matmul %319, %322, %cst_88 {dimension_numbers = #tpu.dot_dimension_numbers<[1], [0], [0], [1], [0, 0, 1, 1], [], []>} : vector<8x8xf32>, vector<8x16xf32>, vector<8x16xf32> -> vector<8x16xf32>
    %cst_89 = arith.constant dense<0xFF800000> : vector<8xf32>
    %324 = vector.multi_reduction <maximumf>, %323, %cst_89 [1] : vector<8x16xf32> to vector<8xf32>
    %325 = vector.shape_cast %324 : vector<8xf32> to vector<8x1xf32>
    %326 = vector.broadcast %325 : vector<8x1xf32> to vector<8x16xf32>
    %327 = arith.subf %323, %326 : vector<8x16xf32>
    %328 = math.exp %327 : vector<8x16xf32>
    %cst_90 = arith.constant dense<0.000000e+00> : vector<8xf32>
    %329 = vector.multi_reduction <add>, %328, %cst_90 [1] : vector<8x16xf32> to vector<8xf32>
    %330 = vector.shape_cast %329 : vector<8xf32> to vector<8x1xf32>
    %cst_91 = arith.constant dense<0.000000e+00> : vector<8x8xf32>
    %331 = tpu.matmul %328, %321, %cst_91 {dimension_numbers = #tpu.dot_dimension_numbers<[1], [0], [0], [1], [0, 0, 1, 1], [], []>} : vector<8x16xf32>, vector<16x8xf32>, vector<8x8xf32> -> vector<8x8xf32>
    %cst_92 = arith.constant 1.000000e+00 : f32
    %332 = vector.broadcast %cst_92 : f32 to vector<8x1xf32>
    %333 = arith.divf %332, %330 : vector<8x1xf32>
    %334 = vector.broadcast %333 : vector<8x1xf32> to vector<8x8xf32>
    %335 = arith.mulf %331, %334 : vector<8x8xf32>
    %336 = vector.extract_strided_slice %299 {offsets = [0, 16], sizes = [8, 8], strides = [1, 1]} : vector<8x32xf32> to vector<8x8xf32>
    %337 = vector.extract_strided_slice %300 {offsets = [0, 16], sizes = [16, 8], strides = [1, 1]} : vector<16x32xf32> to vector<16x8xf32>
    %338 = vector.extract_strided_slice %301 {offsets = [0, 16], sizes = [16, 8], strides = [1, 1]} : vector<16x32xf32> to vector<16x8xf32>
    %339 = tpu.transpose %337, [1, 0] : vector<16x8xf32> -> vector<8x16xf32>
    %cst_93 = arith.constant dense<0.000000e+00> : vector<8x16xf32>
    %340 = tpu.matmul %336, %339, %cst_93 {dimension_numbers = #tpu.dot_dimension_numbers<[1], [0], [0], [1], [0, 0, 1, 1], [], []>} : vector<8x8xf32>, vector<8x16xf32>, vector<8x16xf32> -> vector<8x16xf32>
    %cst_94 = arith.constant dense<0xFF800000> : vector<8xf32>
    %341 = vector.multi_reduction <maximumf>, %340, %cst_94 [1] : vector<8x16xf32> to vector<8xf32>
    %342 = vector.shape_cast %341 : vector<8xf32> to vector<8x1xf32>
    %343 = vector.broadcast %342 : vector<8x1xf32> to vector<8x16xf32>
    %344 = arith.subf %340, %343 : vector<8x16xf32>
    %345 = math.exp %344 : vector<8x16xf32>
    %cst_95 = arith.constant dense<0.000000e+00> : vector<8xf32>
    %346 = vector.multi_reduction <add>, %345, %cst_95 [1] : vector<8x16xf32> to vector<8xf32>
    %347 = vector.shape_cast %346 : vector<8xf32> to vector<8x1xf32>
    %cst_96 = arith.constant dense<0.000000e+00> : vector<8x8xf32>
    %348 = tpu.matmul %345, %338, %cst_96 {dimension_numbers = #tpu.dot_dimension_numbers<[1], [0], [0], [1], [0, 0, 1, 1], [], []>} : vector<8x16xf32>, vector<16x8xf32>, vector<8x8xf32> -> vector<8x8xf32>
    %cst_97 = arith.constant 1.000000e+00 : f32
    %349 = vector.broadcast %cst_97 : f32 to vector<8x1xf32>
    %350 = arith.divf %349, %347 : vector<8x1xf32>
    %351 = vector.broadcast %350 : vector<8x1xf32> to vector<8x8xf32>
    %352 = arith.mulf %348, %351 : vector<8x8xf32>
    %353 = vector.extract_strided_slice %299 {offsets = [0, 24], sizes = [8, 8], strides = [1, 1]} : vector<8x32xf32> to vector<8x8xf32>
    %354 = vector.extract_strided_slice %300 {offsets = [0, 24], sizes = [16, 8], strides = [1, 1]} : vector<16x32xf32> to vector<16x8xf32>
    %355 = vector.extract_strided_slice %301 {offsets = [0, 24], sizes = [16, 8], strides = [1, 1]} : vector<16x32xf32> to vector<16x8xf32>
    %356 = tpu.transpose %354, [1, 0] : vector<16x8xf32> -> vector<8x16xf32>
    %cst_98 = arith.constant dense<0.000000e+00> : vector<8x16xf32>
    %357 = tpu.matmul %353, %356, %cst_98 {dimension_numbers = #tpu.dot_dimension_numbers<[1], [0], [0], [1], [0, 0, 1, 1], [], []>} : vector<8x8xf32>, vector<8x16xf32>, vector<8x16xf32> -> vector<8x16xf32>
    %cst_99 = arith.constant dense<0xFF800000> : vector<8xf32>
    %358 = vector.multi_reduction <maximumf>, %357, %cst_99 [1] : vector<8x16xf32> to vector<8xf32>
    %359 = vector.shape_cast %358 : vector<8xf32> to vector<8x1xf32>
    %360 = vector.broadcast %359 : vector<8x1xf32> to vector<8x16xf32>
    %361 = arith.subf %357, %360 : vector<8x16xf32>
    %362 = math.exp %361 : vector<8x16xf32>
    %cst_100 = arith.constant dense<0.000000e+00> : vector<8xf32>
    %363 = vector.multi_reduction <add>, %362, %cst_100 [1] : vector<8x16xf32> to vector<8xf32>
    %364 = vector.shape_cast %363 : vector<8xf32> to vector<8x1xf32>
    %cst_101 = arith.constant dense<0.000000e+00> : vector<8x8xf32>
    %365 = tpu.matmul %362, %355, %cst_101 {dimension_numbers = #tpu.dot_dimension_numbers<[1], [0], [0], [1], [0, 0, 1, 1], [], []>} : vector<8x16xf32>, vector<16x8xf32>, vector<8x8xf32> -> vector<8x8xf32>
    %cst_102 = arith.constant 1.000000e+00 : f32
    %366 = vector.broadcast %cst_102 : f32 to vector<8x1xf32>
    %367 = arith.divf %366, %364 : vector<8x1xf32>
    %368 = vector.broadcast %367 : vector<8x1xf32> to vector<8x8xf32>
    %369 = arith.mulf %365, %368 : vector<8x8xf32>
    %370 = tpu.concatenate %318, %335, %352, %369 in 1 : vector<8x8xf32>, vector<8x8xf32>, vector<8x8xf32>, vector<8x8xf32> -> vector<8x32xf32>
    %371 = tpu.concatenate %298, %370 in 0 : vector<8x32xf32>, vector<8x32xf32> -> vector<16x32xf32>
    %cst_103 = arith.constant dense<0.000000e+00> : vector<16x32xf32>
    %372 = tpu.matmul %371, %25, %cst_103 {dimension_numbers = #tpu.dot_dimension_numbers<[1], [0], [0], [1], [0, 0, 1, 1], [], []>} : vector<16x32xf32>, vector<32x32xf32>, vector<16x32xf32> -> vector<16x32xf32>
    %373 = vector.shape_cast %14 : vector<32xf32> to vector<1x32xf32>
    %374 = vector.broadcast %373 : vector<1x32xf32> to vector<16x32xf32>
    %375 = arith.addf %372, %374 : vector<16x32xf32>
    %376 = arith.addf %219, %375 : vector<16x32xf32>
    %377 = vector.extract_strided_slice %19 {offsets = [1, 0], sizes = [1, 32], strides = [1, 1]} : vector<4x32xf32> to vector<1x32xf32>
    %378 = vector.shape_cast %377 : vector<1x32xf32> to vector<32xf32>
    %379 = vector.extract_strided_slice %20 {offsets = [1, 0], sizes = [1, 32], strides = [1, 1]} : vector<4x32xf32> to vector<1x32xf32>
    %380 = vector.shape_cast %379 : vector<1x32xf32> to vector<32xf32>
    %cst_104 = arith.constant dense<0.000000e+00> : vector<16xf32>
    %381 = vector.multi_reduction <add>, %376, %cst_104 [1] : vector<16x32xf32> to vector<16xf32>
    %382 = vector.shape_cast %381 : vector<16xf32> to vector<16x1xf32>
    %383 = arith.mulf %376, %376 : vector<16x32xf32>
    %cst_105 = arith.constant dense<0.000000e+00> : vector<16xf32>
    %384 = vector.multi_reduction <add>, %383, %cst_105 [1] : vector<16x32xf32> to vector<16xf32>
    %385 = vector.shape_cast %384 : vector<16xf32> to vector<16x1xf32>
    %cst_106 = arith.constant 3.125000e-02 : f32
    %386 = vector.broadcast %cst_106 : f32 to vector<16x1xf32>
    %387 = arith.mulf %382, %386 : vector<16x1xf32>
    %cst_107 = arith.constant 3.125000e-02 : f32
    %388 = vector.broadcast %cst_107 : f32 to vector<16x1xf32>
    %389 = arith.mulf %385, %388 : vector<16x1xf32>
    %390 = arith.mulf %387, %387 : vector<16x1xf32>
    %391 = arith.subf %389, %390 : vector<16x1xf32>
    %392 = vector.broadcast %387 : vector<16x1xf32> to vector<16x32xf32>
    %393 = arith.subf %376, %392 : vector<16x32xf32>
    %cst_108 = arith.constant 9.99999974E-6 : f32
    %394 = vector.broadcast %cst_108 : f32 to vector<16x1xf32>
    %395 = arith.addf %391, %394 : vector<16x1xf32>
    %396 = math.rsqrt %395 : vector<16x1xf32>
    %397 = vector.broadcast %396 : vector<16x1xf32> to vector<16x32xf32>
    %398 = arith.mulf %393, %397 : vector<16x32xf32>
    %399 = vector.shape_cast %378 : vector<32xf32> to vector<1x32xf32>
    %400 = vector.broadcast %399 : vector<1x32xf32> to vector<16x32xf32>
    %401 = arith.mulf %398, %400 : vector<16x32xf32>
    %402 = vector.shape_cast %380 : vector<32xf32> to vector<1x32xf32>
    %403 = vector.broadcast %402 : vector<1x32xf32> to vector<16x32xf32>
    %404 = arith.addf %401, %403 : vector<16x32xf32>
    %cst_109 = arith.constant dense<0.000000e+00> : vector<16x64xf32>
    %405 = tpu.matmul %404, %4, %cst_109 {dimension_numbers = #tpu.dot_dimension_numbers<[1], [0], [0], [1], [0, 0, 1, 1], [], []>} : vector<16x32xf32>, vector<32x64xf32>, vector<16x64xf32> -> vector<16x64xf32>
    %406 = vector.shape_cast %16 : vector<64xf32> to vector<1x64xf32>
    %407 = vector.broadcast %406 : vector<1x64xf32> to vector<16x64xf32>
    %408 = arith.addf %405, %407 : vector<16x64xf32>
    %cst_110 = arith.constant 0.000000e+00 : f32
    %409 = vector.broadcast %cst_110 : f32 to vector<16x64xf32>
    %410 = arith.maximumf %408, %409 : vector<16x64xf32>
    %cst_111 = arith.constant dense<0.000000e+00> : vector<16x32xf32>
    %411 = tpu.matmul %410, %5, %cst_111 {dimension_numbers = #tpu.dot_dimension_numbers<[1], [0], [0], [1], [0, 0, 1, 1], [], []>} : vector<16x64xf32>, vector<64x32xf32>, vector<16x32xf32> -> vector<16x32xf32>
    %412 = arith.addf %404, %411 : vector<16x32xf32>
    %413 = vector.shape_cast %18 : vector<32xf32> to vector<1x32xf32>
    %414 = vector.broadcast %413 : vector<1x32xf32> to vector<16x32xf32>
    %415 = arith.addf %412, %414 : vector<16x32xf32>
    %416 = vector.extract_strided_slice %19 {offsets = [2, 0], sizes = [1, 32], strides = [1, 1]} : vector<4x32xf32> to vector<1x32xf32>
    %417 = vector.shape_cast %416 : vector<1x32xf32> to vector<32xf32>
    %418 = vector.extract_strided_slice %20 {offsets = [2, 0], sizes = [1, 32], strides = [1, 1]} : vector<4x32xf32> to vector<1x32xf32>
    %419 = vector.shape_cast %418 : vector<1x32xf32> to vector<32xf32>
    %cst_112 = arith.constant dense<0.000000e+00> : vector<16xf32>
    %420 = vector.multi_reduction <add>, %415, %cst_112 [1] : vector<16x32xf32> to vector<16xf32>
    %421 = vector.shape_cast %420 : vector<16xf32> to vector<16x1xf32>
    %422 = arith.mulf %415, %415 : vector<16x32xf32>
    %cst_113 = arith.constant dense<0.000000e+00> : vector<16xf32>
    %423 = vector.multi_reduction <add>, %422, %cst_113 [1] : vector<16x32xf32> to vector<16xf32>
    %424 = vector.shape_cast %423 : vector<16xf32> to vector<16x1xf32>
    %cst_114 = arith.constant 3.125000e-02 : f32
    %425 = vector.broadcast %cst_114 : f32 to vector<16x1xf32>
    %426 = arith.mulf %421, %425 : vector<16x1xf32>
    %cst_115 = arith.constant 3.125000e-02 : f32
    %427 = vector.broadcast %cst_115 : f32 to vector<16x1xf32>
    %428 = arith.mulf %424, %427 : vector<16x1xf32>
    %429 = arith.mulf %426, %426 : vector<16x1xf32>
    %430 = arith.subf %428, %429 : vector<16x1xf32>
    %431 = vector.broadcast %426 : vector<16x1xf32> to vector<16x32xf32>
    %432 = arith.subf %415, %431 : vector<16x32xf32>
    %cst_116 = arith.constant 9.99999974E-6 : f32
    %433 = vector.broadcast %cst_116 : f32 to vector<16x1xf32>
    %434 = arith.addf %430, %433 : vector<16x1xf32>
    %435 = math.rsqrt %434 : vector<16x1xf32>
    %436 = vector.broadcast %435 : vector<16x1xf32> to vector<16x32xf32>
    %437 = arith.mulf %432, %436 : vector<16x32xf32>
    %438 = vector.shape_cast %417 : vector<32xf32> to vector<1x32xf32>
    %439 = vector.broadcast %438 : vector<1x32xf32> to vector<16x32xf32>
    %440 = arith.mulf %437, %439 : vector<16x32xf32>
    %441 = vector.shape_cast %419 : vector<32xf32> to vector<1x32xf32>
    %442 = vector.broadcast %441 : vector<1x32xf32> to vector<16x32xf32>
    %443 = arith.addf %440, %442 : vector<16x32xf32>
    %cst_117 = arith.constant dense<0.000000e+00> : vector<16x96xf32>
    %444 = tpu.matmul %443, %21, %cst_117 {dimension_numbers = #tpu.dot_dimension_numbers<[1], [0], [0], [1], [0, 0, 1, 1], [], []>} : vector<16x32xf32>, vector<32x96xf32>, vector<16x96xf32> -> vector<16x96xf32>
    %445 = vector.shape_cast %8 : vector<96xf32> to vector<1x96xf32>
    %446 = vector.broadcast %445 : vector<1x96xf32> to vector<16x96xf32>
    %447 = arith.addf %444, %446 : vector<16x96xf32>
    %448 = vector.extract_strided_slice %447 {offsets = [0, 0], sizes = [16, 32], strides = [1, 1]} : vector<16x96xf32> to vector<16x32xf32>
    %cst_118 = arith.constant 0.353553385 : f32
    %449 = vector.broadcast %cst_118 : f32 to vector<16x32xf32>
    %450 = arith.mulf %448, %449 : vector<16x32xf32>
    %451 = vector.extract_strided_slice %447 {offsets = [0, 32], sizes = [16, 32], strides = [1, 1]} : vector<16x96xf32> to vector<16x32xf32>
    %452 = vector.extract_strided_slice %447 {offsets = [0, 64], sizes = [16, 32], strides = [1, 1]} : vector<16x96xf32> to vector<16x32xf32>
    %453 = vector.extract_strided_slice %450 {offsets = [0, 0], sizes = [8, 32], strides = [1, 1]} : vector<16x32xf32> to vector<8x32xf32>
    %454 = vector.extract_strided_slice %451 {offsets = [0, 0], sizes = [8, 32], strides = [1, 1]} : vector<16x32xf32> to vector<8x32xf32>
    %455 = vector.extract_strided_slice %452 {offsets = [0, 0], sizes = [8, 32], strides = [1, 1]} : vector<16x32xf32> to vector<8x32xf32>
    %456 = vector.extract_strided_slice %453 {offsets = [0, 0], sizes = [8, 8], strides = [1, 1]} : vector<8x32xf32> to vector<8x8xf32>
    %457 = vector.extract_strided_slice %454 {offsets = [0, 0], sizes = [8, 8], strides = [1, 1]} : vector<8x32xf32> to vector<8x8xf32>
    %458 = vector.extract_strided_slice %455 {offsets = [0, 0], sizes = [8, 8], strides = [1, 1]} : vector<8x32xf32> to vector<8x8xf32>
    %459 = tpu.transpose %457, [1, 0] : vector<8x8xf32> -> vector<8x8xf32>
    %cst_119 = arith.constant dense<0.000000e+00> : vector<8x8xf32>
    %460 = tpu.matmul %456, %459, %cst_119 {dimension_numbers = #tpu.dot_dimension_numbers<[1], [0], [0], [1], [0, 0, 1, 1], [], []>} : vector<8x8xf32>, vector<8x8xf32>, vector<8x8xf32> -> vector<8x8xf32>
    %cst_120 = arith.constant dense<0xFF800000> : vector<8xf32>
    %461 = vector.multi_reduction <maximumf>, %460, %cst_120 [1] : vector<8x8xf32> to vector<8xf32>
    %462 = vector.shape_cast %461 : vector<8xf32> to vector<8x1xf32>
    %463 = vector.broadcast %462 : vector<8x1xf32> to vector<8x8xf32>
    %464 = arith.subf %460, %463 : vector<8x8xf32>
    %465 = math.exp %464 : vector<8x8xf32>
    %cst_121 = arith.constant dense<0.000000e+00> : vector<8xf32>
    %466 = vector.multi_reduction <add>, %465, %cst_121 [1] : vector<8x8xf32> to vector<8xf32>
    %467 = vector.shape_cast %466 : vector<8xf32> to vector<8x1xf32>
    %cst_122 = arith.constant dense<0.000000e+00> : vector<8x8xf32>
    %468 = tpu.matmul %465, %458, %cst_122 {dimension_numbers = #tpu.dot_dimension_numbers<[1], [0], [0], [1], [0, 0, 1, 1], [], []>} : vector<8x8xf32>, vector<8x8xf32>, vector<8x8xf32> -> vector<8x8xf32>
    %cst_123 = arith.constant 1.000000e+00 : f32
    %469 = vector.broadcast %cst_123 : f32 to vector<8x1xf32>
    %470 = arith.divf %469, %467 : vector<8x1xf32>
    %471 = vector.broadcast %470 : vector<8x1xf32> to vector<8x8xf32>
    %472 = arith.mulf %468, %471 : vector<8x8xf32>
    %473 = vector.extract_strided_slice %453 {offsets = [0, 8], sizes = [8, 8], strides = [1, 1]} : vector<8x32xf32> to vector<8x8xf32>
    %474 = vector.extract_strided_slice %454 {offsets = [0, 8], sizes = [8, 8], strides = [1, 1]} : vector<8x32xf32> to vector<8x8xf32>
    %475 = vector.extract_strided_slice %455 {offsets = [0, 8], sizes = [8, 8], strides = [1, 1]} : vector<8x32xf32> to vector<8x8xf32>
    %476 = tpu.transpose %474, [1, 0] : vector<8x8xf32> -> vector<8x8xf32>
    %cst_124 = arith.constant dense<0.000000e+00> : vector<8x8xf32>
    %477 = tpu.matmul %473, %476, %cst_124 {dimension_numbers = #tpu.dot_dimension_numbers<[1], [0], [0], [1], [0, 0, 1, 1], [], []>} : vector<8x8xf32>, vector<8x8xf32>, vector<8x8xf32> -> vector<8x8xf32>
    %cst_125 = arith.constant dense<0xFF800000> : vector<8xf32>
    %478 = vector.multi_reduction <maximumf>, %477, %cst_125 [1] : vector<8x8xf32> to vector<8xf32>
    %479 = vector.shape_cast %478 : vector<8xf32> to vector<8x1xf32>
    %480 = vector.broadcast %479 : vector<8x1xf32> to vector<8x8xf32>
    %481 = arith.subf %477, %480 : vector<8x8xf32>
    %482 = math.exp %481 : vector<8x8xf32>
    %cst_126 = arith.constant dense<0.000000e+00> : vector<8xf32>
    %483 = vector.multi_reduction <add>, %482, %cst_126 [1] : vector<8x8xf32> to vector<8xf32>
    %484 = vector.shape_cast %483 : vector<8xf32> to vector<8x1xf32>
    %cst_127 = arith.constant dense<0.000000e+00> : vector<8x8xf32>
    %485 = tpu.matmul %482, %475, %cst_127 {dimension_numbers = #tpu.dot_dimension_numbers<[1], [0], [0], [1], [0, 0, 1, 1], [], []>} : vector<8x8xf32>, vector<8x8xf32>, vector<8x8xf32> -> vector<8x8xf32>
    %cst_128 = arith.constant 1.000000e+00 : f32
    %486 = vector.broadcast %cst_128 : f32 to vector<8x1xf32>
    %487 = arith.divf %486, %484 : vector<8x1xf32>
    %488 = vector.broadcast %487 : vector<8x1xf32> to vector<8x8xf32>
    %489 = arith.mulf %485, %488 : vector<8x8xf32>
    %490 = vector.extract_strided_slice %453 {offsets = [0, 16], sizes = [8, 8], strides = [1, 1]} : vector<8x32xf32> to vector<8x8xf32>
    %491 = vector.extract_strided_slice %454 {offsets = [0, 16], sizes = [8, 8], strides = [1, 1]} : vector<8x32xf32> to vector<8x8xf32>
    %492 = vector.extract_strided_slice %455 {offsets = [0, 16], sizes = [8, 8], strides = [1, 1]} : vector<8x32xf32> to vector<8x8xf32>
    %493 = tpu.transpose %491, [1, 0] : vector<8x8xf32> -> vector<8x8xf32>
    %cst_129 = arith.constant dense<0.000000e+00> : vector<8x8xf32>
    %494 = tpu.matmul %490, %493, %cst_129 {dimension_numbers = #tpu.dot_dimension_numbers<[1], [0], [0], [1], [0, 0, 1, 1], [], []>} : vector<8x8xf32>, vector<8x8xf32>, vector<8x8xf32> -> vector<8x8xf32>
    %cst_130 = arith.constant dense<0xFF800000> : vector<8xf32>
    %495 = vector.multi_reduction <maximumf>, %494, %cst_130 [1] : vector<8x8xf32> to vector<8xf32>
    %496 = vector.shape_cast %495 : vector<8xf32> to vector<8x1xf32>
    %497 = vector.broadcast %496 : vector<8x1xf32> to vector<8x8xf32>
    %498 = arith.subf %494, %497 : vector<8x8xf32>
    %499 = math.exp %498 : vector<8x8xf32>
    %cst_131 = arith.constant dense<0.000000e+00> : vector<8xf32>
    %500 = vector.multi_reduction <add>, %499, %cst_131 [1] : vector<8x8xf32> to vector<8xf32>
    %501 = vector.shape_cast %500 : vector<8xf32> to vector<8x1xf32>
    %cst_132 = arith.constant dense<0.000000e+00> : vector<8x8xf32>
    %502 = tpu.matmul %499, %492, %cst_132 {dimension_numbers = #tpu.dot_dimension_numbers<[1], [0], [0], [1], [0, 0, 1, 1], [], []>} : vector<8x8xf32>, vector<8x8xf32>, vector<8x8xf32> -> vector<8x8xf32>
    %cst_133 = arith.constant 1.000000e+00 : f32
    %503 = vector.broadcast %cst_133 : f32 to vector<8x1xf32>
    %504 = arith.divf %503, %501 : vector<8x1xf32>
    %505 = vector.broadcast %504 : vector<8x1xf32> to vector<8x8xf32>
    %506 = arith.mulf %502, %505 : vector<8x8xf32>
    %507 = vector.extract_strided_slice %453 {offsets = [0, 24], sizes = [8, 8], strides = [1, 1]} : vector<8x32xf32> to vector<8x8xf32>
    %508 = vector.extract_strided_slice %454 {offsets = [0, 24], sizes = [8, 8], strides = [1, 1]} : vector<8x32xf32> to vector<8x8xf32>
    %509 = vector.extract_strided_slice %455 {offsets = [0, 24], sizes = [8, 8], strides = [1, 1]} : vector<8x32xf32> to vector<8x8xf32>
    %510 = tpu.transpose %508, [1, 0] : vector<8x8xf32> -> vector<8x8xf32>
    %cst_134 = arith.constant dense<0.000000e+00> : vector<8x8xf32>
    %511 = tpu.matmul %507, %510, %cst_134 {dimension_numbers = #tpu.dot_dimension_numbers<[1], [0], [0], [1], [0, 0, 1, 1], [], []>} : vector<8x8xf32>, vector<8x8xf32>, vector<8x8xf32> -> vector<8x8xf32>
    %cst_135 = arith.constant dense<0xFF800000> : vector<8xf32>
    %512 = vector.multi_reduction <maximumf>, %511, %cst_135 [1] : vector<8x8xf32> to vector<8xf32>
    %513 = vector.shape_cast %512 : vector<8xf32> to vector<8x1xf32>
    %514 = vector.broadcast %513 : vector<8x1xf32> to vector<8x8xf32>
    %515 = arith.subf %511, %514 : vector<8x8xf32>
    %516 = math.exp %515 : vector<8x8xf32>
    %cst_136 = arith.constant dense<0.000000e+00> : vector<8xf32>
    %517 = vector.multi_reduction <add>, %516, %cst_136 [1] : vector<8x8xf32> to vector<8xf32>
    %518 = vector.shape_cast %517 : vector<8xf32> to vector<8x1xf32>
    %cst_137 = arith.constant dense<0.000000e+00> : vector<8x8xf32>
    %519 = tpu.matmul %516, %509, %cst_137 {dimension_numbers = #tpu.dot_dimension_numbers<[1], [0], [0], [1], [0, 0, 1, 1], [], []>} : vector<8x8xf32>, vector<8x8xf32>, vector<8x8xf32> -> vector<8x8xf32>
    %cst_138 = arith.constant 1.000000e+00 : f32
    %520 = vector.broadcast %cst_138 : f32 to vector<8x1xf32>
    %521 = arith.divf %520, %518 : vector<8x1xf32>
    %522 = vector.broadcast %521 : vector<8x1xf32> to vector<8x8xf32>
    %523 = arith.mulf %519, %522 : vector<8x8xf32>
    %524 = tpu.concatenate %472, %489, %506, %523 in 1 : vector<8x8xf32>, vector<8x8xf32>, vector<8x8xf32>, vector<8x8xf32> -> vector<8x32xf32>
    %525 = vector.extract_strided_slice %450 {offsets = [8, 0], sizes = [8, 32], strides = [1, 1]} : vector<16x32xf32> to vector<8x32xf32>
    %526 = vector.extract_strided_slice %451 {offsets = [8, 0], sizes = [8, 32], strides = [1, 1]} : vector<16x32xf32> to vector<8x32xf32>
    %527 = vector.extract_strided_slice %452 {offsets = [8, 0], sizes = [8, 32], strides = [1, 1]} : vector<16x32xf32> to vector<8x32xf32>
    %528 = vector.extract_strided_slice %525 {offsets = [0, 0], sizes = [8, 8], strides = [1, 1]} : vector<8x32xf32> to vector<8x8xf32>
    %529 = vector.extract_strided_slice %526 {offsets = [0, 0], sizes = [8, 8], strides = [1, 1]} : vector<8x32xf32> to vector<8x8xf32>
    %530 = vector.extract_strided_slice %527 {offsets = [0, 0], sizes = [8, 8], strides = [1, 1]} : vector<8x32xf32> to vector<8x8xf32>
    %531 = tpu.transpose %529, [1, 0] : vector<8x8xf32> -> vector<8x8xf32>
    %cst_139 = arith.constant dense<0.000000e+00> : vector<8x8xf32>
    %532 = tpu.matmul %528, %531, %cst_139 {dimension_numbers = #tpu.dot_dimension_numbers<[1], [0], [0], [1], [0, 0, 1, 1], [], []>} : vector<8x8xf32>, vector<8x8xf32>, vector<8x8xf32> -> vector<8x8xf32>
    %cst_140 = arith.constant dense<0xFF800000> : vector<8xf32>
    %533 = vector.multi_reduction <maximumf>, %532, %cst_140 [1] : vector<8x8xf32> to vector<8xf32>
    %534 = vector.shape_cast %533 : vector<8xf32> to vector<8x1xf32>
    %535 = vector.broadcast %534 : vector<8x1xf32> to vector<8x8xf32>
    %536 = arith.subf %532, %535 : vector<8x8xf32>
    %537 = math.exp %536 : vector<8x8xf32>
    %cst_141 = arith.constant dense<0.000000e+00> : vector<8xf32>
    %538 = vector.multi_reduction <add>, %537, %cst_141 [1] : vector<8x8xf32> to vector<8xf32>
    %539 = vector.shape_cast %538 : vector<8xf32> to vector<8x1xf32>
    %cst_142 = arith.constant dense<0.000000e+00> : vector<8x8xf32>
    %540 = tpu.matmul %537, %530, %cst_142 {dimension_numbers = #tpu.dot_dimension_numbers<[1], [0], [0], [1], [0, 0, 1, 1], [], []>} : vector<8x8xf32>, vector<8x8xf32>, vector<8x8xf32> -> vector<8x8xf32>
    %cst_143 = arith.constant 1.000000e+00 : f32
    %541 = vector.broadcast %cst_143 : f32 to vector<8x1xf32>
    %542 = arith.divf %541, %539 : vector<8x1xf32>
    %543 = vector.broadcast %542 : vector<8x1xf32> to vector<8x8xf32>
    %544 = arith.mulf %540, %543 : vector<8x8xf32>
    %545 = vector.extract_strided_slice %525 {offsets = [0, 8], sizes = [8, 8], strides = [1, 1]} : vector<8x32xf32> to vector<8x8xf32>
    %546 = vector.extract_strided_slice %526 {offsets = [0, 8], sizes = [8, 8], strides = [1, 1]} : vector<8x32xf32> to vector<8x8xf32>
    %547 = vector.extract_strided_slice %527 {offsets = [0, 8], sizes = [8, 8], strides = [1, 1]} : vector<8x32xf32> to vector<8x8xf32>
    %548 = tpu.transpose %546, [1, 0] : vector<8x8xf32> -> vector<8x8xf32>
    %cst_144 = arith.constant dense<0.000000e+00> : vector<8x8xf32>
    %549 = tpu.matmul %545, %548, %cst_144 {dimension_numbers = #tpu.dot_dimension_numbers<[1], [0], [0], [1], [0, 0, 1, 1], [], []>} : vector<8x8xf32>, vector<8x8xf32>, vector<8x8xf32> -> vector<8x8xf32>
    %cst_145 = arith.constant dense<0xFF800000> : vector<8xf32>
    %550 = vector.multi_reduction <maximumf>, %549, %cst_145 [1] : vector<8x8xf32> to vector<8xf32>
    %551 = vector.shape_cast %550 : vector<8xf32> to vector<8x1xf32>
    %552 = vector.broadcast %551 : vector<8x1xf32> to vector<8x8xf32>
    %553 = arith.subf %549, %552 : vector<8x8xf32>
    %554 = math.exp %553 : vector<8x8xf32>
    %cst_146 = arith.constant dense<0.000000e+00> : vector<8xf32>
    %555 = vector.multi_reduction <add>, %554, %cst_146 [1] : vector<8x8xf32> to vector<8xf32>
    %556 = vector.shape_cast %555 : vector<8xf32> to vector<8x1xf32>
    %cst_147 = arith.constant dense<0.000000e+00> : vector<8x8xf32>
    %557 = tpu.matmul %554, %547, %cst_147 {dimension_numbers = #tpu.dot_dimension_numbers<[1], [0], [0], [1], [0, 0, 1, 1], [], []>} : vector<8x8xf32>, vector<8x8xf32>, vector<8x8xf32> -> vector<8x8xf32>
    %cst_148 = arith.constant 1.000000e+00 : f32
    %558 = vector.broadcast %cst_148 : f32 to vector<8x1xf32>
    %559 = arith.divf %558, %556 : vector<8x1xf32>
    %560 = vector.broadcast %559 : vector<8x1xf32> to vector<8x8xf32>
    %561 = arith.mulf %557, %560 : vector<8x8xf32>
    %562 = vector.extract_strided_slice %525 {offsets = [0, 16], sizes = [8, 8], strides = [1, 1]} : vector<8x32xf32> to vector<8x8xf32>
    %563 = vector.extract_strided_slice %526 {offsets = [0, 16], sizes = [8, 8], strides = [1, 1]} : vector<8x32xf32> to vector<8x8xf32>
    %564 = vector.extract_strided_slice %527 {offsets = [0, 16], sizes = [8, 8], strides = [1, 1]} : vector<8x32xf32> to vector<8x8xf32>
    %565 = tpu.transpose %563, [1, 0] : vector<8x8xf32> -> vector<8x8xf32>
    %cst_149 = arith.constant dense<0.000000e+00> : vector<8x8xf32>
    %566 = tpu.matmul %562, %565, %cst_149 {dimension_numbers = #tpu.dot_dimension_numbers<[1], [0], [0], [1], [0, 0, 1, 1], [], []>} : vector<8x8xf32>, vector<8x8xf32>, vector<8x8xf32> -> vector<8x8xf32>
    %cst_150 = arith.constant dense<0xFF800000> : vector<8xf32>
    %567 = vector.multi_reduction <maximumf>, %566, %cst_150 [1] : vector<8x8xf32> to vector<8xf32>
    %568 = vector.shape_cast %567 : vector<8xf32> to vector<8x1xf32>
    %569 = vector.broadcast %568 : vector<8x1xf32> to vector<8x8xf32>
    %570 = arith.subf %566, %569 : vector<8x8xf32>
    %571 = math.exp %570 : vector<8x8xf32>
    %cst_151 = arith.constant dense<0.000000e+00> : vector<8xf32>
    %572 = vector.multi_reduction <add>, %571, %cst_151 [1] : vector<8x8xf32> to vector<8xf32>
    %573 = vector.shape_cast %572 : vector<8xf32> to vector<8x1xf32>
    %cst_152 = arith.constant dense<0.000000e+00> : vector<8x8xf32>
    %574 = tpu.matmul %571, %564, %cst_152 {dimension_numbers = #tpu.dot_dimension_numbers<[1], [0], [0], [1], [0, 0, 1, 1], [], []>} : vector<8x8xf32>, vector<8x8xf32>, vector<8x8xf32> -> vector<8x8xf32>
    %cst_153 = arith.constant 1.000000e+00 : f32
    %575 = vector.broadcast %cst_153 : f32 to vector<8x1xf32>
    %576 = arith.divf %575, %573 : vector<8x1xf32>
    %577 = vector.broadcast %576 : vector<8x1xf32> to vector<8x8xf32>
    %578 = arith.mulf %574, %577 : vector<8x8xf32>
    %579 = vector.extract_strided_slice %525 {offsets = [0, 24], sizes = [8, 8], strides = [1, 1]} : vector<8x32xf32> to vector<8x8xf32>
    %580 = vector.extract_strided_slice %526 {offsets = [0, 24], sizes = [8, 8], strides = [1, 1]} : vector<8x32xf32> to vector<8x8xf32>
    %581 = vector.extract_strided_slice %527 {offsets = [0, 24], sizes = [8, 8], strides = [1, 1]} : vector<8x32xf32> to vector<8x8xf32>
    %582 = tpu.transpose %580, [1, 0] : vector<8x8xf32> -> vector<8x8xf32>
    %cst_154 = arith.constant dense<0.000000e+00> : vector<8x8xf32>
    %583 = tpu.matmul %579, %582, %cst_154 {dimension_numbers = #tpu.dot_dimension_numbers<[1], [0], [0], [1], [0, 0, 1, 1], [], []>} : vector<8x8xf32>, vector<8x8xf32>, vector<8x8xf32> -> vector<8x8xf32>
    %cst_155 = arith.constant dense<0xFF800000> : vector<8xf32>
    %584 = vector.multi_reduction <maximumf>, %583, %cst_155 [1] : vector<8x8xf32> to vector<8xf32>
    %585 = vector.shape_cast %584 : vector<8xf32> to vector<8x1xf32>
    %586 = vector.broadcast %585 : vector<8x1xf32> to vector<8x8xf32>
    %587 = arith.subf %583, %586 : vector<8x8xf32>
    %588 = math.exp %587 : vector<8x8xf32>
    %cst_156 = arith.constant dense<0.000000e+00> : vector<8xf32>
    %589 = vector.multi_reduction <add>, %588, %cst_156 [1] : vector<8x8xf32> to vector<8xf32>
    %590 = vector.shape_cast %589 : vector<8xf32> to vector<8x1xf32>
    %cst_157 = arith.constant dense<0.000000e+00> : vector<8x8xf32>
    %591 = tpu.matmul %588, %581, %cst_157 {dimension_numbers = #tpu.dot_dimension_numbers<[1], [0], [0], [1], [0, 0, 1, 1], [], []>} : vector<8x8xf32>, vector<8x8xf32>, vector<8x8xf32> -> vector<8x8xf32>
    %cst_158 = arith.constant 1.000000e+00 : f32
    %592 = vector.broadcast %cst_158 : f32 to vector<8x1xf32>
    %593 = arith.divf %592, %590 : vector<8x1xf32>
    %594 = vector.broadcast %593 : vector<8x1xf32> to vector<8x8xf32>
    %595 = arith.mulf %591, %594 : vector<8x8xf32>
    %596 = tpu.concatenate %544, %561, %578, %595 in 1 : vector<8x8xf32>, vector<8x8xf32>, vector<8x8xf32>, vector<8x8xf32> -> vector<8x32xf32>
    %597 = tpu.concatenate %524, %596 in 0 : vector<8x32xf32>, vector<8x32xf32> -> vector<16x32xf32>
    %cst_159 = arith.constant dense<0.000000e+00> : vector<16x32xf32>
    %598 = tpu.matmul %597, %24, %cst_159 {dimension_numbers = #tpu.dot_dimension_numbers<[1], [0], [0], [1], [0, 0, 1, 1], [], []>} : vector<16x32xf32>, vector<32x32xf32>, vector<16x32xf32> -> vector<16x32xf32>
    %599 = vector.shape_cast %12 : vector<32xf32> to vector<1x32xf32>
    %600 = vector.broadcast %599 : vector<1x32xf32> to vector<16x32xf32>
    %601 = arith.addf %598, %600 : vector<16x32xf32>
    %602 = arith.addf %443, %601 : vector<16x32xf32>
    %603 = vector.extract_strided_slice %19 {offsets = [0, 0], sizes = [1, 32], strides = [1, 1]} : vector<4x32xf32> to vector<1x32xf32>
    %604 = vector.shape_cast %603 : vector<1x32xf32> to vector<32xf32>
    %605 = vector.extract_strided_slice %20 {offsets = [0, 0], sizes = [1, 32], strides = [1, 1]} : vector<4x32xf32> to vector<1x32xf32>
    %606 = vector.shape_cast %605 : vector<1x32xf32> to vector<32xf32>
    %cst_160 = arith.constant dense<0.000000e+00> : vector<16xf32>
    %607 = vector.multi_reduction <add>, %602, %cst_160 [1] : vector<16x32xf32> to vector<16xf32>
    %608 = vector.shape_cast %607 : vector<16xf32> to vector<16x1xf32>
    %609 = arith.mulf %602, %602 : vector<16x32xf32>
    %cst_161 = arith.constant dense<0.000000e+00> : vector<16xf32>
    %610 = vector.multi_reduction <add>, %609, %cst_161 [1] : vector<16x32xf32> to vector<16xf32>
    %611 = vector.shape_cast %610 : vector<16xf32> to vector<16x1xf32>
    %cst_162 = arith.constant 3.125000e-02 : f32
    %612 = vector.broadcast %cst_162 : f32 to vector<16x1xf32>
    %613 = arith.mulf %608, %612 : vector<16x1xf32>
    %cst_163 = arith.constant 3.125000e-02 : f32
    %614 = vector.broadcast %cst_163 : f32 to vector<16x1xf32>
    %615 = arith.mulf %611, %614 : vector<16x1xf32>
    %616 = arith.mulf %613, %613 : vector<16x1xf32>
    %617 = arith.subf %615, %616 : vector<16x1xf32>
    %618 = vector.broadcast %613 : vector<16x1xf32> to vector<16x32xf32>
    %619 = arith.subf %602, %618 : vector<16x32xf32>
    %cst_164 = arith.constant 9.99999974E-6 : f32
    %620 = vector.broadcast %cst_164 : f32 to vector<16x1xf32>
    %621 = arith.addf %617, %620 : vector<16x1xf32>
    %622 = math.rsqrt %621 : vector<16x1xf32>
    %623 = vector.broadcast %622 : vector<16x1xf32> to vector<16x32xf32>
    %624 = arith.mulf %619, %623 : vector<16x32xf32>
    %625 = vector.shape_cast %604 : vector<32xf32> to vector<1x32xf32>
    %626 = vector.broadcast %625 : vector<1x32xf32> to vector<16x32xf32>
    %627 = arith.mulf %624, %626 : vector<16x32xf32>
    %628 = vector.shape_cast %606 : vector<32xf32> to vector<1x32xf32>
    %629 = vector.broadcast %628 : vector<1x32xf32> to vector<16x32xf32>
    %630 = arith.addf %627, %629 : vector<16x32xf32>
    %cst_165 = arith.constant dense<0.000000e+00> : vector<16x32xf32>
    %631 = tpu.matmul %630, %22, %cst_165 {dimension_numbers = #tpu.dot_dimension_numbers<[1], [0], [0], [1], [0, 0, 1, 1], [], []>} : vector<16x32xf32>, vector<32x32xf32>, vector<16x32xf32> -> vector<16x32xf32>
    %632 = vector.extract_strided_slice %10 {offsets = [0], sizes = [32], strides = [1]} : vector<96xf32> to vector<32xf32>
    %633 = vector.shape_cast %632 : vector<32xf32> to vector<1x32xf32>
    %634 = vector.broadcast %633 : vector<1x32xf32> to vector<16x32xf32>
    %635 = arith.addf %631, %634 : vector<16x32xf32>
    %cst_166 = arith.constant 0.353553385 : f32
    %636 = vector.broadcast %cst_166 : f32 to vector<16x32xf32>
    %637 = arith.mulf %635, %636 : vector<16x32xf32>
    %638 = vector.extract_strided_slice %637 {offsets = [0, 0], sizes = [8, 32], strides = [1, 1]} : vector<16x32xf32> to vector<8x32xf32>
    %639 = vector.extract_strided_slice %31 {offsets = [0, 0], sizes = [16, 32], strides = [1, 1]} : vector<32x32xf32> to vector<16x32xf32>
    %640 = vector.extract_strided_slice %32 {offsets = [0, 0], sizes = [16, 32], strides = [1, 1]} : vector<32x32xf32> to vector<16x32xf32>
    %641 = vector.extract_strided_slice %638 {offsets = [0, 0], sizes = [8, 8], strides = [1, 1]} : vector<8x32xf32> to vector<8x8xf32>
    %642 = vector.extract_strided_slice %639 {offsets = [0, 0], sizes = [16, 8], strides = [1, 1]} : vector<16x32xf32> to vector<16x8xf32>
    %643 = vector.extract_strided_slice %640 {offsets = [0, 0], sizes = [16, 8], strides = [1, 1]} : vector<16x32xf32> to vector<16x8xf32>
    %644 = tpu.transpose %642, [1, 0] : vector<16x8xf32> -> vector<8x16xf32>
    %cst_167 = arith.constant dense<0.000000e+00> : vector<8x16xf32>
    %645 = tpu.matmul %641, %644, %cst_167 {dimension_numbers = #tpu.dot_dimension_numbers<[1], [0], [0], [1], [0, 0, 1, 1], [], []>} : vector<8x8xf32>, vector<8x16xf32>, vector<8x16xf32> -> vector<8x16xf32>
    %cst_168 = arith.constant dense<0xFF800000> : vector<8xf32>
    %646 = vector.multi_reduction <maximumf>, %645, %cst_168 [1] : vector<8x16xf32> to vector<8xf32>
    %647 = vector.shape_cast %646 : vector<8xf32> to vector<8x1xf32>
    %648 = vector.broadcast %647 : vector<8x1xf32> to vector<8x16xf32>
    %649 = arith.subf %645, %648 : vector<8x16xf32>
    %650 = math.exp %649 : vector<8x16xf32>
    %cst_169 = arith.constant dense<0.000000e+00> : vector<8xf32>
    %651 = vector.multi_reduction <add>, %650, %cst_169 [1] : vector<8x16xf32> to vector<8xf32>
    %652 = vector.shape_cast %651 : vector<8xf32> to vector<8x1xf32>
    %cst_170 = arith.constant dense<0.000000e+00> : vector<8x8xf32>
    %653 = tpu.matmul %650, %643, %cst_170 {dimension_numbers = #tpu.dot_dimension_numbers<[1], [0], [0], [1], [0, 0, 1, 1], [], []>} : vector<8x16xf32>, vector<16x8xf32>, vector<8x8xf32> -> vector<8x8xf32>
    %cst_171 = arith.constant 1.000000e+00 : f32
    %654 = vector.broadcast %cst_171 : f32 to vector<8x1xf32>
    %655 = arith.divf %654, %652 : vector<8x1xf32>
    %656 = vector.broadcast %655 : vector<8x1xf32> to vector<8x8xf32>
    %657 = arith.mulf %653, %656 : vector<8x8xf32>
    %658 = vector.extract_strided_slice %638 {offsets = [0, 8], sizes = [8, 8], strides = [1, 1]} : vector<8x32xf32> to vector<8x8xf32>
    %659 = vector.extract_strided_slice %639 {offsets = [0, 8], sizes = [16, 8], strides = [1, 1]} : vector<16x32xf32> to vector<16x8xf32>
    %660 = vector.extract_strided_slice %640 {offsets = [0, 8], sizes = [16, 8], strides = [1, 1]} : vector<16x32xf32> to vector<16x8xf32>
    %661 = tpu.transpose %659, [1, 0] : vector<16x8xf32> -> vector<8x16xf32>
    %cst_172 = arith.constant dense<0.000000e+00> : vector<8x16xf32>
    %662 = tpu.matmul %658, %661, %cst_172 {dimension_numbers = #tpu.dot_dimension_numbers<[1], [0], [0], [1], [0, 0, 1, 1], [], []>} : vector<8x8xf32>, vector<8x16xf32>, vector<8x16xf32> -> vector<8x16xf32>
    %cst_173 = arith.constant dense<0xFF800000> : vector<8xf32>
    %663 = vector.multi_reduction <maximumf>, %662, %cst_173 [1] : vector<8x16xf32> to vector<8xf32>
    %664 = vector.shape_cast %663 : vector<8xf32> to vector<8x1xf32>
    %665 = vector.broadcast %664 : vector<8x1xf32> to vector<8x16xf32>
    %666 = arith.subf %662, %665 : vector<8x16xf32>
    %667 = math.exp %666 : vector<8x16xf32>
    %cst_174 = arith.constant dense<0.000000e+00> : vector<8xf32>
    %668 = vector.multi_reduction <add>, %667, %cst_174 [1] : vector<8x16xf32> to vector<8xf32>
    %669 = vector.shape_cast %668 : vector<8xf32> to vector<8x1xf32>
    %cst_175 = arith.constant dense<0.000000e+00> : vector<8x8xf32>
    %670 = tpu.matmul %667, %660, %cst_175 {dimension_numbers = #tpu.dot_dimension_numbers<[1], [0], [0], [1], [0, 0, 1, 1], [], []>} : vector<8x16xf32>, vector<16x8xf32>, vector<8x8xf32> -> vector<8x8xf32>
    %cst_176 = arith.constant 1.000000e+00 : f32
    %671 = vector.broadcast %cst_176 : f32 to vector<8x1xf32>
    %672 = arith.divf %671, %669 : vector<8x1xf32>
    %673 = vector.broadcast %672 : vector<8x1xf32> to vector<8x8xf32>
    %674 = arith.mulf %670, %673 : vector<8x8xf32>
    %675 = vector.extract_strided_slice %638 {offsets = [0, 16], sizes = [8, 8], strides = [1, 1]} : vector<8x32xf32> to vector<8x8xf32>
    %676 = vector.extract_strided_slice %639 {offsets = [0, 16], sizes = [16, 8], strides = [1, 1]} : vector<16x32xf32> to vector<16x8xf32>
    %677 = vector.extract_strided_slice %640 {offsets = [0, 16], sizes = [16, 8], strides = [1, 1]} : vector<16x32xf32> to vector<16x8xf32>
    %678 = tpu.transpose %676, [1, 0] : vector<16x8xf32> -> vector<8x16xf32>
    %cst_177 = arith.constant dense<0.000000e+00> : vector<8x16xf32>
    %679 = tpu.matmul %675, %678, %cst_177 {dimension_numbers = #tpu.dot_dimension_numbers<[1], [0], [0], [1], [0, 0, 1, 1], [], []>} : vector<8x8xf32>, vector<8x16xf32>, vector<8x16xf32> -> vector<8x16xf32>
    %cst_178 = arith.constant dense<0xFF800000> : vector<8xf32>
    %680 = vector.multi_reduction <maximumf>, %679, %cst_178 [1] : vector<8x16xf32> to vector<8xf32>
    %681 = vector.shape_cast %680 : vector<8xf32> to vector<8x1xf32>
    %682 = vector.broadcast %681 : vector<8x1xf32> to vector<8x16xf32>
    %683 = arith.subf %679, %682 : vector<8x16xf32>
    %684 = math.exp %683 : vector<8x16xf32>
    %cst_179 = arith.constant dense<0.000000e+00> : vector<8xf32>
    %685 = vector.multi_reduction <add>, %684, %cst_179 [1] : vector<8x16xf32> to vector<8xf32>
    %686 = vector.shape_cast %685 : vector<8xf32> to vector<8x1xf32>
    %cst_180 = arith.constant dense<0.000000e+00> : vector<8x8xf32>
    %687 = tpu.matmul %684, %677, %cst_180 {dimension_numbers = #tpu.dot_dimension_numbers<[1], [0], [0], [1], [0, 0, 1, 1], [], []>} : vector<8x16xf32>, vector<16x8xf32>, vector<8x8xf32> -> vector<8x8xf32>
    %cst_181 = arith.constant 1.000000e+00 : f32
    %688 = vector.broadcast %cst_181 : f32 to vector<8x1xf32>
    %689 = arith.divf %688, %686 : vector<8x1xf32>
    %690 = vector.broadcast %689 : vector<8x1xf32> to vector<8x8xf32>
    %691 = arith.mulf %687, %690 : vector<8x8xf32>
    %692 = vector.extract_strided_slice %638 {offsets = [0, 24], sizes = [8, 8], strides = [1, 1]} : vector<8x32xf32> to vector<8x8xf32>
    %693 = vector.extract_strided_slice %639 {offsets = [0, 24], sizes = [16, 8], strides = [1, 1]} : vector<16x32xf32> to vector<16x8xf32>
    %694 = vector.extract_strided_slice %640 {offsets = [0, 24], sizes = [16, 8], strides = [1, 1]} : vector<16x32xf32> to vector<16x8xf32>
    %695 = tpu.transpose %693, [1, 0] : vector<16x8xf32> -> vector<8x16xf32>
    %cst_182 = arith.constant dense<0.000000e+00> : vector<8x16xf32>
    %696 = tpu.matmul %692, %695, %cst_182 {dimension_numbers = #tpu.dot_dimension_numbers<[1], [0], [0], [1], [0, 0, 1, 1], [], []>} : vector<8x8xf32>, vector<8x16xf32>, vector<8x16xf32> -> vector<8x16xf32>
    %cst_183 = arith.constant dense<0xFF800000> : vector<8xf32>
    %697 = vector.multi_reduction <maximumf>, %696, %cst_183 [1] : vector<8x16xf32> to vector<8xf32>
    %698 = vector.shape_cast %697 : vector<8xf32> to vector<8x1xf32>
    %699 = vector.broadcast %698 : vector<8x1xf32> to vector<8x16xf32>
    %700 = arith.subf %696, %699 : vector<8x16xf32>
    %701 = math.exp %700 : vector<8x16xf32>
    %cst_184 = arith.constant dense<0.000000e+00> : vector<8xf32>
    %702 = vector.multi_reduction <add>, %701, %cst_184 [1] : vector<8x16xf32> to vector<8xf32>
    %703 = vector.shape_cast %702 : vector<8xf32> to vector<8x1xf32>
    %cst_185 = arith.constant dense<0.000000e+00> : vector<8x8xf32>
    %704 = tpu.matmul %701, %694, %cst_185 {dimension_numbers = #tpu.dot_dimension_numbers<[1], [0], [0], [1], [0, 0, 1, 1], [], []>} : vector<8x16xf32>, vector<16x8xf32>, vector<8x8xf32> -> vector<8x8xf32>
    %cst_186 = arith.constant 1.000000e+00 : f32
    %705 = vector.broadcast %cst_186 : f32 to vector<8x1xf32>
    %706 = arith.divf %705, %703 : vector<8x1xf32>
    %707 = vector.broadcast %706 : vector<8x1xf32> to vector<8x8xf32>
    %708 = arith.mulf %704, %707 : vector<8x8xf32>
    %709 = tpu.concatenate %657, %674, %691, %708 in 1 : vector<8x8xf32>, vector<8x8xf32>, vector<8x8xf32>, vector<8x8xf32> -> vector<8x32xf32>
    %710 = vector.extract_strided_slice %637 {offsets = [8, 0], sizes = [8, 32], strides = [1, 1]} : vector<16x32xf32> to vector<8x32xf32>
    %711 = vector.extract_strided_slice %31 {offsets = [16, 0], sizes = [16, 32], strides = [1, 1]} : vector<32x32xf32> to vector<16x32xf32>
    %712 = vector.extract_strided_slice %32 {offsets = [16, 0], sizes = [16, 32], strides = [1, 1]} : vector<32x32xf32> to vector<16x32xf32>
    %713 = vector.extract_strided_slice %710 {offsets = [0, 0], sizes = [8, 8], strides = [1, 1]} : vector<8x32xf32> to vector<8x8xf32>
    %714 = vector.extract_strided_slice %711 {offsets = [0, 0], sizes = [16, 8], strides = [1, 1]} : vector<16x32xf32> to vector<16x8xf32>
    %715 = vector.extract_strided_slice %712 {offsets = [0, 0], sizes = [16, 8], strides = [1, 1]} : vector<16x32xf32> to vector<16x8xf32>
    %716 = tpu.transpose %714, [1, 0] : vector<16x8xf32> -> vector<8x16xf32>
    %cst_187 = arith.constant dense<0.000000e+00> : vector<8x16xf32>
    %717 = tpu.matmul %713, %716, %cst_187 {dimension_numbers = #tpu.dot_dimension_numbers<[1], [0], [0], [1], [0, 0, 1, 1], [], []>} : vector<8x8xf32>, vector<8x16xf32>, vector<8x16xf32> -> vector<8x16xf32>
    %cst_188 = arith.constant dense<0xFF800000> : vector<8xf32>
    %718 = vector.multi_reduction <maximumf>, %717, %cst_188 [1] : vector<8x16xf32> to vector<8xf32>
    %719 = vector.shape_cast %718 : vector<8xf32> to vector<8x1xf32>
    %720 = vector.broadcast %719 : vector<8x1xf32> to vector<8x16xf32>
    %721 = arith.subf %717, %720 : vector<8x16xf32>
    %722 = math.exp %721 : vector<8x16xf32>
    %cst_189 = arith.constant dense<0.000000e+00> : vector<8xf32>
    %723 = vector.multi_reduction <add>, %722, %cst_189 [1] : vector<8x16xf32> to vector<8xf32>
    %724 = vector.shape_cast %723 : vector<8xf32> to vector<8x1xf32>
    %cst_190 = arith.constant dense<0.000000e+00> : vector<8x8xf32>
    %725 = tpu.matmul %722, %715, %cst_190 {dimension_numbers = #tpu.dot_dimension_numbers<[1], [0], [0], [1], [0, 0, 1, 1], [], []>} : vector<8x16xf32>, vector<16x8xf32>, vector<8x8xf32> -> vector<8x8xf32>
    %cst_191 = arith.constant 1.000000e+00 : f32
    %726 = vector.broadcast %cst_191 : f32 to vector<8x1xf32>
    %727 = arith.divf %726, %724 : vector<8x1xf32>
    %728 = vector.broadcast %727 : vector<8x1xf32> to vector<8x8xf32>
    %729 = arith.mulf %725, %728 : vector<8x8xf32>
    %730 = vector.extract_strided_slice %710 {offsets = [0, 8], sizes = [8, 8], strides = [1, 1]} : vector<8x32xf32> to vector<8x8xf32>
    %731 = vector.extract_strided_slice %711 {offsets = [0, 8], sizes = [16, 8], strides = [1, 1]} : vector<16x32xf32> to vector<16x8xf32>
    %732 = vector.extract_strided_slice %712 {offsets = [0, 8], sizes = [16, 8], strides = [1, 1]} : vector<16x32xf32> to vector<16x8xf32>
    %733 = tpu.transpose %731, [1, 0] : vector<16x8xf32> -> vector<8x16xf32>
    %cst_192 = arith.constant dense<0.000000e+00> : vector<8x16xf32>
    %734 = tpu.matmul %730, %733, %cst_192 {dimension_numbers = #tpu.dot_dimension_numbers<[1], [0], [0], [1], [0, 0, 1, 1], [], []>} : vector<8x8xf32>, vector<8x16xf32>, vector<8x16xf32> -> vector<8x16xf32>
    %cst_193 = arith.constant dense<0xFF800000> : vector<8xf32>
    %735 = vector.multi_reduction <maximumf>, %734, %cst_193 [1] : vector<8x16xf32> to vector<8xf32>
    %736 = vector.shape_cast %735 : vector<8xf32> to vector<8x1xf32>
    %737 = vector.broadcast %736 : vector<8x1xf32> to vector<8x16xf32>
    %738 = arith.subf %734, %737 : vector<8x16xf32>
    %739 = math.exp %738 : vector<8x16xf32>
    %cst_194 = arith.constant dense<0.000000e+00> : vector<8xf32>
    %740 = vector.multi_reduction <add>, %739, %cst_194 [1] : vector<8x16xf32> to vector<8xf32>
    %741 = vector.shape_cast %740 : vector<8xf32> to vector<8x1xf32>
    %cst_195 = arith.constant dense<0.000000e+00> : vector<8x8xf32>
    %742 = tpu.matmul %739, %732, %cst_195 {dimension_numbers = #tpu.dot_dimension_numbers<[1], [0], [0], [1], [0, 0, 1, 1], [], []>} : vector<8x16xf32>, vector<16x8xf32>, vector<8x8xf32> -> vector<8x8xf32>
    %cst_196 = arith.constant 1.000000e+00 : f32
    %743 = vector.broadcast %cst_196 : f32 to vector<8x1xf32>
    %744 = arith.divf %743, %741 : vector<8x1xf32>
    %745 = vector.broadcast %744 : vector<8x1xf32> to vector<8x8xf32>
    %746 = arith.mulf %742, %745 : vector<8x8xf32>
    %747 = vector.extract_strided_slice %710 {offsets = [0, 16], sizes = [8, 8], strides = [1, 1]} : vector<8x32xf32> to vector<8x8xf32>
    %748 = vector.extract_strided_slice %711 {offsets = [0, 16], sizes = [16, 8], strides = [1, 1]} : vector<16x32xf32> to vector<16x8xf32>
    %749 = vector.extract_strided_slice %712 {offsets = [0, 16], sizes = [16, 8], strides = [1, 1]} : vector<16x32xf32> to vector<16x8xf32>
    %750 = tpu.transpose %748, [1, 0] : vector<16x8xf32> -> vector<8x16xf32>
    %cst_197 = arith.constant dense<0.000000e+00> : vector<8x16xf32>
    %751 = tpu.matmul %747, %750, %cst_197 {dimension_numbers = #tpu.dot_dimension_numbers<[1], [0], [0], [1], [0, 0, 1, 1], [], []>} : vector<8x8xf32>, vector<8x16xf32>, vector<8x16xf32> -> vector<8x16xf32>
    %cst_198 = arith.constant dense<0xFF800000> : vector<8xf32>
    %752 = vector.multi_reduction <maximumf>, %751, %cst_198 [1] : vector<8x16xf32> to vector<8xf32>
    %753 = vector.shape_cast %752 : vector<8xf32> to vector<8x1xf32>
    %754 = vector.broadcast %753 : vector<8x1xf32> to vector<8x16xf32>
    %755 = arith.subf %751, %754 : vector<8x16xf32>
    %756 = math.exp %755 : vector<8x16xf32>
    %cst_199 = arith.constant dense<0.000000e+00> : vector<8xf32>
    %757 = vector.multi_reduction <add>, %756, %cst_199 [1] : vector<8x16xf32> to vector<8xf32>
    %758 = vector.shape_cast %757 : vector<8xf32> to vector<8x1xf32>
    %cst_200 = arith.constant dense<0.000000e+00> : vector<8x8xf32>
    %759 = tpu.matmul %756, %749, %cst_200 {dimension_numbers = #tpu.dot_dimension_numbers<[1], [0], [0], [1], [0, 0, 1, 1], [], []>} : vector<8x16xf32>, vector<16x8xf32>, vector<8x8xf32> -> vector<8x8xf32>
    %cst_201 = arith.constant 1.000000e+00 : f32
    %760 = vector.broadcast %cst_201 : f32 to vector<8x1xf32>
    %761 = arith.divf %760, %758 : vector<8x1xf32>
    %762 = vector.broadcast %761 : vector<8x1xf32> to vector<8x8xf32>
    %763 = arith.mulf %759, %762 : vector<8x8xf32>
    %764 = vector.extract_strided_slice %710 {offsets = [0, 24], sizes = [8, 8], strides = [1, 1]} : vector<8x32xf32> to vector<8x8xf32>
    %765 = vector.extract_strided_slice %711 {offsets = [0, 24], sizes = [16, 8], strides = [1, 1]} : vector<16x32xf32> to vector<16x8xf32>
    %766 = vector.extract_strided_slice %712 {offsets = [0, 24], sizes = [16, 8], strides = [1, 1]} : vector<16x32xf32> to vector<16x8xf32>
    %767 = tpu.transpose %765, [1, 0] : vector<16x8xf32> -> vector<8x16xf32>
    %cst_202 = arith.constant dense<0.000000e+00> : vector<8x16xf32>
    %768 = tpu.matmul %764, %767, %cst_202 {dimension_numbers = #tpu.dot_dimension_numbers<[1], [0], [0], [1], [0, 0, 1, 1], [], []>} : vector<8x8xf32>, vector<8x16xf32>, vector<8x16xf32> -> vector<8x16xf32>
    %cst_203 = arith.constant dense<0xFF800000> : vector<8xf32>
    %769 = vector.multi_reduction <maximumf>, %768, %cst_203 [1] : vector<8x16xf32> to vector<8xf32>
    %770 = vector.shape_cast %769 : vector<8xf32> to vector<8x1xf32>
    %771 = vector.broadcast %770 : vector<8x1xf32> to vector<8x16xf32>
    %772 = arith.subf %768, %771 : vector<8x16xf32>
    %773 = math.exp %772 : vector<8x16xf32>
    %cst_204 = arith.constant dense<0.000000e+00> : vector<8xf32>
    %774 = vector.multi_reduction <add>, %773, %cst_204 [1] : vector<8x16xf32> to vector<8xf32>
    %775 = vector.shape_cast %774 : vector<8xf32> to vector<8x1xf32>
    %cst_205 = arith.constant dense<0.000000e+00> : vector<8x8xf32>
    %776 = tpu.matmul %773, %766, %cst_205 {dimension_numbers = #tpu.dot_dimension_numbers<[1], [0], [0], [1], [0, 0, 1, 1], [], []>} : vector<8x16xf32>, vector<16x8xf32>, vector<8x8xf32> -> vector<8x8xf32>
    %cst_206 = arith.constant 1.000000e+00 : f32
    %777 = vector.broadcast %cst_206 : f32 to vector<8x1xf32>
    %778 = arith.divf %777, %775 : vector<8x1xf32>
    %779 = vector.broadcast %778 : vector<8x1xf32> to vector<8x8xf32>
    %780 = arith.mulf %776, %779 : vector<8x8xf32>
    %781 = tpu.concatenate %729, %746, %763, %780 in 1 : vector<8x8xf32>, vector<8x8xf32>, vector<8x8xf32>, vector<8x8xf32> -> vector<8x32xf32>
    %782 = tpu.concatenate %709, %781 in 0 : vector<8x32xf32>, vector<8x32xf32> -> vector<16x32xf32>
    %cst_207 = arith.constant dense<0.000000e+00> : vector<16x32xf32>
    %783 = tpu.matmul %782, %25, %cst_207 {dimension_numbers = #tpu.dot_dimension_numbers<[1], [0], [0], [1], [0, 0, 1, 1], [], []>} : vector<16x32xf32>, vector<32x32xf32>, vector<16x32xf32> -> vector<16x32xf32>
    %784 = vector.shape_cast %14 : vector<32xf32> to vector<1x32xf32>
    %785 = vector.broadcast %784 : vector<1x32xf32> to vector<16x32xf32>
    %786 = arith.addf %783, %785 : vector<16x32xf32>
    %787 = arith.addf %630, %786 : vector<16x32xf32>
    %788 = vector.extract_strided_slice %19 {offsets = [1, 0], sizes = [1, 32], strides = [1, 1]} : vector<4x32xf32> to vector<1x32xf32>
    %789 = vector.shape_cast %788 : vector<1x32xf32> to vector<32xf32>
    %790 = vector.extract_strided_slice %20 {offsets = [1, 0], sizes = [1, 32], strides = [1, 1]} : vector<4x32xf32> to vector<1x32xf32>
    %791 = vector.shape_cast %790 : vector<1x32xf32> to vector<32xf32>
    %cst_208 = arith.constant dense<0.000000e+00> : vector<16xf32>
    %792 = vector.multi_reduction <add>, %787, %cst_208 [1] : vector<16x32xf32> to vector<16xf32>
    %793 = vector.shape_cast %792 : vector<16xf32> to vector<16x1xf32>
    %794 = arith.mulf %787, %787 : vector<16x32xf32>
    %cst_209 = arith.constant dense<0.000000e+00> : vector<16xf32>
    %795 = vector.multi_reduction <add>, %794, %cst_209 [1] : vector<16x32xf32> to vector<16xf32>
    %796 = vector.shape_cast %795 : vector<16xf32> to vector<16x1xf32>
    %cst_210 = arith.constant 3.125000e-02 : f32
    %797 = vector.broadcast %cst_210 : f32 to vector<16x1xf32>
    %798 = arith.mulf %793, %797 : vector<16x1xf32>
    %cst_211 = arith.constant 3.125000e-02 : f32
    %799 = vector.broadcast %cst_211 : f32 to vector<16x1xf32>
    %800 = arith.mulf %796, %799 : vector<16x1xf32>
    %801 = arith.mulf %798, %798 : vector<16x1xf32>
    %802 = arith.subf %800, %801 : vector<16x1xf32>
    %803 = vector.broadcast %798 : vector<16x1xf32> to vector<16x32xf32>
    %804 = arith.subf %787, %803 : vector<16x32xf32>
    %cst_212 = arith.constant 9.99999974E-6 : f32
    %805 = vector.broadcast %cst_212 : f32 to vector<16x1xf32>
    %806 = arith.addf %802, %805 : vector<16x1xf32>
    %807 = math.rsqrt %806 : vector<16x1xf32>
    %808 = vector.broadcast %807 : vector<16x1xf32> to vector<16x32xf32>
    %809 = arith.mulf %804, %808 : vector<16x32xf32>
    %810 = vector.shape_cast %789 : vector<32xf32> to vector<1x32xf32>
    %811 = vector.broadcast %810 : vector<1x32xf32> to vector<16x32xf32>
    %812 = arith.mulf %809, %811 : vector<16x32xf32>
    %813 = vector.shape_cast %791 : vector<32xf32> to vector<1x32xf32>
    %814 = vector.broadcast %813 : vector<1x32xf32> to vector<16x32xf32>
    %815 = arith.addf %812, %814 : vector<16x32xf32>
    %cst_213 = arith.constant dense<0.000000e+00> : vector<16x64xf32>
    %816 = tpu.matmul %815, %4, %cst_213 {dimension_numbers = #tpu.dot_dimension_numbers<[1], [0], [0], [1], [0, 0, 1, 1], [], []>} : vector<16x32xf32>, vector<32x64xf32>, vector<16x64xf32> -> vector<16x64xf32>
    %817 = vector.shape_cast %16 : vector<64xf32> to vector<1x64xf32>
    %818 = vector.broadcast %817 : vector<1x64xf32> to vector<16x64xf32>
    %819 = arith.addf %816, %818 : vector<16x64xf32>
    %cst_214 = arith.constant 0.000000e+00 : f32
    %820 = vector.broadcast %cst_214 : f32 to vector<16x64xf32>
    %821 = arith.maximumf %819, %820 : vector<16x64xf32>
    %cst_215 = arith.constant dense<0.000000e+00> : vector<16x32xf32>
    %822 = tpu.matmul %821, %5, %cst_215 {dimension_numbers = #tpu.dot_dimension_numbers<[1], [0], [0], [1], [0, 0, 1, 1], [], []>} : vector<16x64xf32>, vector<64x32xf32>, vector<16x32xf32> -> vector<16x32xf32>
    %823 = arith.addf %815, %822 : vector<16x32xf32>
    %824 = vector.shape_cast %18 : vector<32xf32> to vector<1x32xf32>
    %825 = vector.broadcast %824 : vector<1x32xf32> to vector<16x32xf32>
    %826 = arith.addf %823, %825 : vector<16x32xf32>
    %827 = vector.extract_strided_slice %19 {offsets = [2, 0], sizes = [1, 32], strides = [1, 1]} : vector<4x32xf32> to vector<1x32xf32>
    %828 = vector.shape_cast %827 : vector<1x32xf32> to vector<32xf32>
    %829 = vector.extract_strided_slice %20 {offsets = [2, 0], sizes = [1, 32], strides = [1, 1]} : vector<4x32xf32> to vector<1x32xf32>
    %830 = vector.shape_cast %829 : vector<1x32xf32> to vector<32xf32>
    %cst_216 = arith.constant dense<0.000000e+00> : vector<16xf32>
    %831 = vector.multi_reduction <add>, %826, %cst_216 [1] : vector<16x32xf32> to vector<16xf32>
    %832 = vector.shape_cast %831 : vector<16xf32> to vector<16x1xf32>
    %833 = arith.mulf %826, %826 : vector<16x32xf32>
    %cst_217 = arith.constant dense<0.000000e+00> : vector<16xf32>
    %834 = vector.multi_reduction <add>, %833, %cst_217 [1] : vector<16x32xf32> to vector<16xf32>
    %835 = vector.shape_cast %834 : vector<16xf32> to vector<16x1xf32>
    %cst_218 = arith.constant 3.125000e-02 : f32
    %836 = vector.broadcast %cst_218 : f32 to vector<16x1xf32>
    %837 = arith.mulf %832, %836 : vector<16x1xf32>
    %cst_219 = arith.constant 3.125000e-02 : f32
    %838 = vector.broadcast %cst_219 : f32 to vector<16x1xf32>
    %839 = arith.mulf %835, %838 : vector<16x1xf32>
    %840 = arith.mulf %837, %837 : vector<16x1xf32>
    %841 = arith.subf %839, %840 : vector<16x1xf32>
    %842 = vector.broadcast %837 : vector<16x1xf32> to vector<16x32xf32>
    %843 = arith.subf %826, %842 : vector<16x32xf32>
    %cst_220 = arith.constant 9.99999974E-6 : f32
    %844 = vector.broadcast %cst_220 : f32 to vector<16x1xf32>
    %845 = arith.addf %841, %844 : vector<16x1xf32>
    %846 = math.rsqrt %845 : vector<16x1xf32>
    %847 = vector.broadcast %846 : vector<16x1xf32> to vector<16x32xf32>
    %848 = arith.mulf %843, %847 : vector<16x32xf32>
    %849 = vector.shape_cast %828 : vector<32xf32> to vector<1x32xf32>
    %850 = vector.broadcast %849 : vector<1x32xf32> to vector<16x32xf32>
    %851 = arith.mulf %848, %850 : vector<16x32xf32>
    %852 = vector.shape_cast %830 : vector<32xf32> to vector<1x32xf32>
    %853 = vector.broadcast %852 : vector<1x32xf32> to vector<16x32xf32>
    %854 = arith.addf %851, %853 : vector<16x32xf32>
    %855 = vector.extract_strided_slice %19 {offsets = [3, 0], sizes = [1, 32], strides = [1, 1]} : vector<4x32xf32> to vector<1x32xf32>
    %856 = vector.shape_cast %855 : vector<1x32xf32> to vector<32xf32>
    %857 = vector.extract_strided_slice %20 {offsets = [3, 0], sizes = [1, 32], strides = [1, 1]} : vector<4x32xf32> to vector<1x32xf32>
    %858 = vector.shape_cast %857 : vector<1x32xf32> to vector<32xf32>
    %cst_221 = arith.constant dense<0.000000e+00> : vector<16xf32>
    %859 = vector.multi_reduction <add>, %854, %cst_221 [1] : vector<16x32xf32> to vector<16xf32>
    %860 = vector.shape_cast %859 : vector<16xf32> to vector<16x1xf32>
    %861 = arith.mulf %854, %854 : vector<16x32xf32>
    %cst_222 = arith.constant dense<0.000000e+00> : vector<16xf32>
    %862 = vector.multi_reduction <add>, %861, %cst_222 [1] : vector<16x32xf32> to vector<16xf32>
    %863 = vector.shape_cast %862 : vector<16xf32> to vector<16x1xf32>
    %cst_223 = arith.constant 3.125000e-02 : f32
    %864 = vector.broadcast %cst_223 : f32 to vector<16x1xf32>
    %865 = arith.mulf %860, %864 : vector<16x1xf32>
    %cst_224 = arith.constant 3.125000e-02 : f32
    %866 = vector.broadcast %cst_224 : f32 to vector<16x1xf32>
    %867 = arith.mulf %863, %866 : vector<16x1xf32>
    %868 = arith.mulf %865, %865 : vector<16x1xf32>
    %869 = arith.subf %867, %868 : vector<16x1xf32>
    %870 = vector.broadcast %865 : vector<16x1xf32> to vector<16x32xf32>
    %871 = arith.subf %854, %870 : vector<16x32xf32>
    %cst_225 = arith.constant 9.99999974E-6 : f32
    %872 = vector.broadcast %cst_225 : f32 to vector<16x1xf32>
    %873 = arith.addf %869, %872 : vector<16x1xf32>
    %874 = math.rsqrt %873 : vector<16x1xf32>
    %875 = vector.broadcast %874 : vector<16x1xf32> to vector<16x32xf32>
    %876 = arith.mulf %871, %875 : vector<16x32xf32>
    %877 = vector.shape_cast %856 : vector<32xf32> to vector<1x32xf32>
    %878 = vector.broadcast %877 : vector<1x32xf32> to vector<16x32xf32>
    %879 = arith.mulf %876, %878 : vector<16x32xf32>
    %880 = vector.shape_cast %858 : vector<32xf32> to vector<1x32xf32>
    %881 = vector.broadcast %880 : vector<1x32xf32> to vector<16x32xf32>
    %882 = arith.addf %879, %881 : vector<16x32xf32>
    %c0_226 = arith.constant 0 : index
    %c0_227 = arith.constant 0 : index
    %883 = vector.load %arg8[%c0_226, %c0_227] : memref<16x32xf32, #tpu.memory_space<vmem>>, vector<16x32xf32>
    tpu.vector_store %arg8[%c0_226, %c0_227], %882 {strides = array<i32>} : memref<16x32xf32, #tpu.memory_space<vmem>>, vector<16x32xf32>,
    return
  }
  func.func @transform_0(%arg0: i32) -> (i32, i32) {
    %c0_i32 = arith.constant 0 : i32
    %c0_i32_0 = arith.constant 0 : i32
    return %arg0, %c0_i32 : i32, i32
  }
  func.func @transform_1(%arg0: i32) -> (i32, i32) {
    %c0_i32 = arith.constant 0 : i32
    %c0_i32_0 = arith.constant 0 : i32
    return %arg0, %c0_i32 : i32, i32
  }
  func.func @transform_2(%arg0: i32) -> (i32, i32) {
    %c0_i32 = arith.constant 0 : i32
    %c0_i32_0 = arith.constant 0 : i32
    %c0_i32_1 = arith.constant 0 : i32
    return %c0_i32, %c0_i32_0 : i32, i32
  }
  func.func @transform_3(%arg0: i32) -> (i32, i32) {
    %c0_i32 = arith.constant 0 : i32
    %c0_i32_0 = arith.constant 0 : i32
    %c0_i32_1 = arith.constant 0 : i32
    return %c0_i32, %c0_i32_0 : i32, i32
  }
  func.func @transform_4(%arg0: i32) -> (i32, i32) {
    %c0_i32 = arith.constant 0 : i32
    %c0_i32_0 = arith.constant 0 : i32
    %c0_i32_1 = arith.constant 0 : i32
    return %c0_i32, %c0_i32_0 : i32, i32
  }
  func.func @transform_5(%arg0: i32) -> (i32, i32) {
    %c0_i32 = arith.constant 0 : i32
    %c0_i32_0 = arith.constant 0 : i32
    %c0_i32_1 = arith.constant 0 : i32
    return %c0_i32, %c0_i32_0 : i32, i32
  }
  func.func @transform_6(%arg0: i32) -> (i32, i32) {
    %c0_i32 = arith.constant 0 : i32
    %c0_i32_0 = arith.constant 0 : i32
    %c0_i32_1 = arith.constant 0 : i32
    return %c0_i32, %c0_i32_0 : i32, i32
  }
  func.func @transform_7(%arg0: i32) -> (i32, i32) {
    %c0_i32 = arith.constant 0 : i32
    %c0_i32_0 = arith.constant 0 : i32
    return %arg0, %c0_i32 : i32, i32
  }
}

</mosaic_0001>

<bundles_post_ra>
// kernel: tpu_custom_call.1
= control target key start
LH: loop header
LB: loop body
LE: loop exit
PB: predicated region body
PF: predicated region fallthrough
CT: control target
= control target key end

     0   :  { %s5029_s0 = inlined_call_operand.vmem [shape: f32[16,32], index: 0, kind: input, shape index: {}]   ;;  %s5030_s1 = inlined_call_operand.vmem [shape: f32[32,32], index: 1, kind: input, shape index: {}]   ;;  %s5031_s2 = inlined_call_operand.vmem [shape: f32[64,96], index: 2, kind: input, shape index: {}]   ;;  %s5032_s3 = inlined_call_operand.vmem [shape: f32[64,32], index: 3, kind: input, shape index: {}]   ;;  %s5033_s4 = inlined_call_operand.vmem [shape: f32[32,64], index: 4, kind: input, shape index: {}]   ;;  %s5034_s5 = inlined_call_operand.vmem [shape: f32[64,32], index: 5, kind: input, shape index: {}]   ;;  %s5035_s6 = inlined_call_operand.vmem [shape: f32[14,96], index: 6, kind: input, shape index: {}]   ;;  %s5036_s7 = inlined_call_operand.hbm [shape: f32[16,32], index: 7, kind: output, shape index: {}]  }
   0x1   :  { %v36_v0 = vld [vmem:[%s5031_s2 + $0x18] sm:$0xff]  ;;  %v35_v1 = vld [vmem:[%s5031_s2 + $0x10] sm:$0xff]  ;;  %v34_v3 = vld [vmem:[%s5031_s2 + $0x8] sm:$0xff] }
   0x2   :  { %145 = vmatpush.msra.mxu1 %v36_v0  ;;  %v4027_v2 = vld [vmem:[%s5031_s2 + $0x30] sm:$0xff]  ;;  %v4035_v4 = vld [vmem:[%s5031_s2 + $0x38] sm:$0xff] }
   0x3   :  { %v3699_v5 = vpack.i.bf16 %v4027_v2, %v4035_v4 }
   0x4   :  { %146 = vmatpush.msra.mxu1 %v35_v1 }
   0x5   :  { %12 = vsyncpa [#allocation3], 0  ;;  %v33_v6 = vld [vmem:[%s5031_s2] sm:$0xff]  ;;  %vm84_vm0 = vcmask 261120   ;;  %s3962_s15 = smov 96   ;;  %v4056_v9 = vld [vmem:[%s5031_s2 + $0x28] sm:$0xff] }
   0x6   :  { %147 = vmatpush.msra.mxu1 %v34_v3  ;;  %v4045_v7 = vld [vmem:[%s5029_s0] sm:$0xff]  ;;  %3700 = vrot.lane.b32.xlu0 %v3699_v5, %s3962_s15  ;;  %s3963_s22 = smov 64   ;;  %s3964_s23 = smov 120   ;;  %v30_v23 = vld [vmem:[%s5030_s1 + $0x8] sm:$0xff]  ;;  %v31_v24 = vld [vmem:[%s5030_s1 + $0x10] sm:$0xff]  ;;  %vm161_vm1 = vcmask 64512  }
   0x7   :  { %v4051_v8 = vld [vmem:[%s5031_s2 + $0x20] sm:$0xff]  ;;  %s3965_s24 = smov 88   ;;  %s3966_s25 = smov 72   ;;  %v32_v25 = vld [vmem:[%s5030_s1 + $0x18] sm:$0xff]  ;;  %v4111_v27 = vld [vmem:[%s5029_s0 + $0x8] sm:$0xff] }
   0x8   :  { %148 = vmatpush.msra.mxu1 %v33_v6  ;;  %v3704_v10 = vpack.i.bf16 %v4051_v8, %v4056_v9  ;;  %v4066_v11 = vld [vmem:[%s5035_s6] sm:$0xff]  ;;  %s3967_s28 = smov 80   ;;  %s3968_s29 = smov 104  }
   0x9   :  { %3547 = vmatmul.msk.f32.vlgmr.msra.gmra.mxu1 %vm84_vm0, %v4045_v7  ;;  %v4069_v12 = vperm.slane %v4066_v11, 0  ;;  %v29_v22 = vld [vmem:[%s5030_s1] sm:$0xff]  ;;  %s3969_s30 = smov 112   ;;  %s3970_s8 = smov 48  }
   0xa   :  { %s3971_s9 = smov 40   ;;  %s3972_s0 = smov 56  }
   0xb   :  { %s3973_s1 = smov 24   ;;  %s3974_s19 = smov 8  }
   0xc   :  { %s3975_s20 = smov 16  }
   0xe   :  { %3705 = vrot.lane.b32.xlu0 %v3704_v10, %s3962_s15 }
  0x11   :  { %3548 = vmatmul.msk.f32.gmra.mxu1 %vm84_vm0, %v4111_v27 }
  0x78   :  { %v3701_v16 = vpop.permute.xlu0 %3700 }
  0x79   :  { %v3702_v17 = vunpack.i.l.bf16 %v3701_v16  ;;  %v3703_v18 = vunpack.i.h.bf16 %v3701_v16 }
  0x7b   :  { %109 = vmatpush.msra.mxu0 %v3702_v17 }
  0x7d   :  { %110 = vmatpush.msra.mxu0 %v3703_v18 }
  0x80   :  { %v3706_v19 = vpop.permute.xlu0 %3705 }
  0x81   :  { %v3707_v20 = vunpack.i.l.bf16 %v3706_v19  ;;  %v3708_v21 = vunpack.i.h.bf16 %v3706_v19 }
  0x83   :  { %111 = vmatpush.msra.mxu0 %v3707_v20 }
  0x85   :  { %112 = vmatpush.msra.mxu0 %v3708_v21 }
  0x86   :  { %v150_v13 = vpop.f32.mrf.mxu1  ;;  %3543 = vmatmul.msk.f32.vlgmr.msra.gmra.mxu0 %vm84_vm0, %v29_v22 }
  0x87   :  { %v4072_v14 = vadd.f32 %v150_v13, %v4069_v12 }
  0x89   :  { %196 = vrot.lane.b32.xlu2 %v4072_v14, %s3963_s22  ;;  %159 = vrot.lane.b32.xlu1 %v4072_v14, %s3962_s15  ;;  %v156_v15 = vmul.f32 0.35355338, %v4072_v14 }
  0x8b   :  { %238 = vrot.lane.b32.xlu0 %v156_v15, %s3964_s23 }
  0x8e   :  { %3544 = vmatmul.msk.f32.gmra.mxu0 %vm84_vm0, %v30_v23  ;;  %v153_v35 = vpop.f32.mrf.mxu1 }
  0x8f   :  { %v4125_v36 = vadd.f32 %v153_v35, %v4069_v12 }
  0x91   :  { %240 = vrot.lane.b32.xlu2 %v4072_v14, %s3965_s24  ;;  %v4138_v43 = vmul.f32 0.35355338, %v4125_v36 }
  0x93   :  { %398 = vrot.lane.b32.xlu0 %v4072_v14, %s3966_s25 }
  0x96   :  { %3545 = vmatmul.msk.f32.gmra.mxu0 %vm84_vm0, %v31_v24 }
  0x99   :  { %319 = vrot.lane.b32.xlu2 %v4072_v14, %s3967_s28 }
  0x9b   :  { %396 = vrot.lane.b32.xlu0 %v156_v15, %s3968_s29 }
  0x9e   :  { %3546 = vmatmul.msk.f32.gmra.mxu0 %vm84_vm0, %v32_v25 }
  0xa1   :  { %317 = vrot.lane.b32.xlu2 %v156_v15, %s3969_s30 }
  0xa3   :  { %354 = vrot.lane.b32.xlu0 %v4072_v14, %s3970_s8 }
  0xa9   :  { %433 = vrot.lane.b32.xlu2 %v4072_v14, %s3971_s9 }
  0xb1   :  { %493 = vrot.lane.b32.xlu2 %v4125_v36, %s3962_s15 }
  0xe3   :  { %v197_v26 = vpop.permute.xlu2 %196 }
  0xe4   :  { %217 = vmatpush.msra.mxu3 %v197_v26 }
  0xeb   :  { %v241_v28 = vpop.permute.xlu2 %240 }
  0xec   :  { %3552 = vmatpush.xpose.msk.msrb.mxu3 %vm161_vm1, %v241_v28 }
  0xf3   :  { %v320_v44 = vpop.permute.xlu2 %319 }
  0xfb   :  { %v160_v29 = vpop.permute.xlu1 %159  ;;  %v318_v48 = vpop.permute.xlu2 %317 }
  0xfc   :  { %3549 = vmatpush.xpose.msk.msrb.mxu0 %vm161_vm1, %v160_v29 }
  0xfd   :  { %v239_v30 = vpop.permute.xlu0 %238 }
  0xff   :  { %3550 = vmatmul.msk.f32.vlgmr.msrb.gmra.mxu0 %vm161_vm1, %v156_v15 }
 0x103   :  { %v4120_v33 = vpop.f32.mrf.mxu0  ;;  %v434_v53 = vpop.permute.xlu2 %433 }
 0x105   :  { %v399_v31 = vpop.permute.xlu0 %398 }
 0x106   :  { %3558 = vmatpush.xpose.msk.msrb.mxu1 %vm161_vm1, %v399_v31 }
 0x10b   :  { %v4122_v34 = vpop.f32.mrf.mxu0  ;;  %v494_v6 = vpop.permute.xlu2 %493 }
 0x10d   :  { %v397_v32 = vpop.permute.xlu0 %396 }
 0x10e   :  { %3559 = vmatmul.msk.f32.vlgmr.msrb.gmra.mxu1 %vm161_vm1, %v397_v32 }
 0x113   :  { %v4129_v37 = vpop.f32.mrf.mxu0 }
 0x115   :  { %v355_v49 = vpop.permute.xlu0 %354 }
 0x11b   :  { %v4131_v38 = vpop.f32.mrf.mxu0 }
 0x17c   :  { %v184_v39 = vpop.f32.mrf.mxu0 }
 0x17d   :  { %v187_v40 = vsel %vm161_vm1, %v184_v39, -inf }
 0x17e   :  { %188 = vmax.xlane.f32.xlu1 %v187_v40 }
 0x18b   :  { %v421_v41 = vpop.f32.mrf.mxu1 }
 0x18c   :  { %v424_v42 = vsel %vm161_vm1, %v421_v41, -inf }
 0x18d   :  { %425 = vmax.xlane.f32.xlu0 %v424_v42 }
 0x197   :  { %275 = vrot.lane.b32.xlu1 %v4072_v14, %s3972_s0 }
 0x19f   :  { %573 = vrot.lane.b32.xlu1 %v4125_v36, %s3965_s24 }
 0x1a1   :  { %729 = vrot.lane.b32.xlu0 %v4138_v43, %s3968_s29 }
 0x1a7   :  { %571 = vrot.lane.b32.xlu1 %v4138_v43, %s3964_s23 }
 0x1af   :  { %731 = vrot.lane.b32.xlu1 %v4125_v36, %s3966_s25 }
 0x1f1   :  { %v189_v45 = vpop.xlane.xlu1 %188 }
 0x1f2   :  { %v190_v46 = vsub.f32 %v184_v39, %v189_v45 }
 0x1f4   :  { %v191_v47 = vmul.f32 1.442695, %v190_v46 }
 0x1f6   :  { %3749 = vpow2.f32 %v191_v47 }
 0x1fc   :  { %v3750_v50 = vpop.eup %3749 }
 0x1fd   :  { %3551 = vmatmul.msk.f32.vlgmr.msra.gmra.mxu3 %vm161_vm1, %v3750_v50  ;;  %v193_v51 = vsel %vm161_vm1, %v3750_v50, 0.0 }
 0x1fe   :  { %3555 = vmatpush.xpose.msk.msra.mxu3 %vm161_vm1, %v320_v44  ;;  %194 = vadd.xlane.f32.xlu0 %v193_v51 }
 0x200   :  { %v426_v52 = vpop.xlane.xlu0 %425 }
 0x201   :  { %v427_v54 = vsub.f32 %v421_v41, %v426_v52 }
 0x203   :  { %v428_v56 = vmul.f32 1.442695, %v427_v54 }
 0x205   :  { %3553 = vmatmul.msk.f32.vlgmr.msrb.gmra.mxu3 %vm161_vm1, %v239_v30  ;;  %3751 = vpow2.f32 %v428_v56 }
 0x206   :  { %454 = vmatpush.msrb.mxu3 %v434_v53 }
 0x209   :  { %v276_v55 = vpop.permute.xlu1 %275 }
 0x20a   :  { %296 = vmatpush.msra.mxu2 %v276_v55 }
 0x20b   :  { %v3752_v57 = vpop.eup %3751 }
 0x20c   :  { %375 = vmatpush.msrb.mxu2 %v355_v49  ;;  %v430_v5 = vsel %vm161_vm1, %v3752_v57, 0.0 }
 0x20d   :  { %3556 = vmatmul.msk.f32.vlgmr.msra.gmra.mxu3 %vm161_vm1, %v318_v48 }
 0x211   :  { %v574_v61 = vpop.permute.xlu1 %573 }
 0x212   :  { %3564 = vmatpush.xpose.msk.msra.mxu3 %vm161_vm1, %v574_v61 }
 0x213   :  { %v730_v3 = vpop.permute.xlu0 %729 }
 0x215   :  { %3560 = vmatmul.msk.f32.vlgmr.msrb.gmra.mxu3 %vm161_vm1, %v3752_v57 }
 0x219   :  { %v572_v0 = vpop.permute.xlu1 %571 }
 0x21d   :  { %3565 = vmatmul.msk.f32.vlgmr.msra.gmra.mxu3 %vm161_vm1, %v572_v0 }
 0x221   :  { %v732_v1 = vpop.permute.xlu1 %731 }
 0x222   :  { %3570 = vmatpush.xpose.msk.msrb.mxu3 %vm161_vm1, %v732_v1 }
 0x225   :  { %3571 = vmatmul.msk.f32.vlgmr.msrb.gmra.mxu3 %vm161_vm1, %v730_v3 }
 0x280   :  { %v4154_v58 = vpop.f32.mrf.mxu3 }
 0x288   :  { %v263_v59 = vpop.f32.mrf.mxu3 }
 0x289   :  { %v266_v60 = vsel %vm161_vm1, %v263_v59, -inf }
 0x28a   :  { %267 = vmax.xlane.f32.xlu2 %v266_v60 }
 0x290   :  { %v342_v62 = vpop.f32.mrf.mxu3 }
 0x291   :  { %v345_v63 = vsel %vm161_vm1, %v342_v62, -inf }
 0x292   :  { %346 = vmax.xlane.f32.xlu1 %v345_v63 }
 0x298   :  { %v456_v40 = vpop.f32.mrf.mxu3 }
 0x2a2   :  { %652 = vrot.lane.b32.xlu2 %v4125_v36, %s3967_s28 }
 0x2ab   :  { %650 = vrot.lane.b32.xlu1 %v4138_v43, %s3969_s30 }
 0x2d5   :  { %431 = vadd.xlane.f32.xlu1 %v430_v5 }
 0x2fd   :  { %v268_v10 = vpop.xlane.xlu2 %267 }
 0x2fe   :  { %v269_v13 = vsub.f32 %v263_v59, %v268_v10 }
 0x300   :  { %v270_v14 = vmul.f32 1.442695, %v269_v13 }
 0x302   :  { %3753 = vpow2.f32 %v270_v14 }
 0x305   :  { %v653_v15 = vpop.permute.xlu2 %652  ;;  %v347_v16 = vpop.xlane.xlu1 %346 }
 0x306   :  { %v348_v17 = vsub.f32 %v342_v62, %v347_v16  ;;  %3567 = vmatpush.xpose.msk.msra.mxu0 %vm161_vm1, %v653_v15 }
 0x308   :  { %v3754_v18 = vpop.eup %3753  ;;  %v349_v19 = vmul.f32 1.442695, %v348_v17 }
 0x309   :  { %3554 = vmatmul.msk.f32.vlgmr.msra.gmra.mxu2 %vm161_vm1, %v3754_v18  ;;  %v272_v20 = vsel %vm161_vm1, %v3754_v18, 0.0  ;;  %v596_v18 = vpop.f32.mrf.mxu3 }
 0x30a   :  { %3755 = vpow2.f32 %v349_v19  ;;  %3561 = vmatpush.xpose.msk.msra.mxu2 %vm161_vm1, %v494_v6  ;;  %273 = vadd.xlane.f32.xlu0 %v272_v20  ;;  %v599_v19 = vsel %vm161_vm1, %v596_v18, -inf }
 0x310   :  { %v3756_v21 = vpop.eup %3755 }
 0x311   :  { %3557 = vmatmul.msk.f32.vlgmr.msrb.gmra.mxu2 %vm161_vm1, %v3756_v21  ;;  %v351_v22 = vsel %vm161_vm1, %v3756_v21, 0.0  ;;  %v4186_v20 = vpop.f32.mrf.mxu3 }
 0x312   :  { %352 = vadd.xlane.f32.xlu2 %v351_v22  ;;  %v757_v21 = vsel %vm161_vm1, %v4186_v20, -inf  ;;  %v44_v22 = vld [vmem:[%s5032_s3 + $0x18] sm:$0xff] }
 0x313   :  { %842 = vmatpush.msrb.mxu0 %v44_v22 }
 0x319   :  { %3562 = vmatmul.msk.f32.vlgmr.msra.gmra.mxu2 %vm161_vm1, %v4138_v43  ;;  %v4177_v43 = vpop.xlane.xlu0 %194 }
 0x31a   :  { %vm227_vm15 = vweird.f32 %v4177_v43 }
 0x31d   :  { %v651_v23 = vpop.permute.xlu1 %650 }
 0x31e   :  { %3568 = vmatmul.msk.f32.vlgmr.msra.gmra.mxu0 %vm161_vm1, %v651_v23  ;;  %v43_v23 = vld [vmem:[%s5032_s3 + $0x10] sm:$0xff] }
 0x31f   :  { %843 = vmatpush.msrb.mxu0 %v43_v23 }
 0x348   :  { %v432_v24 = vpop.xlane.xlu1 %431 }
 0x349   :  { %3757 = vrcp.f32 %v432_v24  ;;  %v470_v29 = vand.u32 2147483648, %v432_v24  ;;  %v468_v31 = vand.u32 2147483647, %v432_v24  ;;  %vm464_vm3 = vweird.f32 %v432_v24 }
 0x34b   :  { %v471_v35 = vor.u32 1.1754944e-38, %v470_v29  ;;  %vm469_vm5 = vcmp.eq.f32.partialorder %v468_v31, 8.507059e+37 }
 0x34f   :  { %v3758_v25 = vpop.eup %3757 }
 0x350   :  { %v460_v26 = vmul.f32 %v3758_v25, %v432_v24  ;;  %vm465_vm2 = vweird.f32 %v3758_v25  ;;  %v42_v24 = vld [vmem:[%s5032_s3 + $0x8] sm:$0xff] }
 0x351   :  { %vm466_vm4 = vmor %vm464_vm3, %vm465_vm2  ;;  %844 = vmatpush.msrb.mxu0 %v42_v24 }
 0x352   :  { %v461_v28 = vsub.f32 1.0, %v460_v26 }
 0x354   :  { %v462_v30 = vmul.f32 %v3758_v25, %v461_v28 }
 0x356   :  { %v463_v32 = vadd.f32 %v3758_v25, %v462_v30 }
 0x358   :  { %v467_v39 = vsel %vm466_vm4, %v3758_v25, %v463_v32  ;;  %v41_v25 = vld [vmem:[%s5032_s3] sm:$0xff]  ;;  %v233_v32 = vand.u32 2147483648, %v4177_v43  ;;  %vm488_vm4 = vcmask 130048  }
 0x359   :  { %v472_v41 = vsel %vm469_vm5, %v471_v35, %v467_v39  ;;  %845 = vmatpush.msrb.mxu0 %v41_v25  ;;  %vm490_vm5 = vcmask 195584  }
 0x35a   :  { %v474_v42 = vmul.f32 %v472_v41, %v456_v40  ;;  %v234_v39 = vor.u32 1.1754944e-38, %v233_v32 }
 0x35c   :  { %484 = vrot.lane.b32.xlu0 %v474_v42, %s3973_s1 }
 0x37d   :  { %v274_v44 = vpop.xlane.xlu0 %273 }
 0x37e   :  { %3759 = vrcp.f32 %v274_v44  ;;  %v312_v49 = vand.u32 2147483648, %v274_v44  ;;  %v310_v51 = vand.u32 2147483647, %v274_v44  ;;  %vm306_vm7 = vweird.f32 %v274_v44 }
 0x380   :  { %v313_v55 = vor.u32 1.1754944e-38, %v312_v49  ;;  %vm311_vm9 = vcmp.eq.f32.partialorder %v310_v51, 8.507059e+37 }
 0x384   :  { %v3760_v45 = vpop.eup %3759 }
 0x385   :  { %v302_v46 = vmul.f32 %v3760_v45, %v274_v44  ;;  %v353_v47 = vpop.xlane.xlu2 %352  ;;  %vm307_vm6 = vweird.f32 %v3760_v45 }
 0x386   :  { %3761 = vrcp.f32 %v353_v47  ;;  %vm308_vm8 = vmor %vm306_vm7, %vm307_vm6  ;;  %v391_v62 = vand.u32 2147483648, %v353_v47  ;;  %v389_v0 = vand.u32 2147483647, %v353_v47  ;;  %vm385_vm11 = vweird.f32 %v353_v47 }
 0x387   :  { %v303_v48 = vsub.f32 1.0, %v302_v46  ;;  %3763 = vrcp.f32 %v4177_v43 }
 0x388   :  { %v392_v3 = vor.u32 1.1754944e-38, %v391_v62  ;;  %vm390_vm13 = vcmp.eq.f32.partialorder %v389_v0, 8.507059e+37 }
 0x389   :  { %v304_v50 = vmul.f32 %v3760_v45, %v303_v48 }
 0x38b   :  { %v305_v52 = vadd.f32 %v3760_v45, %v304_v50 }
 0x38c   :  { %v3762_v53 = vpop.eup %3761  ;;  %v298_v54 = vpop.f32.mrf.mxu2 }
 0x38d   :  { %v381_v56 = vmul.f32 %v3762_v53, %v353_v47  ;;  %v309_v57 = vsel %vm308_vm8, %v3760_v45, %v305_v52  ;;  %vm386_vm10 = vweird.f32 %v3762_v53  ;;  %v3764_v26 = vpop.eup %3763 }
 0x38e   :  { %v314_v59 = vsel %vm311_vm9, %v313_v55, %v309_v57  ;;  %vm387_vm12 = vmor %vm385_vm11, %vm386_vm10  ;;  %v223_v28 = vmul.f32 %v3764_v26, %v4177_v43  ;;  %vm228_vm14 = vweird.f32 %v3764_v26 }
 0x38f   :  { %v316_v60 = vmul.f32 %v314_v59, %v298_v54  ;;  %v382_v61 = vsub.f32 1.0, %v381_v56  ;;  %vm229_vm2 = vmor %vm227_vm15, %vm228_vm14 }
 0x390   :  { %v224_v29 = vsub.f32 1.0, %v223_v28 }
 0x391   :  { %476 = vrot.lane.b32.xlu2 %v316_v60, %s3974_s19  ;;  %v383_v63 = vmul.f32 %v3762_v53, %v382_v61 }
 0x392   :  { %v225_v30 = vmul.f32 %v3764_v26, %v224_v29 }
 0x393   :  { %v384_v1 = vadd.f32 %v3762_v53, %v383_v63 }
 0x394   :  { %v377_v6 = vpop.f32.mrf.mxu2  ;;  %v226_v31 = vadd.f32 %v3764_v26, %v225_v30 }
 0x395   :  { %v388_v5 = vsel %vm387_vm12, %v3762_v53, %v384_v1 }
 0x396   :  { %v393_v10 = vsel %vm390_vm13, %v392_v3, %v388_v5  ;;  %v230_v35 = vsel %vm229_vm2, %v3764_v26, %v226_v31 }
 0x397   :  { %v395_v13 = vmul.f32 %v393_v10, %v377_v6 }
 0x399   :  { %480 = vrot.lane.b32.xlu1 %v395_v13, %s3975_s20 }
 0x39b   :  { %v675_v14 = vpop.f32.mrf.mxu0 }
 0x39c   :  { %v678_v15 = vsel %vm161_vm1, %v675_v14, -inf  ;;  %v517_v16 = vpop.f32.mrf.mxu2 }
 0x39d   :  { %679 = vmax.xlane.f32.xlu0 %v678_v15  ;;  %v520_v17 = vsel %vm161_vm1, %v517_v16, -inf  ;;  %v4232_v15 = vperm.slane %v4066_v11, 2 }
 0x3a5   :  { %521 = vmax.xlane.f32.xlu0 %v520_v17 }
 0x3b9   :  { %766 = vrot.lane.b32.xlu0 %v4125_v36, %s3971_s9 }
 0x3ba   :  { %600 = vmax.xlane.f32.xlu2 %v599_v19 }
 0x3c3   :  { %758 = vmax.xlane.f32.xlu1 %v757_v21 }
 0x3ce   :  { %v485_v41 = vpop.permute.xlu0 %484 }
 0x3d2   :  { %608 = vrot.lane.b32.xlu2 %v4125_v36, %s3972_s0 }
 0x3da   :  { %687 = vrot.lane.b32.xlu2 %v4125_v36, %s3970_s8 }
 0x3dc   :  { %529 = vrot.lane.b32.xlu1 %v4125_v36, %s3963_s22  ;;  %v231_v36 = vand.u32 2147483647, %v4177_v43 }
 0x3de   :  { %vm232_vm3 = vcmp.eq.f32.partialorder %v231_v36, 8.507059e+37 }
 0x3df   :  { %v235_v40 = vsel %vm232_vm3, %v234_v39, %v230_v35 }
 0x3e0   :  { %v237_v44 = vmul.f32 %v235_v40, %v4154_v58 }
 0x3eb   :  { %v477_v42 = vpop.permute.xlu2 %476 }
 0x3ec   :  { %v487_v45 = vsel %vm161_vm1, %v237_v44, %v477_v42 }
 0x40b   :  { %v481_v46 = vpop.permute.xlu1 %480 }
 0x40c   :  { %v489_v47 = vsel %vm488_vm4, %v487_v45, %v481_v46 }
 0x40d   :  { %v491_v48 = vsel %vm490_vm5, %v489_v47, %v485_v41 }
 0x40e   :  { %3573 = vmatmul.msk.f32.vlgmr.msrb.gmra.mxu0 %vm84_vm0, %v491_v48 }
 0x410   :  { %v680_v43 = vpop.xlane.xlu0 %679 }
 0x411   :  { %v681_v49 = vsub.f32 %v675_v14, %v680_v43 }
 0x413   :  { %v682_v50 = vmul.f32 1.442695, %v681_v49 }
 0x415   :  { %3765 = vpow2.f32 %v682_v50 }
 0x418   :  { %v522_v51 = vpop.xlane.xlu0 %521 }
 0x419   :  { %v523_v52 = vsub.f32 %v517_v16, %v522_v51 }
 0x41b   :  { %v3766_v53 = vpop.eup %3765  ;;  %v524_v54 = vmul.f32 1.442695, %v523_v52 }
 0x41c   :  { %v684_v58 = vsel %vm161_vm1, %v3766_v53, 0.0 }
 0x41d   :  { %3767 = vpow2.f32 %v524_v54  ;;  %685 = vadd.xlane.f32.xlu0 %v684_v58 }
 0x423   :  { %v3768_v55 = vpop.eup %3767 }
 0x424   :  { %v526_v56 = vsel %vm161_vm1, %v3768_v55, 0.0 }
 0x425   :  { %527 = vadd.xlane.f32.xlu0 %v526_v56 }
 0x42b   :  { %v767_v62 = vpop.permute.xlu0 %766 }
 0x42d   :  { %v601_v57 = vpop.xlane.xlu2 %600 }
 0x42e   :  { %v602_v59 = vsub.f32 %v596_v18, %v601_v57 }
 0x430   :  { %v603_v60 = vmul.f32 1.442695, %v602_v59 }
 0x432   :  { %3769 = vpow2.f32 %v603_v60 }
 0x435   :  { %v609_v61 = vpop.permute.xlu2 %608 }
 0x436   :  { %629 = vmatpush.msrb.mxu2 %v609_v61  ;;  %v759_v63 = vpop.xlane.xlu1 %758 }
 0x437   :  { %v760_v0 = vsub.f32 %v4186_v20, %v759_v63 }
 0x438   :  { %787 = vmatpush.msra.mxu2 %v767_v62  ;;  %v3770_v1 = vpop.eup %3769  ;;  %v4247_v62 = vperm.slane %v4066_v11, 1 }
 0x439   :  { %v761_v3 = vmul.f32 1.442695, %v760_v0  ;;  %3566 = vmatmul.msk.f32.vlgmr.msrb.gmra.mxu2 %vm161_vm1, %v3770_v1  ;;  %v605_v5 = vsel %vm161_vm1, %v3770_v1, 0.0 }
 0x43a   :  { %606 = vadd.xlane.f32.xlu1 %v605_v5 }
 0x43b   :  { %3771 = vpow2.f32 %v761_v3 }
 0x43d   :  { %v688_v14 = vpop.permute.xlu2 %687 }
 0x441   :  { %v3772_v6 = vpop.eup %3771 }
 0x442   :  { %3572 = vmatmul.msk.f32.vlgmr.msra.gmra.mxu2 %vm161_vm1, %v3772_v6  ;;  %v763_v10 = vsel %vm161_vm1, %v3772_v6, 0.0 }
 0x443   :  { %764 = vadd.xlane.f32.xlu2 %v763_v10 }
 0x44e   :  { %v530_v13 = vpop.permute.xlu1 %529 }
 0x44f   :  { %550 = vmatpush.msra.mxu1 %v530_v13 }
 0x450   :  { %3563 = vmatmul.msk.f32.vlgmr.msra.gmra.mxu1 %vm161_vm1, %v3768_v55 }
 0x451   :  { %708 = vmatpush.msrb.mxu1 %v688_v14 }
 0x453   :  { %927 = vmatpush.msra.mxu1 %v4035_v4 }
 0x455   :  { %928 = vmatpush.msra.mxu1 %v4027_v2 }
 0x457   :  { %929 = vmatpush.msra.mxu1 %v4056_v9 }
 0x458   :  { %3569 = vmatmul.msk.f32.vlgmr.msrb.gmra.mxu1 %vm161_vm1, %v3766_v53 }
 0x459   :  { %930 = vmatpush.msra.mxu1 %v4051_v8 }
 0x48b   :  { %v847_v16 = vpop.f32.mrf.mxu0 }
 0x48c   :  { %v848_v17 = vadd.f32 %v847_v16, %v4232_v15 }
 0x48e   :  { %v4236_v18 = vadd.f32 %v848_v17, %v4045_v7 }
 0x490   :  { %v855_v4 = vsel %vm84_vm0, %v4236_v18, 0.0  ;;  %v861_v2 = vmul.f32 %v4236_v18, %v4236_v18  ;;  %v686_v21 = vpop.xlane.xlu0 %685 }
 0x491   :  { %856 = vadd.xlane.f32.xlu1 %v855_v4  ;;  %v724_v58 = vand.u32 2147483648, %v686_v21  ;;  %vm718_vm15 = vweird.f32 %v686_v21  ;;  %v722_v55 = vand.u32 2147483647, %v686_v21 }
 0x492   :  { %v863_v9 = vsel %vm84_vm0, %v861_v2, 0.0 }
 0x493   :  { %864 = vadd.xlane.f32.xlu2 %v863_v9  ;;  %v725_v57 = vor.u32 1.1754944e-38, %v724_v58  ;;  %vm723_vm3 = vcmp.eq.f32.partialorder %v722_v55, 8.507059e+37  ;;  %v4254_v9 = vld [vmem:[%s5035_s6 + $0x8] sm:$0x3f] }
 0x4ad   :  { %v607_v8 = vpop.xlane.xlu1 %606 }
 0x4ae   :  { %3773 = vrcp.f32 %v607_v8  ;;  %v645_v7 = vand.u32 2147483648, %v607_v8  ;;  %v643_v25 = vand.u32 2147483647, %v607_v8  ;;  %vm639_vm7 = vweird.f32 %v607_v8 }
 0x4b0   :  { %v646_v28 = vor.u32 1.1754944e-38, %v645_v7  ;;  %vm644_vm9 = vcmp.eq.f32.partialorder %v643_v25, 8.507059e+37 }
 0x4b4   :  { %v3774_v19 = vpop.eup %3773 }
 0x4b5   :  { %v635_v20 = vmul.f32 %v3774_v19, %v607_v8  ;;  %vm640_vm6 = vweird.f32 %v3774_v19 }
 0x4b6   :  { %v765_v22 = vpop.xlane.xlu2 %764  ;;  %vm641_vm8 = vmor %vm639_vm7, %vm640_vm6 }
 0x4b7   :  { %v636_v23 = vsub.f32 1.0, %v635_v20  ;;  %3775 = vrcp.f32 %v765_v22  ;;  %v803_v41 = vand.u32 2147483648, %v765_v22  ;;  %v801_v45 = vand.u32 2147483647, %v765_v22 }
 0x4b8   :  { %3777 = vrcp.f32 %v686_v21  ;;  %vm797_vm11 = vweird.f32 %v765_v22 }
 0x4b9   :  { %v637_v24 = vmul.f32 %v3774_v19, %v636_v23  ;;  %v804_v47 = vor.u32 1.1754944e-38, %v803_v41  ;;  %vm802_vm13 = vcmp.eq.f32.partialorder %v801_v45, 8.507059e+37 }
 0x4bb   :  { %v638_v26 = vadd.f32 %v3774_v19, %v637_v24  ;;  %v528_v24 = vpop.xlane.xlu0 %527 }
 0x4bc   :  { %v631_v30 = vpop.f32.mrf.mxu2 }
 0x4bd   :  { %v3776_v29 = vpop.eup %3775  ;;  %v642_v31 = vsel %vm641_vm8, %v3774_v19, %v638_v26  ;;  %v4258_v19 = vperm.slane %v4066_v11, 6 }
 0x4be   :  { %v793_v32 = vmul.f32 %v3776_v29, %v765_v22  ;;  %v647_v36 = vsel %vm644_vm9, %v646_v28, %v642_v31  ;;  %v3778_v35 = vpop.eup %3777  ;;  %vm798_vm10 = vweird.f32 %v3776_v29  ;;  %v4261_v22 = vperm.slane %v4254_v9, 2 }
 0x4bf   :  { %v649_v39 = vmul.f32 %v647_v36, %v631_v30  ;;  %v714_v42 = vmul.f32 %v3778_v35, %v686_v21  ;;  %vm799_vm12 = vmor %vm797_vm11, %vm798_vm10  ;;  %vm719_vm14 = vweird.f32 %v3778_v35  ;;  %vm560_vm10 = vweird.f32 %v528_v24 }
 0x4c0   :  { %v794_v40 = vsub.f32 1.0, %v793_v32  ;;  %vm720_vm2 = vmor %vm718_vm15, %vm719_vm14  ;;  %v564_v30 = vand.u32 2147483647, %v528_v24 }
 0x4c1   :  { %809 = vrot.lane.b32.xlu1 %v649_v39, %s3974_s19  ;;  %v715_v43 = vsub.f32 1.0, %v714_v42 }
 0x4c2   :  { %v795_v44 = vmul.f32 %v3776_v29, %v794_v40 }
 0x4c3   :  { %v716_v52 = vmul.f32 %v3778_v35, %v715_v43 }
 0x4c4   :  { %v796_v46 = vadd.f32 %v3776_v29, %v795_v44 }
 0x4c5   :  { %v789_v49 = vpop.f32.mrf.mxu2  ;;  %v717_v54 = vadd.f32 %v3778_v35, %v716_v52 }
 0x4c6   :  { %v800_v48 = vsel %vm799_vm12, %v3776_v29, %v796_v46  ;;  %v566_v29 = vand.u32 2147483648, %v528_v24  ;;  %vm565_vm12 = vcmp.eq.f32.partialorder %v564_v30, 8.507059e+37 }
 0x4c7   :  { %v805_v50 = vsel %vm802_vm13, %v804_v47, %v800_v48  ;;  %v721_v56 = vsel %vm720_vm2, %v3778_v35, %v717_v54 }
 0x4c8   :  { %v807_v51 = vmul.f32 %v805_v50, %v789_v49  ;;  %v726_v60 = vsel %vm723_vm3, %v725_v57, %v721_v56  ;;  %v567_v32 = vor.u32 1.1754944e-38, %v566_v29 }
 0x4ca   :  { %817 = vrot.lane.b32.xlu2 %v807_v51, %s3973_s1 }
 0x4cd   :  { %v552_v53 = vpop.f32.mrf.mxu1 }
 0x4d5   :  { %v710_v59 = vpop.f32.mrf.mxu1 }
 0x4d6   :  { %v728_v61 = vmul.f32 %v726_v60, %v710_v59 }
 0x4d8   :  { %813 = vrot.lane.b32.xlu0 %v728_v61, %s3975_s20 }
 0x4e0   :  { %81 = vrot.lane.b32.xlu0 %v4247_v62, %s3962_s15 }
 0x504   :  { %v857_v63 = vpop.xlane.xlu1 %856 }
 0x505   :  { %v869_v0 = vmul.f32 0.03125, %v857_v63 }
 0x506   :  { %v865_v1 = vpop.xlane.xlu2 %864 }
 0x507   :  { %v873_v3 = vmul.f32 %v869_v0, %v869_v0  ;;  %v871_v5 = vmul.f32 0.03125, %v865_v1  ;;  %v877_v8 = vsub.f32 %v4236_v18, %v869_v0 }
 0x509   :  { %v875_v6 = vsub.f32 %v871_v5, %v873_v3 }
 0x50b   :  { %v879_v10 = vadd.f32 1e-05, %v875_v6 }
 0x50d   :  { %3779 = vrsqrt.f32 %v879_v10  ;;  %vm887_vm7 = vweird.f32 %v879_v10 }
 0x50e   :  { %3781 = vrcp.f32 %v528_v24 }
 0x513   :  { %v3780_v13 = vpop.eup %3779 }
 0x514   :  { %v882_v14 = vmul.f32 %v3780_v13, %v879_v10  ;;  %vm888_vm6 = vweird.f32 %v3780_v13  ;;  %v3782_v18 = vpop.eup %3781 }
 0x515   :  { %vm889_vm8 = vmor %vm887_vm7, %vm888_vm6  ;;  %v556_v25 = vmul.f32 %v3782_v18, %v528_v24  ;;  %vm561_vm9 = vweird.f32 %v3782_v18 }
 0x516   :  { %v883_v16 = vmul.f32 %v3780_v13, %v882_v14  ;;  %vm562_vm11 = vmor %vm560_vm10, %vm561_vm9 }
 0x517   :  { %v557_v26 = vsub.f32 1.0, %v556_v25 }
 0x518   :  { %v884_v17 = vmul.f32 0.5, %v883_v16 }
 0x519   :  { %v558_v11 = vmul.f32 %v3782_v18, %v557_v26 }
 0x51a   :  { %v885_v4 = vsub.f32 1.5, %v884_v17 }
 0x51b   :  { %v559_v28 = vadd.f32 %v3782_v18, %v558_v11 }
 0x51c   :  { %v886_v2 = vmul.f32 %v3780_v13, %v885_v4 }
 0x51d   :  { %v563_v31 = vsel %vm562_vm11, %v3782_v18, %v559_v28 }
 0x51e   :  { %v890_v20 = vsel %vm889_vm8, %v3780_v13, %v886_v2  ;;  %v568_v36 = vsel %vm565_vm12, %v567_v32, %v563_v31 }
 0x51f   :  { %v901_v21 = vmul.f32 %v890_v20, %v877_v8  ;;  %v570_v39 = vmul.f32 %v568_v36, %v552_v53 }
 0x521   :  { %v904_v23 = vmul.f32 %v4258_v19, %v901_v21 }
 0x523   :  { %v4265_v7 = vadd.f32 %v4261_v22, %v904_v23 }
 0x524   :  { %v818_v42 = vpop.permute.xlu2 %817 }
 0x525   :  { %3575 = vmatmul.msk.f32.vlgmr.msra.gmra.mxu1 %vm84_vm0, %v4265_v7 }
 0x533   :  { %v810_v35 = vpop.permute.xlu1 %809 }
 0x534   :  { %v820_v40 = vsel %vm161_vm1, %v570_v39, %v810_v35 }
 0x54a   :  { %v814_v41 = vpop.permute.xlu0 %813 }
 0x54b   :  { %v821_v44 = vsel %vm488_vm4, %v820_v40, %v814_v41 }
 0x54c   :  { %v822_v45 = vsel %vm490_vm5, %v821_v44, %v818_v42 }
 0x54d   :  { %3574 = vmatmul.msk.f32.gmra.mxu0 %vm84_vm0, %v822_v45 }
 0x552   :  { %v82_v46 = vpop.permute.xlu0 %81 }
 0x553   :  { %v4274_v47 = vadd.f32 %v4122_v34, %v82_v46  ;;  %v4281_v48 = vadd.f32 %v4120_v33, %v82_v46  ;;  %v4312_v53 = vadd.f32 %v4129_v37, %v82_v46  ;;  %v4330_v60 = vadd.f32 %v4131_v38, %v82_v46 }
 0x555   :  { %1027 = vrot.lane.b32.xlu2 %v4274_v47, %s3964_s23  ;;  %3577 = vmatpush.xpose.msk.msra.mxu3 %vm161_vm1, %v4274_v47  ;;  %v3714_v51 = vpack.i.bf16 %v4281_v48, %v4274_v47 }
 0x559   :  { %3578 = vmatpush.xpose.msk.msra.mxu3 %vm161_vm1, %v4281_v48 }
 0x55d   :  { %1025 = vrot.lane.b32.xlu2 %v4281_v48, %s3964_s23 }
 0x565   :  { %1199 = vrot.lane.b32.xlu2 %v4274_v47, %s3968_s29 }
 0x56d   :  { %1197 = vrot.lane.b32.xlu2 %v4281_v48, %s3968_s29 }
 0x5a2   :  { %v932_v34 = vpop.f32.mrf.mxu1 }
 0x5a3   :  { %v933_v43 = vadd.f32 %v932_v34, %v4247_v62 }
 0x5a5   :  { %v938_v49 = vmul.f32 0.35355338, %v933_v43 }
 0x5a7   :  { %1023 = vrot.lane.b32.xlu2 %v938_v49, %s3964_s23  ;;  %3579 = vmatmul.msk.f32.vlgmr.msra.gmra.mxu3 %vm161_vm1, %v938_v49 }
 0x5af   :  { %v4294_v33 = vpop.permute.xlu2 %1027  ;;  %1195 = vrot.lane.b32.xlu2 %v938_v49, %s3968_s29 }
 0x5b0   :  { %3581 = vmatpush.xpose.msk.msrb.mxu3 %vm161_vm1, %v4294_v33 }
 0x5b7   :  { %v4299_v50 = vpop.permute.xlu2 %1025  ;;  %1109 = vrot.lane.b32.xlu2 %v938_v49, %s3969_s30 }
 0x5b8   :  { %3582 = vmatpush.xpose.msk.msrb.mxu3 %vm161_vm1, %v4299_v50 }
 0x5bf   :  { %v4306_v52 = vpop.permute.xlu2 %1199  ;;  %3715 = vrot.lane.b32.xlu2 %v3714_v51, %s3965_s24 }
 0x5c0   :  { %3589 = vmatpush.xpose.msk.msra.mxu3 %vm161_vm1, %v4306_v52 }
 0x5c7   :  { %v4314_v54 = vpop.permute.xlu2 %1197  ;;  %1381 = vrot.lane.b32.xlu2 %v4312_v53, %s3964_s23 }
 0x5c8   :  { %3590 = vmatpush.xpose.msk.msra.mxu3 %vm161_vm1, %v4314_v54 }
 0x5ca   :  { %v850_v58 = vpop.f32.mrf.mxu0 }
 0x5cb   :  { %v851_v55 = vadd.f32 %v850_v58, %v4232_v15 }
 0x5cd   :  { %v854_v56 = vadd.f32 %v851_v55, %v4111_v27 }
 0x5cf   :  { %3725 = vrot.lane.b32.xlu2 %v3714_v51, %s3967_s28  ;;  %v858_v57 = vsel %vm84_vm0, %v854_v56, 0.0  ;;  %v862_v59 = vmul.f32 %v854_v56, %v854_v56 }
 0x5d0   :  { %859 = vadd.xlane.f32.xlu1 %v858_v57 }
 0x5d1   :  { %v866_v37 = vsel %vm84_vm0, %v862_v59, 0.0 }
 0x5d2   :  { %867 = vadd.xlane.f32.xlu0 %v866_v37 }
 0x5e6   :  { %1111 = vrot.lane.b32.xlu0 %v4281_v48, %s3969_s30 }
 0x5e9   :  { %1113 = vrot.lane.b32.xlu1 %v4274_v47, %s3969_s30 }
 0x5ee   :  { %1383 = vrot.lane.b32.xlu0 %v4330_v60, %s3964_s23 }
 0x5f1   :  { %3710 = vrot.lane.b32.xlu1 %v3714_v51, %s3962_s15 }
 0x5f9   :  { %3720 = vrot.lane.b32.xlu1 %v3714_v51, %s3966_s25 }
 0x601   :  { %v1024_v27 = vpop.permute.xlu2 %1023  ;;  %1553 = vrot.lane.b32.xlu1 %v4312_v53, %s3968_s29 }
 0x602   :  { %3583 = vmatmul.msk.f32.vlgmr.msrb.gmra.mxu3 %vm161_vm1, %v1024_v27 }
 0x609   :  { %v1196_v61 = vpop.permute.xlu2 %1195 }
 0x60a   :  { %3591 = vmatmul.msk.f32.vlgmr.msra.gmra.mxu3 %vm161_vm1, %v1196_v61 }
 0x611   :  { %v1110_v63 = vpop.permute.xlu2 %1109 }
 0x619   :  { %v4340_v0 = vpop.permute.xlu2 %3715 }
 0x61a   :  { %v3717_v41 = vunpack.i.l.bf16 %v4340_v0  ;;  %v3718_v42 = vunpack.i.h.bf16 %v4340_v0 }
 0x621   :  { %v4342_v38 = vpop.permute.xlu2 %1381 }
 0x629   :  { %v4344_v1 = vpop.permute.xlu2 %3725 }
 0x62a   :  { %v3727_v3 = vunpack.i.l.bf16 %v4344_v1  ;;  %v966_v5 = vpop.f32.mrf.mxu3  ;;  %v3728_v10 = vunpack.i.h.bf16 %v4344_v1 }
 0x62b   :  { %v969_v6 = vsel %vm488_vm4, %v966_v5, -inf }
 0x62c   :  { %1173 = vmatpush.msrb.mxu1 %v3727_v3  ;;  %970 = vmax.xlane.f32.xlu2 %v969_v6 }
 0x62e   :  { %1174 = vmatpush.msrb.mxu1 %v3728_v10 }
 0x643   :  { %v860_v13 = vpop.xlane.xlu1 %859 }
 0x644   :  { %v870_v14 = vmul.f32 0.03125, %v860_v13  ;;  %1555 = vrot.lane.b32.xlu2 %v4330_v60, %s3968_s29 }
 0x645   :  { %v868_v16 = vpop.xlane.xlu0 %867 }
 0x646   :  { %v874_v17 = vmul.f32 %v870_v14, %v870_v14  ;;  %v872_v4 = vmul.f32 0.03125, %v868_v16  ;;  %v878_v28 = vsub.f32 %v854_v56, %v870_v14 }
 0x648   :  { %v876_v2 = vsub.f32 %v872_v4, %v874_v17  ;;  %v4430_v17 = vpack.i.bf16 %v4312_v53, %v4330_v60 }
 0x64a   :  { %v880_v8 = vadd.f32 1e-05, %v876_v2 }
 0x64c   :  { %3783 = vrsqrt.f32 %v880_v8  ;;  %1469 = vrot.lane.b32.xlu2 %v4330_v60, %s3969_s30  ;;  %vm897_vm14 = vweird.f32 %v880_v8 }
 0x652   :  { %v3784_v20 = vpop.eup %3783 }
 0x653   :  { %v892_v21 = vmul.f32 %v3784_v20, %v880_v8  ;;  %vm898_vm13 = vweird.f32 %v3784_v20 }
 0x654   :  { %vm899_vm15 = vmor %vm897_vm14, %vm898_vm13 }
 0x655   :  { %v893_v23 = vmul.f32 %v3784_v20, %v892_v21 }
 0x657   :  { %v894_v24 = vmul.f32 0.5, %v893_v23 }
 0x658   :  { %v4357_v18 = vpop.permute.xlu0 %1111 }
 0x659   :  { %v895_v25 = vsub.f32 1.5, %v894_v24 }
 0x65b   :  { %v4359_v26 = vpop.permute.xlu1 %1113  ;;  %v896_v11 = vmul.f32 %v3784_v20, %v895_v25 }
 0x65c   :  { %3585 = vmatpush.xpose.msk.msra.mxu0 %vm161_vm1, %v4359_v26 }
 0x65d   :  { %v900_v29 = vsel %vm899_vm15, %v3784_v20, %v896_v11 }
 0x65e   :  { %v902_v30 = vmul.f32 %v900_v29, %v878_v28 }
 0x660   :  { %v4363_v31 = vpop.permute.xlu0 %1383  ;;  %3586 = vmatpush.xpose.msk.msra.mxu0 %vm161_vm1, %v4357_v18  ;;  %v905_v32 = vmul.f32 %v4258_v19, %v902_v30 }
 0x661   :  { %3597 = vmatpush.xpose.msk.msrb.mxu3 %vm161_vm1, %v4363_v31 }
 0x662   :  { %v4373_v36 = vadd.f32 %v4261_v22, %v905_v32 }
 0x663   :  { %3587 = vmatmul.msk.f32.vlgmr.msra.gmra.mxu0 %vm161_vm1, %v1110_v63  ;;  %v4376_v35 = vpop.permute.xlu1 %3710 }
 0x664   :  { %3593 = vmatpush.xpose.msk.msrb.mxu0 %vm161_vm1, %v4330_v60  ;;  %v3712_v39 = vunpack.i.l.bf16 %v4376_v35  ;;  %3576 = vmatmul.msk.f32.gmra.mxu1 %vm84_vm0, %v4373_v36  ;;  %v3713_v40 = vunpack.i.h.bf16 %v4376_v35 }
 0x665   :  { %3598 = vmatpush.xpose.msk.msrb.mxu3 %vm161_vm1, %v4342_v38 }
 0x666   :  { %1001 = vmatpush.msrb.mxu2 %v3712_v39 }
 0x668   :  { %3594 = vmatpush.xpose.msk.msrb.mxu0 %vm161_vm1, %v4312_v53  ;;  %1002 = vmatpush.msrb.mxu2 %v3713_v40 }
 0x66a   :  { %1087 = vmatpush.msra.mxu2 %v3717_v41 }
 0x66b   :  { %v4397_v49 = vpop.permute.xlu1 %3720 }
 0x66c   :  { %1088 = vmatpush.msra.mxu2 %v3718_v42  ;;  %v3722_v56 = vunpack.i.l.bf16 %v4397_v49  ;;  %v5043_v59 = vunpack.i.h.bf16 %v4397_v49 }
 0x673   :  { %v4409_v37 = vpop.permute.xlu1 %1553 }
 0x685   :  { %v1052_v44 = vpop.f32.mrf.mxu3 }
 0x686   :  { %v1055_v14 = vsel %vm488_vm4, %v1052_v44, -inf }
 0x68d   :  { %v1224_v45 = vpop.f32.mrf.mxu3 }
 0x68e   :  { %v1227_v46 = vsel %vm488_vm4, %v1224_v45, -inf }
 0x68f   :  { %1228 = vmax.xlane.f32.xlu1 %v1227_v46 }
 0x69f   :  { %v971_v34 = vpop.xlane.xlu2 %970 }
 0x6a0   :  { %v972_v43 = vsub.f32 %v966_v5, %v971_v34 }
 0x6a2   :  { %v973_v51 = vmul.f32 1.442695, %v972_v43 }
 0x6a4   :  { %3785 = vpow2.f32 %v973_v51 }
 0x6a7   :  { %v4399_v58 = vpop.permute.xlu2 %1555 }
 0x6a8   :  { %3605 = vmatpush.xpose.msk.msra.mxu3 %vm161_vm1, %v4399_v58  ;;  %1467 = vrot.lane.b32.xlu1 %v4312_v53, %s3969_s30 }
 0x6aa   :  { %v3786_v55 = vpop.eup %3785 }
 0x6ab   :  { %3580 = vmatmul.msk.f32.vlgmr.msrb.gmra.mxu2 %vm488_vm4, %v3786_v55  ;;  %v975_v57 = vsel %vm488_vm4, %v3786_v55, 0.0 }
 0x6ac   :  { %1259 = vmatpush.msrb.mxu2 %v3722_v56  ;;  %976 = vadd.xlane.f32.xlu2 %v975_v57 }
 0x6ad   :  { %3606 = vmatpush.xpose.msk.msra.mxu3 %vm161_vm1, %v4409_v37 }
 0x6ae   :  { %1260 = vmatpush.msrb.mxu2 %v5043_v59 }
 0x6af   :  { %v4417_v27 = vpop.permute.xlu2 %1469 }
 0x6b0   :  { %3601 = vmatpush.xpose.msk.msra.mxu0 %vm161_vm1, %v4417_v27 }
 0x6e0   :  { %v1138_v61 = vpop.f32.mrf.mxu0 }
 0x6e1   :  { %v935_v63 = vpop.f32.mrf.mxu1  ;;  %v1141_v5 = vsel %vm488_vm4, %v1138_v61, -inf }
 0x6e2   :  { %v936_v6 = vadd.f32 %v935_v63, %v4247_v62  ;;  %1142 = vmax.xlane.f32.xlu0 %v1141_v5 }
 0x6e4   :  { %v939_v13 = vmul.f32 0.35355338, %v936_v6 }
 0x6e6   :  { %3595 = vmatmul.msk.f32.vlgmr.msrb.gmra.mxu0 %vm161_vm1, %v939_v13 }
 0x6ea   :  { %1056 = vmax.xlane.f32.xlu0 %v1055_v14 }
 0x6fe   :  { %1379 = vrot.lane.b32.xlu0 %v939_v13, %s3964_s23 }
 0x702   :  { %v1229_v16 = vpop.xlane.xlu1 %1228 }
 0x703   :  { %v1230_v2 = vsub.f32 %v1224_v45, %v1229_v16 }
 0x705   :  { %v1231_v8 = vmul.f32 1.442695, %v1230_v2 }
 0x706   :  { %1551 = vrot.lane.b32.xlu0 %v939_v13, %s3968_s29 }
 0x707   :  { %3787 = vpow2.f32 %v1231_v8 }
 0x70d   :  { %v3788_v20 = vpop.eup %3787 }
 0x70e   :  { %1465 = vrot.lane.b32.xlu0 %v939_v13, %s3969_s30  ;;  %v1233_v21 = vsel %vm488_vm4, %v3788_v20, 0.0 }
 0x716   :  { %3730 = vrot.lane.b32.xlu0 %v4430_v17, %s3965_s24 }
 0x71a   :  { %v4434_v4 = vpop.permute.xlu1 %1467 }
 0x71b   :  { %3602 = vmatpush.xpose.msk.msra.mxu0 %vm161_vm1, %v4434_v4 }
 0x71f   :  { %v4459_v5 = vpop.xlane.xlu2 %976 }
 0x740   :  { %1234 = vadd.xlane.f32.xlu0 %v1233_v21 }
 0x755   :  { %v1143_v23 = vpop.xlane.xlu0 %1142 }
 0x756   :  { %v1144_v24 = vsub.f32 %v1138_v61, %v1143_v23 }
 0x758   :  { %v1145_v25 = vmul.f32 1.442695, %v1144_v24 }
 0x75a   :  { %3789 = vpow2.f32 %v1145_v25 }
 0x75d   :  { %v1057_v11 = vpop.xlane.xlu0 %1056 }
 0x75e   :  { %v1058_v28 = vsub.f32 %v1052_v44, %v1057_v11 }
 0x760   :  { %v3790_v29 = vpop.eup %3789  ;;  %v1059_v30 = vmul.f32 1.442695, %v1058_v28 }
 0x761   :  { %3588 = vmatmul.msk.f32.vlgmr.msrb.gmra.mxu1 %vm488_vm4, %v3790_v29  ;;  %v1147_v32 = vsel %vm488_vm4, %v3790_v29, 0.0  ;;  %v4461_v29 = vpop.f32.mrf.mxu2 }
 0x762   :  { %3791 = vpow2.f32 %v1059_v30  ;;  %1148 = vadd.xlane.f32.xlu1 %v1147_v32 }
 0x763   :  { %v4441_v45 = vpop.f32.mrf.mxu0 }
 0x764   :  { %v1325_v34 = vsel %vm488_vm4, %v4441_v45, -inf }
 0x768   :  { %v3792_v46 = vpop.eup %3791 }
 0x769   :  { %3584 = vmatmul.msk.f32.vlgmr.msra.gmra.mxu2 %vm488_vm4, %v3792_v46  ;;  %v1061_v43 = vsel %vm488_vm4, %v3792_v46, 0.0 }
 0x76a   :  { %1326 = vmax.xlane.f32.xlu1 %v1325_v34  ;;  %1062 = vadd.xlane.f32.xlu2 %v1061_v43 }
 0x770   :  { %v1380_v44 = vpop.permute.xlu0 %1379 }
 0x771   :  { %3592 = vmatmul.msk.f32.vlgmr.msrb.gmra.mxu2 %vm488_vm4, %v3788_v20  ;;  %3599 = vmatmul.msk.f32.vlgmr.msrb.gmra.mxu3 %vm161_vm1, %v1380_v44 }
 0x778   :  { %v1552_v51 = vpop.permute.xlu0 %1551 }
 0x779   :  { %3607 = vmatmul.msk.f32.vlgmr.msra.gmra.mxu3 %vm161_vm1, %v1552_v51 }
 0x780   :  { %v1466_v55 = vpop.permute.xlu0 %1465 }
 0x781   :  { %3603 = vmatmul.msk.f32.vlgmr.msra.gmra.mxu0 %vm161_vm1, %v1466_v55 }
 0x788   :  { %v4451_v57 = vpop.permute.xlu0 %3730 }
 0x789   :  { %v5038_v61 = vunpack.i.l.bf16 %v4451_v57  ;;  %v5037_v63 = vunpack.i.h.bf16 %v4451_v57 }
 0x78b   :  { %1443 = vmatpush.msra.mxu2 %v5038_v61 }
 0x78d   :  { %1444 = vmatpush.msra.mxu2 %v5037_v63 }
 0x7b3   :  { %v1235_v6 = vpop.xlane.xlu0 %1234 }
 0x7b4   :  { %vm1270_vm13 = vweird.f32 %v1235_v6 }
 0x7d5   :  { %v1149_v13 = vpop.xlane.xlu1 %1148 }
 0x7d6   :  { %3793 = vrcp.f32 %v1149_v13  ;;  %v1190_v21 = vand.u32 2147483648, %v1149_v13  ;;  %v1188_v25 = vand.u32 2147483647, %v1149_v13  ;;  %vm1184_vm3 = vweird.f32 %v1149_v13 }
 0x7d7   :  { %3795 = vrcp.f32 %v1235_v6 }
 0x7d8   :  { %v1191_v30 = vor.u32 1.1754944e-38, %v1190_v21  ;;  %vm1189_vm7 = vcmp.eq.f32.partialorder %v1188_v25, 8.507059e+37 }
 0x7dc   :  { %v3794_v14 = vpop.eup %3793 }
 0x7dd   :  { %v1180_v16 = vmul.f32 %v3794_v14, %v1149_v13  ;;  %v1063_v2 = vpop.xlane.xlu2 %1062  ;;  %v3796_v8 = vpop.eup %3795  ;;  %vm1185_vm2 = vweird.f32 %v3794_v14 }
 0x7de   :  { %3797 = vrcp.f32 %v1063_v2  ;;  %v1266_v23 = vmul.f32 %v3796_v8, %v1235_v6  ;;  %vm1186_vm6 = vmor %vm1184_vm3, %vm1185_vm2  ;;  %v1176_v43 = vpop.f32.mrf.mxu1  ;;  %vm1098_vm9 = vweird.f32 %v1063_v2  ;;  %vm1271_vm12 = vweird.f32 %v3796_v8 }
 0x7df   :  { %v1181_v20 = vsub.f32 1.0, %v1180_v16  ;;  %v1104_v16 = vand.u32 2147483648, %v1063_v2  ;;  %vm1272_vm14 = vmor %vm1270_vm13, %vm1271_vm12  ;;  %3799 = vrcp.f32 %v4459_v5  ;;  %vm1012_vm3 = vweird.f32 %v4459_v5 }
 0x7e0   :  { %v1267_v32 = vsub.f32 1.0, %v1266_v23 }
 0x7e1   :  { %v1182_v24 = vmul.f32 %v3794_v14, %v1181_v20  ;;  %v1105_v21 = vor.u32 1.1754944e-38, %v1104_v16  ;;  %v47_v16 = vld [vmem:[%s5032_s3 + $0x30] sm:$0xff] }
 0x7e2   :  { %v1268_v13 = vmul.f32 %v3796_v8, %v1267_v32 }
 0x7e3   :  { %v1183_v11 = vadd.f32 %v3794_v14, %v1182_v24  ;;  %v1102_v24 = vand.u32 2147483647, %v1063_v2 }
 0x7e4   :  { %v3798_v28 = vpop.eup %3797 }
 0x7e5   :  { %v1094_v46 = vmul.f32 %v3798_v28, %v1063_v2  ;;  %v1187_v34 = vsel %vm1186_vm6, %v3794_v14, %v1183_v11  ;;  %vm1099_vm8 = vweird.f32 %v3798_v28  ;;  %vm1103_vm11 = vcmp.eq.f32.partialorder %v1102_v24, 8.507059e+37  ;;  %v3800_v24 = vpop.eup %3799 }
 0x7e6   :  { %v1192_v44 = vsel %vm1189_vm7, %v1191_v30, %v1187_v34  ;;  %vm1100_vm10 = vmor %vm1098_vm9, %vm1099_vm8  ;;  %v1269_v14 = vadd.f32 %v3796_v8, %v1268_v13  ;;  %v1276_v11 = vand.u32 2147483648, %v1235_v6  ;;  %v1008_v13 = vmul.f32 %v3800_v24, %v4459_v5 }
 0x7e7   :  { %v1095_v51 = vsub.f32 1.0, %v1094_v46  ;;  %v1194_v55 = vmul.f32 %v1192_v44, %v1176_v43  ;;  %v1274_v46 = vand.u32 2147483647, %v1235_v6  ;;  %vm1013_vm2 = vweird.f32 %v3800_v24 }
 0x7e8   :  { %v1273_v34 = vsel %vm1272_vm14, %v3796_v8, %v1269_v14  ;;  %v1277_v43 = vor.u32 1.1754944e-38, %v1276_v11  ;;  %v48_v8 = vld [vmem:[%s5032_s3 + $0x38] sm:$0xff]  ;;  %v1016_v11 = vand.u32 2147483647, %v4459_v5  ;;  %vm1014_vm6 = vmor %vm1012_vm3, %vm1013_vm2 }
 0x7e9   :  { %1286 = vrot.lane.b32.xlu0 %v1194_v55, %s3975_s20  ;;  %v1096_v20 = vmul.f32 %v3798_v28, %v1095_v51  ;;  %vm1275_vm15 = vcmp.eq.f32.partialorder %v1274_v46, 8.507059e+37  ;;  %1671 = vmatpush.msrb.mxu0 %v48_v8 }
 0x7ea   :  { %v1278_v2 = vsel %vm1275_vm15, %v1277_v43, %v1273_v34  ;;  %vm1017_vm7 = vcmp.eq.f32.partialorder %v1016_v11, 8.507059e+37 }
 0x7eb   :  { %v1097_v63 = vadd.f32 %v3798_v28, %v1096_v20  ;;  %1672 = vmatpush.msrb.mxu0 %v47_v16  ;;  %v46_v20 = vld [vmem:[%s5032_s3 + $0x28] sm:$0xff] }
 0x7ec   :  { %v1090_v61 = vpop.f32.mrf.mxu2 }
 0x7ed   :  { %v1101_v23 = vsel %vm1100_vm10, %v3798_v28, %v1097_v63  ;;  %1673 = vmatpush.msrb.mxu0 %v46_v20 }
 0x7ee   :  { %v1106_v25 = vsel %vm1103_vm11, %v1105_v21, %v1101_v23  ;;  %v1009_v21 = vsub.f32 1.0, %v1008_v13 }
 0x7ef   :  { %v1108_v30 = vmul.f32 %v1106_v25, %v1090_v61  ;;  %v1018_v25 = vand.u32 2147483648, %v4459_v5 }
 0x7f0   :  { %v1010_v23 = vmul.f32 %v3800_v24, %v1009_v21 }
 0x7f1   :  { %1282 = vrot.lane.b32.xlu1 %v1108_v30, %s3974_s19  ;;  %v1327_v30 = vpop.xlane.xlu1 %1326  ;;  %v1019_v34 = vor.u32 1.1754944e-38, %v1018_v25 }
 0x7f2   :  { %v1011_v14 = vadd.f32 %v3800_v24, %v1010_v23 }
 0x7f4   :  { %v1262_v32 = vpop.f32.mrf.mxu2  ;;  %v1408_v63 = vpop.f32.mrf.mxu3  ;;  %v1015_v46 = vsel %vm1014_vm6, %v3800_v24, %v1011_v14 }
 0x7f5   :  { %v1280_v44 = vmul.f32 %v1278_v2, %v1262_v32  ;;  %v1411_v28 = vsel %vm488_vm4, %v1408_v63, -inf  ;;  %v1020_v43 = vsel %vm1017_vm7, %v1019_v34, %v1015_v46 }
 0x7f6   :  { %v1022_v32 = vmul.f32 %v1020_v43, %v4461_v29  ;;  %v1328_v29 = vsub.f32 %v4441_v45, %v1327_v30 }
 0x7f7   :  { %1290 = vrot.lane.b32.xlu2 %v1280_v44, %s3973_s1 }
 0x7f8   :  { %v1329_v11 = vmul.f32 1.442695, %v1328_v29 }
 0x7fc   :  { %v1580_v6 = vpop.f32.mrf.mxu3 }
 0x7fd   :  { %v1583_v55 = vsel %vm488_vm4, %v1580_v6, -inf }
 0x7fe   :  { %v1494_v51 = vpop.f32.mrf.mxu0 }
 0x7ff   :  { %v1497_v61 = vsel %vm488_vm4, %v1494_v51, -inf }
 0x813   :  { %1412 = vmax.xlane.f32.xlu0 %v1411_v28 }
 0x81b   :  { %1498 = vmax.xlane.f32.xlu1 %v1497_v61 }
 0x820   :  { %1584 = vmax.xlane.f32.xlu2 %v1583_v55 }
 0x827   :  { %3745 = vrot.lane.b32.xlu0 %v4430_v17, %s3967_s28 }
 0x834   :  { %3740 = vrot.lane.b32.xlu1 %v4430_v17, %s3966_s25 }
 0x838   :  { %3735 = vrot.lane.b32.xlu2 %v4430_v17, %s3962_s15  ;;  %v45_v17 = vld [vmem:[%s5032_s3 + $0x20] sm:$0xff] }
 0x839   :  { %1674 = vmatpush.msrb.mxu0 %v45_v17 }
 0x851   :  { %v1291_v61 = vpop.permute.xlu2 %1290 }
 0x85b   :  { %v1287_v44 = vpop.permute.xlu0 %1286 }
 0x863   :  { %v1283_v2 = vpop.permute.xlu1 %1282 }
 0x864   :  { %v1293_v28 = vsel %vm161_vm1, %v1022_v32, %v1283_v2 }
 0x865   :  { %v1294_v55 = vsel %vm488_vm4, %v1293_v28, %v1287_v44 }
 0x866   :  { %v1295_v8 = vsel %vm490_vm5, %v1294_v55, %v1291_v61 }
 0x867   :  { %3609 = vmatmul.msk.f32.vlgmr.msrb.gmra.mxu0 %vm84_vm0, %v1295_v8 }
 0x886   :  { %v1413_v5 = vpop.xlane.xlu0 %1412 }
 0x887   :  { %v1414_v16 = vsub.f32 %v1408_v63, %v1413_v5 }
 0x889   :  { %v1415_v20 = vmul.f32 1.442695, %v1414_v16  ;;  %v3905_v16 = vld [vmem:[%s5031_s2 + $0x18] sm:$0xff] }
 0x88b   :  { %3801 = vpow2.f32 %v1415_v20  ;;  %v3906_v20 = vld [vmem:[%s5031_s2 + $0x10] sm:$0xff] }
 0x88e   :  { %v1499_v17 = vpop.xlane.xlu1 %1498 }
 0x88f   :  { %v1500_v24 = vsub.f32 %v1494_v51, %v1499_v17  ;;  %v3907_v17 = vld [vmem:[%s5031_s2 + $0x8] sm:$0xff] }
 0x891   :  { %v3802_v13 = vpop.eup %3801  ;;  %v1501_v21 = vmul.f32 1.442695, %v1500_v24  ;;  %v3908_v24 = vld [vmem:[%s5031_s2] sm:$0xff] }
 0x892   :  { %3600 = vmatmul.msk.f32.vlgmr.msra.gmra.mxu2 %vm488_vm4, %v3802_v13  ;;  %v1417_v23 = vsel %vm488_vm4, %v3802_v13, 0.0  ;;  %v4545_v13 = vld [vmem:[%s5035_s6] sm:$0xff] }
 0x893   :  { %3803 = vpow2.f32 %v1501_v21  ;;  %1418 = vadd.xlane.f32.xlu2 %v1417_v23  ;;  %v1585_v14 = vpop.xlane.xlu2 %1584  ;;  %v4548_v29 = vperm.slane %v4545_v13, 3 }
 0x894   :  { %v1586_v25 = vsub.f32 %v1580_v6, %v1585_v14 }
 0x896   :  { %v1587_v46 = vmul.f32 1.442695, %v1586_v25 }
 0x898   :  { %3805 = vpow2.f32 %v1587_v46 }
 0x899   :  { %v3804_v63 = vpop.eup %3803  ;;  %3807 = vpow2.f32 %v1329_v11  ;;  %v4504_v30 = vpop.permute.xlu0 %3745 }
 0x89a   :  { %v1503_v34 = vsel %vm488_vm4, %v3804_v63, 0.0  ;;  %v5042_v44 = vunpack.i.l.bf16 %v4504_v30  ;;  %v5041_v28 = vunpack.i.h.bf16 %v4504_v30 }
 0x89b   :  { %v4501_v51 = vpop.permute.xlu2 %3735  ;;  %1504 = vadd.xlane.f32.xlu0 %v1503_v34 }
 0x89c   :  { %v3737_v45 = vunpack.i.l.bf16 %v4501_v51  ;;  %v3738_v32 = vunpack.i.h.bf16 %v4501_v51 }
 0x89e   :  { %v3806_v43 = vpop.eup %3805  ;;  %1357 = vmatpush.msra.mxu1 %v3737_v45 }
 0x89f   :  { %v3808_v6 = vpop.eup %3807  ;;  %v1589_v2 = vsel %vm488_vm4, %v3806_v43, 0.0 }
 0x8a0   :  { %1358 = vmatpush.msra.mxu1 %v3738_v32  ;;  %1590 = vadd.xlane.f32.xlu1 %v1589_v2  ;;  %v1331_v61 = vsel %vm488_vm4, %v3808_v6, 0.0 }
 0x8a1   :  { %3596 = vmatmul.msk.f32.vlgmr.msra.gmra.mxu1 %vm488_vm4, %v3808_v6 }
 0x8a2   :  { %1529 = vmatpush.msrb.mxu1 %v5042_v44 }
 0x8a3   :  { %1332 = vadd.xlane.f32.xlu0 %v1331_v61 }
 0x8a4   :  { %1530 = vmatpush.msrb.mxu1 %v5041_v28 }
 0x8a6   :  { %v4520_v55 = vpop.permute.xlu1 %3740 }
 0x8a7   :  { %v5040_v8 = vunpack.i.l.bf16 %v4520_v55  ;;  %v5039_v5 = vunpack.i.h.bf16 %v4520_v55 }
 0x8a9   :  { %3604 = vmatmul.msk.f32.vlgmr.msrb.gmra.mxu1 %vm488_vm4, %v3804_v63  ;;  %1615 = vmatpush.msrb.mxu2 %v5040_v8 }
 0x8ab   :  { %1616 = vmatpush.msrb.mxu2 %v5039_v5 }
 0x8ac   :  { %3608 = vmatmul.msk.f32.vlgmr.msrb.gmra.mxu2 %vm488_vm4, %v3806_v43 }
 0x8ad   :  { %1877 = vmatpush.msra.mxu2 %v3905_v16 }
 0x8af   :  { %1878 = vmatpush.msra.mxu2 %v3906_v20 }
 0x8b1   :  { %1879 = vmatpush.msra.mxu2 %v3907_v17 }
 0x8b3   :  { %1880 = vmatpush.msra.mxu2 %v3908_v24 }
 0x8e4   :  { %v1676_v21 = vpop.f32.mrf.mxu0 }
 0x8e5   :  { %v1677_v23 = vadd.f32 %v1676_v21, %v4548_v29 }
 0x8e7   :  { %v4552_v14 = vadd.f32 %v1677_v23, %v4265_v7 }
 0x8e9   :  { %v1684_v25 = vsel %vm84_vm0, %v4552_v14, 0.0  ;;  %v1690_v11 = vmul.f32 %v4552_v14, %v4552_v14 }
 0x8ea   :  { %1685 = vadd.xlane.f32.xlu2 %v1684_v25 }
 0x8eb   :  { %v1692_v46 = vsel %vm84_vm0, %v1690_v11, 0.0 }
 0x8f2   :  { %1693 = vadd.xlane.f32.xlu2 %v1692_v46 }
 0x906   :  { %v1419_v63 = vpop.xlane.xlu2 %1418 }
 0x907   :  { %3809 = vrcp.f32 %v1419_v63  ;;  %v1460_v61 = vand.u32 2147483648, %v1419_v63  ;;  %v1458_v16 = vand.u32 2147483647, %v1419_v63  ;;  %vm1454_vm9 = vweird.f32 %v1419_v63 }
 0x909   :  { %v1461_v21 = vor.u32 1.1754944e-38, %v1460_v61  ;;  %vm1459_vm11 = vcmp.eq.f32.partialorder %v1458_v16, 8.507059e+37 }
 0x90d   :  { %v3810_v34 = vpop.eup %3809 }
 0x90e   :  { %v1450_v43 = vmul.f32 %v3810_v34, %v1419_v63  ;;  %v1505_v6 = vpop.xlane.xlu0 %1504  ;;  %vm1455_vm8 = vweird.f32 %v3810_v34 }
 0x90f   :  { %3811 = vrcp.f32 %v1505_v6  ;;  %vm1456_vm10 = vmor %vm1454_vm9, %vm1455_vm8  ;;  %vm1540_vm13 = vweird.f32 %v1505_v6  ;;  %v1544_v61 = vand.u32 2147483647, %v1505_v6 }
 0x910   :  { %v1451_v2 = vsub.f32 1.0, %v1450_v43 }
 0x911   :  { %vm1545_vm15 = vcmp.eq.f32.partialorder %v1544_v61, 8.507059e+37  ;;  %v49_v61 = vld [vmem:[%s5033_s4] sm:$0xff] }
 0x912   :  { %v1452_v7 = vmul.f32 %v3810_v34, %v1451_v2 }
 0x913   :  { %v1591_v20 = vpop.xlane.xlu1 %1590 }
 0x914   :  { %3813 = vrcp.f32 %v1591_v20  ;;  %v1453_v17 = vadd.f32 %v3810_v34, %v1452_v7  ;;  %v1546_v7 = vand.u32 2147483648, %v1505_v6  ;;  %vm1626_vm3 = vweird.f32 %v1591_v20 }
 0x915   :  { %v3812_v24 = vpop.eup %3811  ;;  %v1446_v11 = vpop.f32.mrf.mxu2 }
 0x916   :  { %v1536_v23 = vmul.f32 %v3812_v24, %v1505_v6  ;;  %v1457_v25 = vsel %vm1456_vm10, %v3810_v34, %v1453_v17  ;;  %vm1541_vm12 = vweird.f32 %v3812_v24  ;;  %v1547_v16 = vor.u32 1.1754944e-38, %v1546_v7  ;;  %v51_v7 = vld [vmem:[%s5033_s4 + $0x10] sm:$0xff] }
 0x917   :  { %v1462_v46 = vsel %vm1459_vm11, %v1461_v21, %v1457_v25  ;;  %vm1542_vm14 = vmor %vm1540_vm13, %vm1541_vm12 }
 0x918   :  { %v1537_v5 = vsub.f32 1.0, %v1536_v23  ;;  %v1464_v8 = vmul.f32 %v1462_v46, %v1446_v11 }
 0x91a   :  { %v3814_v28 = vpop.eup %3813  ;;  %1638 = vrot.lane.b32.xlu0 %v1464_v8, %s3974_s19  ;;  %v1538_v43 = vmul.f32 %v3812_v24, %v1537_v5  ;;  %v1632_v8 = vand.u32 2147483648, %v1591_v20  ;;  %v1630_v5 = vand.u32 2147483647, %v1591_v20 }
 0x91b   :  { %v1622_v2 = vmul.f32 %v3814_v28, %v1591_v20  ;;  %vm1627_vm2 = vweird.f32 %v3814_v28 }
 0x91c   :  { %v1539_v59 = vadd.f32 %v3812_v24, %v1538_v43  ;;  %vm1628_vm6 = vmor %vm1626_vm3, %vm1627_vm2  ;;  %v1633_v43 = vor.u32 1.1754944e-38, %v1632_v8  ;;  %vm1631_vm7 = vcmp.eq.f32.partialorder %v1630_v5, 8.507059e+37  ;;  %v1333_v5 = vpop.xlane.xlu0 %1332 }
 0x91d   :  { %v1623_v63 = vsub.f32 1.0, %v1622_v2  ;;  %vm1368_vm12 = vweird.f32 %v1333_v5 }
 0x91e   :  { %v4560_v44 = vpop.f32.mrf.mxu1  ;;  %v1543_v34 = vsel %vm1542_vm14, %v3812_v24, %v1539_v59 }
 0x91f   :  { %v1624_v17 = vmul.f32 %v3814_v28, %v1623_v63  ;;  %v1548_v23 = vsel %vm1545_vm15, %v1547_v16, %v1543_v34  ;;  %v52_v63 = vld [vmem:[%s5033_s4 + $0x18] sm:$0xff]  ;;  %vm1770_vm15 = vcmask 523264  }
 0x920   :  { %1757 = vmatpush.msra.mxu1 %v52_v63 }
 0x921   :  { %v1625_v11 = vadd.f32 %v3814_v28, %v1624_v17 }
 0x922   :  { %1758 = vmatpush.msra.mxu1 %v51_v7  ;;  %v4581_v7 = vperm.slane %v4254_v9, 3 }
 0x923   :  { %v1629_v46 = vsel %vm1628_vm6, %v3814_v28, %v1625_v11  ;;  %v50_v28 = vld [vmem:[%s5033_s4 + $0x8] sm:$0xff] }
 0x924   :  { %v1634_v2 = vsel %vm1631_vm7, %v1633_v43, %v1629_v46  ;;  %1759 = vmatpush.msra.mxu1 %v50_v28  ;;  %v60_v28 = vld [vmem:[%s5034_s5 + $0x38] sm:$0xff] }
 0x925   :  { %1785 = vmatpush.msrb.mxu3 %v60_v28 }
 0x926   :  { %v1532_v21 = vpop.f32.mrf.mxu1  ;;  %1760 = vmatpush.msra.mxu1 %v49_v61  ;;  %v59_v61 = vld [vmem:[%s5034_s5 + $0x30] sm:$0xff] }
 0x927   :  { %v1550_v25 = vmul.f32 %v1548_v23, %v1532_v21  ;;  %1786 = vmatpush.msrb.mxu3 %v59_v61 }
 0x929   :  { %1642 = vrot.lane.b32.xlu1 %v1550_v25, %s3975_s20 }
 0x92f   :  { %v1618_v6 = vpop.f32.mrf.mxu2 }
 0x930   :  { %v1636_v59 = vmul.f32 %v1634_v2, %v1618_v6 }
 0x932   :  { %1646 = vrot.lane.b32.xlu2 %v1636_v59, %s3973_s1  ;;  %v4578_v59 = vperm.slane %v4545_v13, 7 }
 0x95d   :  { %v1686_v24 = vpop.xlane.xlu2 %1685 }
 0x95e   :  { %v1698_v20 = vmul.f32 0.03125, %v1686_v24 }
 0x960   :  { %v1702_v16 = vmul.f32 %v1698_v20, %v1698_v20  ;;  %v1706_v2 = vsub.f32 %v4552_v14, %v1698_v20  ;;  %v58_v20 = vld [vmem:[%s5034_s5 + $0x28] sm:$0xff] }
 0x961   :  { %1787 = vmatpush.msrb.mxu3 %v58_v20 }
 0x965   :  { %v1694_v34 = vpop.xlane.xlu2 %1693 }
 0x966   :  { %v1700_v17 = vmul.f32 0.03125, %v1694_v34 }
 0x968   :  { %v1704_v21 = vsub.f32 %v1700_v17, %v1702_v16  ;;  %v57_v16 = vld [vmem:[%s5034_s5 + $0x20] sm:$0xff] }
 0x969   :  { %1788 = vmatpush.msrb.mxu3 %v57_v16 }
 0x96a   :  { %v1708_v23 = vadd.f32 1e-05, %v1704_v21  ;;  %v56_v21 = vld [vmem:[%s5034_s5 + $0x18] sm:$0xff] }
 0x96b   :  { %1789 = vmatpush.msrb.mxu3 %v56_v21 }
 0x96c   :  { %3815 = vrsqrt.f32 %v1708_v23  ;;  %vm1716_vm9 = vweird.f32 %v1708_v23 }
 0x96d   :  { %3817 = vrcp.f32 %v1333_v5 }
 0x972   :  { %v3816_v25 = vpop.eup %3815 }
 0x973   :  { %v1711_v11 = vmul.f32 %v3816_v25, %v1708_v23  ;;  %vm1717_vm8 = vweird.f32 %v3816_v25  ;;  %v3818_v34 = vpop.eup %3817 }
 0x974   :  { %vm1718_vm10 = vmor %vm1716_vm9, %vm1717_vm8  ;;  %v1364_v17 = vmul.f32 %v3818_v34, %v1333_v5  ;;  %vm1369_vm11 = vweird.f32 %v3818_v34 }
 0x975   :  { %v1712_v8 = vmul.f32 %v3816_v25, %v1711_v11  ;;  %vm1370_vm13 = vmor %vm1368_vm12, %vm1369_vm11 }
 0x976   :  { %v1365_v23 = vsub.f32 1.0, %v1364_v17  ;;  %v4616_v17 = vperm.slane %v4545_v13, 4 }
 0x977   :  { %v1713_v46 = vmul.f32 0.5, %v1712_v8  ;;  %v1374_v8 = vand.u32 2147483648, %v1333_v5 }
 0x979   :  { %v1714_v43 = vsub.f32 1.5, %v1713_v46  ;;  %v1372_v46 = vand.u32 2147483647, %v1333_v5  ;;  %v55_v5 = vld [vmem:[%s5034_s5 + $0x10] sm:$0xff] }
 0x97a   :  { %1790 = vmatpush.msrb.mxu3 %v55_v5 }
 0x97b   :  { %v1715_v6 = vmul.f32 %v3816_v25, %v1714_v43  ;;  %vm1373_vm14 = vcmp.eq.f32.partialorder %v1372_v46, 8.507059e+37 }
 0x97d   :  { %v1719_v24 = vsel %vm1718_vm10, %v3816_v25, %v1715_v6  ;;  %v1366_v25 = vmul.f32 %v3818_v34, %v1365_v23  ;;  %v1375_v6 = vor.u32 1.1754944e-38, %v1374_v8 }
 0x97e   :  { %v1730_v63 = vmul.f32 %v1719_v24, %v1706_v2 }
 0x97f   :  { %v1367_v11 = vadd.f32 %v3818_v34, %v1366_v25 }
 0x980   :  { %v1733_v14 = vmul.f32 %v4578_v59, %v1730_v63 }
 0x981   :  { %v1371_v43 = vsel %vm1370_vm13, %v3818_v34, %v1367_v11  ;;  %v54_v34 = vld [vmem:[%s5034_s5 + $0x8] sm:$0xff] }
 0x982   :  { %v1736_v9 = vadd.f32 %v4581_v7, %v1733_v14  ;;  %v1376_v2 = vsel %vm1373_vm14, %v1375_v6, %v1371_v43  ;;  %1791 = vmatpush.msrb.mxu3 %v54_v34 }
 0x983   :  { %v1378_v63 = vmul.f32 %v1376_v2, %v4560_v44  ;;  %v53_v44 = vld [vmem:[%s5034_s5] sm:$0xff] }
 0x984   :  { %3611 = vmatmul.msk.f32.vlgmr.msra.gmra.mxu1 %vm84_vm0, %v1736_v9  ;;  %1792 = vmatpush.msrb.mxu3 %v53_v44 }
 0x98c   :  { %v1639_v24 = vpop.permute.xlu0 %1638  ;;  %v1647_v14 = vpop.permute.xlu2 %1646 }
 0x98d   :  { %v1649_v28 = vsel %vm161_vm1, %v1378_v63, %v1639_v24  ;;  %v4625_v24 = vperm.slane %v4545_v13, 5 }
 0x99b   :  { %v1643_v61 = vpop.permute.xlu1 %1642 }
 0x99c   :  { %v1650_v20 = vsel %vm488_vm4, %v1649_v28, %v1643_v61 }
 0x99d   :  { %v1651_v16 = vsel %vm490_vm5, %v1650_v20, %v1647_v14 }
 0x99e   :  { %3610 = vmatmul.msk.f32.gmra.mxu0 %vm84_vm0, %v1651_v16 }
 0xa01   :  { %v1762_v21 = vpop.f32.mrf.mxu1 }
 0xa02   :  { %v1763_v23 = vadd.f32 %v1762_v21, %v4616_v17 }
 0xa04   :  { %v1768_v25 = vmax.f32 %v1763_v23, 0.0 }
 0xa06   :  { %3613 = vmatmul.msk.f32.vlgmr.msrb.gmra.mxu3 %vm1770_vm15, %v1768_v25 }
 0xa1b   :  { %v1679_v11 = vpop.f32.mrf.mxu0 }
 0xa1c   :  { %v1680_v8 = vadd.f32 %v1679_v11, %v4548_v29 }
 0xa1e   :  { %v1683_v46 = vadd.f32 %v1680_v8, %v4373_v36 }
 0xa20   :  { %v1687_v43 = vsel %vm84_vm0, %v1683_v46, 0.0  ;;  %v1691_v6 = vmul.f32 %v1683_v46, %v1683_v46 }
 0xa21   :  { %1688 = vadd.xlane.f32.xlu0 %v1687_v43 }
 0xa22   :  { %v1695_v2 = vsel %vm84_vm0, %v1691_v6, 0.0 }
 0xa23   :  { %1696 = vadd.xlane.f32.xlu1 %v1695_v2 }
 0xa89   :  { %v1794_v63 = vpop.f32.mrf.mxu3 }
 0xa8a   :  { %v1800_v28 = vadd.f32 %v1794_v63, %v1736_v9 }
 0xa8c   :  { %v1803_v61 = vadd.f32 %v4625_v24, %v1800_v28 }
 0xa8e   :  { %v1805_v14 = vsel %vm84_vm0, %v1803_v61, 0.0  ;;  %v1811_v20 = vmul.f32 %v1803_v61, %v1803_v61 }
 0xa8f   :  { %1806 = vadd.xlane.f32.xlu2 %v1805_v14 }
 0xa90   :  { %v1813_v36 = vsel %vm84_vm0, %v1811_v20, 0.0 }
 0xa91   :  { %1814 = vadd.xlane.f32.xlu0 %v1813_v36 }
 0xa94   :  { %v1689_v16 = vpop.xlane.xlu0 %1688 }
 0xa95   :  { %v1699_v5 = vmul.f32 0.03125, %v1689_v16 }
 0xa96   :  { %v1697_v34 = vpop.xlane.xlu1 %1696 }
 0xa97   :  { %v1703_v44 = vmul.f32 %v1699_v5, %v1699_v5  ;;  %v1701_v21 = vmul.f32 0.03125, %v1697_v34  ;;  %v1707_v2 = vsub.f32 %v1683_v46, %v1699_v5 }
 0xa99   :  { %v1705_v23 = vsub.f32 %v1701_v21, %v1703_v44 }
 0xa9b   :  { %v1709_v25 = vadd.f32 1e-05, %v1705_v23 }
 0xa9d   :  { %3819 = vrsqrt.f32 %v1709_v25  ;;  %vm1726_vm3 = vweird.f32 %v1709_v25 }
 0xaa3   :  { %v3820_v13 = vpop.eup %3819 }
 0xaa4   :  { %v1721_v11 = vmul.f32 %v3820_v13, %v1709_v25  ;;  %vm1727_vm2 = vweird.f32 %v3820_v13 }
 0xaa5   :  { %vm1728_vm6 = vmor %vm1726_vm3, %vm1727_vm2 }
 0xaa6   :  { %v1722_v9 = vmul.f32 %v3820_v13, %v1721_v11 }
 0xaa8   :  { %v1723_v8 = vmul.f32 0.5, %v1722_v9 }
 0xaaa   :  { %v1724_v43 = vsub.f32 1.5, %v1723_v8 }
 0xaac   :  { %v1725_v6 = vmul.f32 %v3820_v13, %v1724_v43 }
 0xaae   :  { %v1729_v63 = vsel %vm1728_vm6, %v3820_v13, %v1725_v6  ;;  %v3910_v6 = vld [vmem:[%s5035_s6 + $0x8] sm:$0x3f] }
 0xaaf   :  { %v1731_v28 = vmul.f32 %v1729_v63, %v1707_v2  ;;  %v4636_v2 = vperm.slane %v3910_v6, 0 }
 0xab1   :  { %v1734_v14 = vmul.f32 %v4578_v59, %v1731_v28 }
 0xab3   :  { %v1737_v20 = vadd.f32 %v4581_v7, %v1734_v14  ;;  %v4638_v14 = vperm.slane %v3910_v6, 4 }
 0xab5   :  { %3612 = vmatmul.msk.f32.gmra.mxu1 %vm84_vm0, %v1737_v20 }
 0xb02   :  { %v1807_v36 = vpop.xlane.xlu2 %1806 }
 0xb03   :  { %v1819_v16 = vmul.f32 0.03125, %v1807_v36 }
 0xb04   :  { %v1815_v34 = vpop.xlane.xlu0 %1814 }
 0xb05   :  { %v1823_v44 = vmul.f32 %v1819_v16, %v1819_v16  ;;  %v1821_v21 = vmul.f32 0.03125, %v1815_v34  ;;  %v1827_v43 = vsub.f32 %v1803_v61, %v1819_v16 }
 0xb07   :  { %v1825_v23 = vsub.f32 %v1821_v21, %v1823_v44 }
 0xb09   :  { %v1829_v11 = vadd.f32 1e-05, %v1825_v23 }
 0xb0b   :  { %3821 = vrsqrt.f32 %v1829_v11  ;;  %vm1837_vm8 = vweird.f32 %v1829_v11 }
 0xb11   :  { %v3822_v9 = vpop.eup %3821 }
 0xb12   :  { %v1832_v25 = vmul.f32 %v3822_v9, %v1829_v11  ;;  %vm1838_vm7 = vweird.f32 %v3822_v9 }
 0xb13   :  { %vm1839_vm9 = vmor %vm1837_vm8, %vm1838_vm7 }
 0xb14   :  { %v1833_v46 = vmul.f32 %v3822_v9, %v1832_v25 }
 0xb16   :  { %v1834_v5 = vmul.f32 0.5, %v1833_v46 }
 0xb18   :  { %v1835_v13 = vsub.f32 1.5, %v1834_v5 }
 0xb1a   :  { %v1836_v8 = vmul.f32 %v3822_v9, %v1835_v13 }
 0xb1c   :  { %v1840_v63 = vsel %vm1839_vm9, %v3822_v9, %v1836_v8 }
 0xb1d   :  { %v1851_v28 = vmul.f32 %v1840_v63, %v1827_v43 }
 0xb1f   :  { %v1854_v36 = vmul.f32 %v4636_v2, %v1851_v28 }
 0xb21   :  { %v4642_v34 = vadd.f32 %v4638_v14, %v1854_v36 }
 0xb23   :  { %3615 = vmatmul.msk.f32.vlgmr.msra.gmra.mxu2 %vm84_vm0, %v4642_v34 }
 0xb32   :  { %v1765_v61 = vpop.f32.mrf.mxu1 }
 0xb33   :  { %v1766_v16 = vadd.f32 %v1765_v61, %v4616_v17 }
 0xb35   :  { %v1769_v44 = vmax.f32 %v1766_v16, 0.0 }
 0xb37   :  { %3614 = vmatmul.msk.f32.gmra.mxu3 %vm1770_vm15, %v1769_v44 }
 0xba6   :  { %v1882_v21 = vpop.f32.mrf.mxu2 }
 0xba7   :  { %v4649_v23 = vadd.f32 %v1882_v21, %v4069_v12 }
 0xba9   :  { %1891 = vrot.lane.b32.xlu2 %v4649_v23, %s3962_s15  ;;  %v1888_v11 = vmul.f32 0.35355338, %v4649_v23 }
 0xbb1   :  { %2129 = vrot.lane.b32.xlu2 %v4649_v23, %s3966_s25 }
 0xbb9   :  { %1969 = vrot.lane.b32.xlu2 %v1888_v11, %s3964_s23 }
 0xbba   :  { %v1797_v9 = vpop.f32.mrf.mxu3 }
 0xbbb   :  { %v1801_v25 = vadd.f32 %v1797_v9, %v1737_v20 }
 0xbbd   :  { %v1804_v46 = vadd.f32 %v4625_v24, %v1801_v25 }
 0xbbf   :  { %v1808_v5 = vsel %vm84_vm0, %v1804_v46, 0.0  ;;  %v1812_v13 = vmul.f32 %v1804_v46, %v1804_v46 }
 0xbc0   :  { %1809 = vadd.xlane.f32.xlu1 %v1808_v5 }
 0xbc1   :  { %v1816_v8 = vsel %vm84_vm0, %v1812_v13, 0.0 }
 0xbc2   :  { %1817 = vadd.xlane.f32.xlu0 %v1816_v8 }
 0xbd6   :  { %1971 = vrot.lane.b32.xlu0 %v4649_v23, %s3965_s24 }
 0xbd9   :  { %1927 = vrot.lane.b32.xlu1 %v4649_v23, %s3963_s22 }
 0xbde   :  { %2050 = vrot.lane.b32.xlu0 %v4649_v23, %s3967_s28 }
 0xbe1   :  { %2127 = vrot.lane.b32.xlu1 %v1888_v11, %s3968_s29 }
 0xbe6   :  { %2048 = vrot.lane.b32.xlu0 %v1888_v11, %s3969_s30 }
 0xc03   :  { %v1892_v20 = vpop.permute.xlu2 %1891 }
 0xc04   :  { %3617 = vmatpush.xpose.msk.msra.mxu0 %vm161_vm1, %v1892_v20 }
 0xc07   :  { %3618 = vmatmul.msk.f32.vlgmr.msra.gmra.mxu0 %vm161_vm1, %v1888_v11 }
 0xc0b   :  { %v2130_v13 = vpop.permute.xlu2 %2129 }
 0xc33   :  { %v1810_v43 = vpop.xlane.xlu1 %1809 }
 0xc34   :  { %v1820_v6 = vmul.f32 0.03125, %v1810_v43 }
 0xc35   :  { %v1818_v63 = vpop.xlane.xlu0 %1817 }
 0xc36   :  { %v1824_v28 = vmul.f32 %v1820_v6, %v1820_v6  ;;  %v1822_v36 = vmul.f32 0.03125, %v1818_v63  ;;  %v1828_v43 = vsub.f32 %v1804_v46, %v1820_v6 }
 0xc38   :  { %v1826_v61 = vsub.f32 %v1822_v36, %v1824_v28 }
 0xc3a   :  { %v1830_v16 = vadd.f32 1e-05, %v1826_v61 }
 0xc3c   :  { %3823 = vrsqrt.f32 %v1830_v16  ;;  %vm1847_vm11 = vweird.f32 %v1830_v16 }
 0xc42   :  { %v3824_v44 = vpop.eup %3823 }
 0xc43   :  { %v1842_v21 = vmul.f32 %v3824_v44, %v1830_v16  ;;  %vm1848_vm10 = vweird.f32 %v3824_v44 }
 0xc44   :  { %vm1849_vm12 = vmor %vm1847_vm11, %vm1848_vm10 }
 0xc45   :  { %v1843_v9 = vmul.f32 %v3824_v44, %v1842_v21 }
 0xc47   :  { %v1844_v25 = vmul.f32 0.5, %v1843_v9  ;;  %v1970_v9 = vpop.permute.xlu2 %1969 }
 0xc48   :  { %v1972_v5 = vpop.permute.xlu0 %1971 }
 0xc49   :  { %v1845_v8 = vsub.f32 1.5, %v1844_v25  ;;  %3620 = vmatpush.xpose.msk.msrb.mxu2 %vm161_vm1, %v1972_v5 }
 0xc4b   :  { %v1846_v11 = vmul.f32 %v3824_v44, %v1845_v8  ;;  %v1928_v20 = vpop.permute.xlu1 %1927 }
 0xc4c   :  { %1948 = vmatpush.msrb.mxu1 %v1928_v20 }
 0xc4d   :  { %3626 = vmatpush.xpose.msk.msra.mxu2 %vm161_vm1, %v2130_v13  ;;  %v1850_v63 = vsel %vm1849_vm12, %v3824_v44, %v1846_v11 }
 0xc4e   :  { %v1852_v28 = vmul.f32 %v1850_v63, %v1828_v43 }
 0xc50   :  { %v2051_v36 = vpop.permute.xlu0 %2050  ;;  %v1855_v61 = vmul.f32 %v4636_v2, %v1852_v28 }
 0xc51   :  { %3623 = vmatpush.xpose.msk.msra.mxu1 %vm161_vm1, %v2051_v36 }
 0xc52   :  { %v4675_v21 = vadd.f32 %v4638_v14, %v1855_v61 }
 0xc53   :  { %v2128_v16 = vpop.permute.xlu1 %2127 }
 0xc54   :  { %3616 = vmatmul.msk.f32.gmra.mxu2 %vm84_vm0, %v4675_v21 }
 0xc58   :  { %v2049_v63 = vpop.permute.xlu0 %2048 }
 0xc5c   :  { %3621 = vmatmul.msk.f32.vlgmr.msrb.gmra.mxu2 %vm161_vm1, %v1970_v9 }
 0xc64   :  { %3627 = vmatmul.msk.f32.vlgmr.msra.gmra.mxu2 %vm161_vm1, %v2128_v16  ;;  %v3911_v16 = vld [vmem:[%s5032_s3 + $0x18] sm:$0xff] }
 0xc84   :  { %v1915_v46 = vpop.f32.mrf.mxu0 }
 0xc85   :  { %v1918_v6 = vsel %vm161_vm1, %v1915_v46, -inf }
 0xc86   :  { %1919 = vmax.xlane.f32.xlu1 %v1918_v6  ;;  %v3914_v6 = vld [vmem:[%s5032_s3] sm:$0xff] }
 0xcd7   :  { %v1885_v44 = vpop.f32.mrf.mxu2 }
 0xcd8   :  { %v4683_v25 = vadd.f32 %v1885_v44, %v4069_v12 }
 0xcda   :  { %2302 = vrot.lane.b32.xlu0 %v4683_v25, %s3965_s24  ;;  %2222 = vrot.lane.b32.xlu2 %v4683_v25, %s3962_s15  ;;  %v1889_v5 = vmul.f32 0.35355338, %v4683_v25  ;;  %s3531_s15 = sshll.u32 %s5036_s7, 4  ;;  %s3532_s15 = int_to_ptr.hbm [resolvable:$true] %s3531_s15 }
 0xcdc   :  { %2300 = vrot.lane.b32.xlu1 %v1889_v5, %s3964_s23 }
 0xcdf   :  { %v1994_v20 = vpop.f32.mrf.mxu2 }
 0xce0   :  { %v1997_v43 = vsel %vm161_vm1, %v1994_v20, -inf }
 0xce2   :  { %2460 = vrot.lane.b32.xlu0 %v4683_v25, %s3966_s25  ;;  %2381 = vrot.lane.b32.xlu2 %v4683_v25, %s3967_s28  ;;  %s3977_s25 = smov 128  }
 0xce4   :  { %2379 = vrot.lane.b32.xlu1 %v1889_v5, %s3969_s30 }
 0xce7   :  { %v2152_v28 = vpop.f32.mrf.mxu2 }
 0xce8   :  { %v2155_v36 = vsel %vm161_vm1, %v2152_v28, -inf }
 0xcea   :  { %2458 = vrot.lane.b32.xlu2 %v1889_v5, %s3968_s29 }
 0xcec   :  { %2006 = vrot.lane.b32.xlu1 %v4649_v23, %s3972_s0 }
 0xcf4   :  { %2258 = vrot.lane.b32.xlu1 %v4683_v25, %s3963_s22  ;;  %s3976_s22 = smov [#allocation2]  }
 0xcf5   :  { %s3529_s24 = sshll.u32 %s3976_s22, 4  ;;  %s3530_s24 = int_to_ptr.vmem [resolvable:$true] %s3529_s24 }
 0xcf9   :  { %v1920_v12 = vpop.xlane.xlu1 %1919 }
 0xcfa   :  { %v1921_v13 = vsub.f32 %v1915_v46, %v1920_v12  ;;  %v3912_v46 = vld [vmem:[%s5032_s3 + $0x10] sm:$0xff] }
 0xcfc   :  { %v1922_v8 = vmul.f32 1.442695, %v1921_v13 }
 0xcfe   :  { %3825 = vpow2.f32 %v1922_v8 }
 0xd04   :  { %v4701_v11 = vpop.eup %3825 }
 0xd05   :  { %3619 = vmatmul.msk.f32.vlgmr.msrb.gmra.mxu1 %vm161_vm1, %v4701_v11 }
 0xd0c   :  { %1998 = vmax.xlane.f32.xlu0 %v1997_v43 }
 0xd0d   :  { %3624 = vmatmul.msk.f32.vlgmr.msra.gmra.mxu1 %vm161_vm1, %v2049_v63 }
 0xd13   :  { %2156 = vmax.xlane.f32.xlu2 %v2155_v36 }
 0xd20   :  { %2164 = vrot.lane.b32.xlu0 %v4649_v23, %s3971_s9 }
 0xd2b   :  { %2085 = vrot.lane.b32.xlu2 %v4649_v23, %s3970_s8  ;;  %v3913_v23 = vld [vmem:[%s5032_s3 + $0x8] sm:$0xff] }
 0xd34   :  { %v2223_v61 = vpop.permute.xlu2 %2222 }
 0xd35   :  { %3629 = vmatpush.xpose.msk.msrb.mxu1 %vm161_vm1, %v2223_v61 }
 0xd38   :  { %3630 = vmatmul.msk.f32.vlgmr.msrb.gmra.mxu1 %vm161_vm1, %v1889_v5 }
 0xd3c   :  { %v2382_v9 = vpop.permute.xlu2 %2381 }
 0xd3d   :  { %3635 = vmatpush.xpose.msk.msra.mxu1 %vm161_vm1, %v2382_v9 }
 0xd41   :  { %2570 = vmatpush.msrb.mxu1 %v3911_v16 }
 0xd43   :  { %2571 = vmatpush.msrb.mxu1 %v3912_v46 }
 0xd44   :  { %v2459_v8 = vpop.permute.xlu2 %2458 }
 0xd45   :  { %2572 = vmatpush.msrb.mxu1 %v3913_v23 }
 0xd47   :  { %2573 = vmatpush.msrb.mxu1 %v3914_v6 }
 0xd4c   :  { %v2303_v44 = vpop.permute.xlu0 %2302 }
 0xd4d   :  { %3632 = vmatpush.xpose.msk.msrb.mxu2 %vm161_vm1, %v2303_v44 }
 0xd4e   :  { %v2301_v5 = vpop.permute.xlu1 %2300 }
 0xd50   :  { %3633 = vmatmul.msk.f32.vlgmr.msrb.gmra.mxu2 %vm161_vm1, %v2301_v5 }
 0xd54   :  { %v2461_v12 = vpop.permute.xlu0 %2460 }
 0xd55   :  { %3638 = vmatpush.xpose.msk.msra.mxu2 %vm161_vm1, %v2461_v12 }
 0xd56   :  { %v2380_v13 = vpop.permute.xlu1 %2379 }
 0xd57   :  { %3636 = vmatmul.msk.f32.vlgmr.msra.gmra.mxu1 %vm161_vm1, %v2380_v13 }
 0xd58   :  { %3653 = vmatpush.xpose.msk.msra.mxu1 %vm161_vm1, %v4359_v26  ;;  %3639 = vmatmul.msk.f32.vlgmr.msra.gmra.mxu2 %vm161_vm1, %v2459_v8 }
 0xd59   :  { %3645 = vmatpush.xpose.msk.msrb.mxu2 %vm161_vm1, %v4274_v47 }
 0xd5c   :  { %3654 = vmatpush.xpose.msk.msra.mxu1 %vm161_vm1, %v4357_v18 }
 0xd5d   :  { %3646 = vmatpush.xpose.msk.msrb.mxu2 %vm161_vm1, %v4281_v48 }
 0xd5e   :  { %v2007_v43 = vpop.permute.xlu1 %2006 }
 0xd5f   :  { %2027 = vmatpush.msrb.mxu0 %v2007_v43 }
 0xd61   :  { %3649 = vmatpush.xpose.msk.msra.mxu2 %vm161_vm1, %v4294_v33 }
 0xd65   :  { %3650 = vmatpush.xpose.msk.msra.mxu2 %vm161_vm1, %v4299_v50 }
 0xd66   :  { %v2259_v23 = vpop.permute.xlu1 %2258 }
 0xd7f   :  { %v1999_v47 = vpop.xlane.xlu0 %1998 }
 0xd80   :  { %v2000_v63 = vsub.f32 %v1994_v20, %v1999_v47 }
 0xd82   :  { %v2001_v36 = vmul.f32 1.442695, %v2000_v63  ;;  %v4744_v26 = vpop.f32.mrf.mxu1 }
 0xd84   :  { %3827 = vpow2.f32 %v2001_v36 }
 0xd86   :  { %v2157_v61 = vpop.xlane.xlu2 %2156 }
 0xd87   :  { %v2158_v9 = vsub.f32 %v2152_v28, %v2157_v61 }
 0xd89   :  { %v2159_v48 = vmul.f32 1.442695, %v2158_v9 }
 0xd8a   :  { %v3828_v16 = vpop.eup %3827  ;;  %v2073_v46 = vpop.f32.mrf.mxu1 }
 0xd8b   :  { %3622 = vmatmul.msk.f32.vlgmr.msrb.gmra.mxu0 %vm161_vm1, %v3828_v16  ;;  %v2076_v33 = vsel %vm161_vm1, %v2073_v46, -inf  ;;  %3829 = vpow2.f32 %v2159_v48  ;;  %v2003_v12 = vsel %vm161_vm1, %v3828_v16, 0.0 }
 0xd8c   :  { %2077 = vmax.xlane.f32.xlu1 %v2076_v33 }
 0xd8e   :  { %v2086_v18 = vpop.permute.xlu2 %2085 }
 0xd8f   :  { %2106 = vmatpush.msra.mxu3 %v2086_v18 }
 0xd91   :  { %2279 = vmatpush.msrb.mxu3 %v2259_v23  ;;  %v3830_v20 = vpop.eup %3829 }
 0xd92   :  { %v2165_v50 = vpop.permute.xlu0 %2164  ;;  %v2161_v63 = vsel %vm161_vm1, %v3830_v20, 0.0 }
 0xd93   :  { %2185 = vmatpush.msra.mxu0 %v2165_v50 }
 0xd94   :  { %3628 = vmatmul.msk.f32.vlgmr.msra.gmra.mxu0 %vm161_vm1, %v3830_v20 }
 0xda5   :  { %2337 = vrot.lane.b32.xlu1 %v4683_v25, %s3972_s0 }
 0xdad   :  { %2416 = vrot.lane.b32.xlu1 %v4683_v25, %s3970_s8 }
 0xdb5   :  { %v2246_v28 = vpop.f32.mrf.mxu1 }
 0xdb6   :  { %v2249_v6 = vsel %vm161_vm1, %v2246_v28, -inf }
 0xdb7   :  { %2250 = vmax.xlane.f32.xlu0 %v2249_v6 }
 0xdd3   :  { %v2325_v44 = vpop.f32.mrf.mxu2 }
 0xdd4   :  { %v2328_v5 = vsel %vm161_vm1, %v2325_v44, -inf  ;;  %v2404_v13 = vpop.f32.mrf.mxu1 }
 0xdd5   :  { %2329 = vmax.xlane.f32.xlu0 %v2328_v5  ;;  %v2407_v47 = vsel %vm161_vm1, %v2404_v13, -inf  ;;  %v3916_v5 = vld [vmem:[%s5031_s2 + $0x30] sm:$0xff] }
 0xdd7   :  { %2004 = vadd.xlane.f32.xlu1 %v2003_v12  ;;  %v3918_v12 = vld [vmem:[%s5031_s2 + $0x20] sm:$0xff] }
 0xddb   :  { %v2483_v8 = vpop.f32.mrf.mxu2 }
 0xddc   :  { %v2486_v43 = vsel %vm161_vm1, %v2483_v8, -inf }
 0xddd   :  { %2487 = vmax.xlane.f32.xlu2 %v2486_v43  ;;  %2408 = vmax.xlane.f32.xlu0 %v2407_v47 }
 0xde5   :  { %2162 = vadd.xlane.f32.xlu2 %v2161_v63 }
 0xdf1   :  { %2495 = vrot.lane.b32.xlu0 %v4683_v25, %s3971_s9 }
 0xdff   :  { %v2078_v36 = vpop.xlane.xlu1 %2077 }
 0xe00   :  { %v2079_v61 = vsub.f32 %v2073_v46, %v2078_v36  ;;  %v3915_v46 = vld [vmem:[%s5031_s2 + $0x38] sm:$0xff] }
 0xe02   :  { %v2080_v9 = vmul.f32 1.442695, %v2079_v61 }
 0xe04   :  { %3831 = vpow2.f32 %v2080_v9 }
 0xe0a   :  { %v3832_v48 = vpop.eup %3831 }
 0xe0b   :  { %3625 = vmatmul.msk.f32.vlgmr.msra.gmra.mxu3 %vm161_vm1, %v3832_v48  ;;  %v2082_v33 = vsel %vm161_vm1, %v3832_v48, 0.0 }
 0xe17   :  { %v2338_v16 = vpop.permute.xlu1 %2337 }
 0xe18   :  { %2358 = vmatpush.msrb.mxu0 %v2338_v16 }
 0xe1b   :  { %2083 = vadd.xlane.f32.xlu0 %v2082_v33 }
 0xe1f   :  { %v2417_v18 = vpop.permute.xlu1 %2416 }
 0xe20   :  { %2437 = vmatpush.msra.mxu3 %v2417_v18 }
 0xe2a   :  { %v2251_v23 = vpop.xlane.xlu0 %2250 }
 0xe2b   :  { %v2252_v50 = vsub.f32 %v2246_v28, %v2251_v23  ;;  %v3917_v28 = vld [vmem:[%s5031_s2 + $0x28] sm:$0xff] }
 0xe2d   :  { %v2253_v20 = vmul.f32 1.442695, %v2252_v50 }
 0xe2f   :  { %3833 = vpow2.f32 %v2253_v20 }
 0xe35   :  { %v3834_v6 = vpop.eup %3833 }
 0xe36   :  { %3631 = vmatmul.msk.f32.vlgmr.msrb.gmra.mxu3 %vm161_vm1, %v3834_v6  ;;  %v2255_v25 = vsel %vm161_vm1, %v3834_v6, 0.0 }
 0xe37   :  { %2256 = vadd.xlane.f32.xlu0 %v2255_v25  ;;  %2653 = vmatpush.msrb.mxu3 %v3915_v46 }
 0xe39   :  { %2654 = vmatpush.msrb.mxu3 %v3916_v5 }
 0xe3b   :  { %2655 = vmatpush.msrb.mxu3 %v3917_v28  ;;  %v2029_v28 = vpop.f32.mrf.mxu0 }
 0xe3d   :  { %2656 = vmatpush.msrb.mxu3 %v3918_v12 }
 0xe48   :  { %v2330_v43 = vpop.xlane.xlu0 %2329 }
 0xe49   :  { %v2331_v47 = vsub.f32 %v2325_v44, %v2330_v43 }
 0xe4a   :  { %v2005_v9 = vpop.xlane.xlu1 %2004 }
 0xe4b   :  { %v2332_v63 = vmul.f32 1.442695, %v2331_v47  ;;  %vm2037_vm7 = vweird.f32 %v2005_v9 }
 0xe4d   :  { %3835 = vpow2.f32 %v2332_v63 }
 0xe4e   :  { %3837 = vrcp.f32 %v2005_v9 }
 0xe50   :  { %v2488_v36 = vpop.xlane.xlu2 %2487  ;;  %v2409_v61 = vpop.xlane.xlu0 %2408 }
 0xe51   :  { %v2489_v48 = vsub.f32 %v2483_v8, %v2488_v36  ;;  %v2410_v16 = vsub.f32 %v2404_v13, %v2409_v61 }
 0xe53   :  { %v3836_v33 = vpop.eup %3835  ;;  %v2490_v18 = vmul.f32 1.442695, %v2489_v48  ;;  %v2411_v23 = vmul.f32 1.442695, %v2410_v16  ;;  %v1924_v16 = vsel %vm161_vm1, %v4701_v11, 0.0 }
 0xe54   :  { %3634 = vmatmul.msk.f32.vlgmr.msrb.gmra.mxu0 %vm161_vm1, %v3836_v33  ;;  %v2334_v50 = vsel %vm161_vm1, %v3836_v33, 0.0  ;;  %v3838_v44 = vpop.eup %3837 }
 0xe55   :  { %3839 = vpow2.f32 %v2490_v18  ;;  %2335 = vadd.xlane.f32.xlu2 %v2334_v50  ;;  %v2033_v8 = vmul.f32 %v3838_v44, %v2005_v9  ;;  %v2187_v18 = vpop.f32.mrf.mxu0  ;;  %vm2038_vm6 = vweird.f32 %v3838_v44 }
 0xe56   :  { %3841 = vpow2.f32 %v2411_v23  ;;  %vm2039_vm8 = vmor %vm2037_vm7, %vm2038_vm6 }
 0xe57   :  { %v2034_v43 = vsub.f32 1.0, %v2033_v8 }
 0xe58   :  { %v2163_v20 = vpop.xlane.xlu2 %2162 }
 0xe59   :  { %3843 = vrcp.f32 %v2163_v20  ;;  %v2201_v63 = vand.u32 2147483648, %v2163_v20  ;;  %v2199_v48 = vand.u32 2147483647, %v2163_v20  ;;  %vm2195_vm14 = vweird.f32 %v2163_v20 }
 0xe5b   :  { %v3840_v6 = vpop.eup %3839  ;;  %v2202_v1 = vor.u32 1.1754944e-38, %v2201_v63  ;;  %vm2200_vm3 = vcmp.eq.f32.partialorder %v2199_v48, 8.507059e+37 }
 0xe5c   :  { %v3842_v25 = vpop.eup %3841  ;;  %v2492_v46 = vsel %vm161_vm1, %v3840_v6, 0.0 }
 0xe5d   :  { %3637 = vmatmul.msk.f32.vlgmr.msra.gmra.mxu3 %vm161_vm1, %v3842_v25  ;;  %2493 = vadd.xlane.f32.xlu1 %v2492_v46  ;;  %v2413_v13 = vsel %vm161_vm1, %v3842_v25, 0.0 }
 0xe5e   :  { %2859 = vmatpush.msra.mxu3 %v3727_v3  ;;  %2414 = vadd.xlane.f32.xlu2 %v2413_v13  ;;  %v2035_v3 = vmul.f32 %v3838_v44, %v2034_v43 }
 0xe5f   :  { %v3844_v5 = vpop.eup %3843 }
 0xe60   :  { %v2191_v12 = vmul.f32 %v3844_v5, %v2163_v20  ;;  %2860 = vmatpush.msra.mxu3 %v3728_v10  ;;  %vm2196_vm13 = vweird.f32 %v3844_v5  ;;  %v2036_v50 = vadd.f32 %v3838_v44, %v2035_v3  ;;  %v2043_v20 = vand.u32 2147483648, %v2005_v9 }
 0xe61   :  { %vm2197_vm2 = vmor %vm2195_vm14, %vm2196_vm13 }
 0xe62   :  { %v2192_v47 = vsub.f32 1.0, %v2191_v12  ;;  %v2040_v35 = vsel %vm2039_vm8, %v3838_v44, %v2036_v50 }
 0xe63   :  { %v2496_v36 = vpop.permute.xlu0 %2495 }
 0xe64   :  { %v2193_v61 = vmul.f32 %v3844_v5, %v2192_v47  ;;  %2516 = vmatpush.msra.mxu0 %v2496_v36 }
 0xe65   :  { %3640 = vmatmul.msk.f32.vlgmr.msra.gmra.mxu0 %vm161_vm1, %v3840_v6 }
 0xe66   :  { %v2194_v33 = vadd.f32 %v3844_v5, %v2193_v61  ;;  %1925 = vadd.xlane.f32.xlu2 %v1924_v16  ;;  %2715 = vmatpush.msrb.mxu0 %v3712_v39  ;;  %v2041_v39 = vand.u32 2147483647, %v2005_v9 }
 0xe68   :  { %2716 = vmatpush.msrb.mxu0 %v3713_v40  ;;  %v2198_v10 = vsel %vm2197_vm2, %v3844_v5, %v2194_v33  ;;  %v2044_v40 = vor.u32 1.1754944e-38, %v2043_v20  ;;  %vm2042_vm9 = vcmp.eq.f32.partialorder %v2041_v39, 8.507059e+37 }
 0xe69   :  { %v2203_v11 = vsel %vm2200_vm3, %v2202_v1, %v2198_v10 }
 0xe6a   :  { %2787 = vmatpush.msra.mxu0 %v3717_v41  ;;  %v2205_v23 = vmul.f32 %v2203_v11, %v2187_v18  ;;  %v2045_v6 = vsel %vm2042_vm9, %v2044_v40, %v2040_v35 }
 0xe6b   :  { %v2047_v25 = vmul.f32 %v2045_v6, %v2029_v28 }
 0xe6c   :  { %2788 = vmatpush.msra.mxu0 %v3718_v42  ;;  %2215 = vrot.lane.b32.xlu0 %v2205_v23, %s3973_s1 }
 0xe76   :  { %2207 = vrot.lane.b32.xlu1 %v2047_v25, %s3974_s19 }
 0xe8e   :  { %v2084_v41 = vpop.xlane.xlu0 %2083  ;;  %v2108_v43 = vpop.f32.mrf.mxu3 }
 0xe8f   :  { %3845 = vrcp.f32 %v2084_v41  ;;  %v2122_v5 = vand.u32 2147483648, %v2084_v41  ;;  %v2120_v42 = vand.u32 2147483647, %v2084_v41  ;;  %vm2116_vm11 = vweird.f32 %v2084_v41 }
 0xe91   :  { %v2123_v9 = vor.u32 1.1754944e-38, %v2122_v5  ;;  %vm2121_vm13 = vcmp.eq.f32.partialorder %v2120_v42, 8.507059e+37 }
 0xe95   :  { %v3846_v46 = vpop.eup %3845 }
 0xe96   :  { %v2112_v13 = vmul.f32 %v3846_v46, %v2084_v41  ;;  %vm2117_vm10 = vweird.f32 %v3846_v46 }
 0xe97   :  { %vm2118_vm12 = vmor %vm2116_vm11, %vm2117_vm10 }
 0xe98   :  { %v2113_v8 = vsub.f32 1.0, %v2112_v13 }
 0xe9a   :  { %v2114_v0 = vmul.f32 %v3846_v46, %v2113_v8 }
 0xe9c   :  { %v2115_v12 = vadd.f32 %v3846_v46, %v2114_v0 }
 0xe9e   :  { %v2119_v44 = vsel %vm2118_vm12, %v3846_v46, %v2115_v12 }
 0xe9f   :  { %v2124_v47 = vsel %vm2121_vm13, %v2123_v9, %v2119_v44 }
 0xea0   :  { %v2126_v28 = vmul.f32 %v2124_v47, %v2108_v43 }
 0xea2   :  { %2211 = vrot.lane.b32.xlu2 %v2126_v28, %s3975_s20 }
 0xeaa   :  { %v2257_v63 = vpop.xlane.xlu0 %2256 }
 0xeab   :  { %3847 = vrcp.f32 %v2257_v63  ;;  %v2295_v16 = vand.u32 2147483648, %v2257_v63  ;;  %v2293_v33 = vand.u32 2147483647, %v2257_v63  ;;  %vm2289_vm2 = vweird.f32 %v2257_v63 }
 0xead   :  { %v2296_v10 = vor.u32 1.1754944e-38, %v2295_v16  ;;  %vm2294_vm6 = vcmp.eq.f32.partialorder %v2293_v33, 8.507059e+37 }
 0xeb1   :  { %v3848_v36 = vpop.eup %3847 }
 0xeb2   :  { %v2285_v61 = vmul.f32 %v3848_v36, %v2257_v63  ;;  %vm2290_vm14 = vweird.f32 %v3848_v36 }
 0xeb3   :  { %vm2291_vm3 = vmor %vm2289_vm2, %vm2290_vm14 }
 0xeb4   :  { %v2286_v48 = vsub.f32 1.0, %v2285_v61 }
 0xeb6   :  { %v2287_v3 = vmul.f32 %v3848_v36, %v2286_v48 }
 0xeb8   :  { %v2288_v1 = vadd.f32 %v3848_v36, %v2287_v3 }
 0xeb9   :  { %v2281_v11 = vpop.f32.mrf.mxu3 }
 0xeba   :  { %v2292_v18 = vsel %vm2291_vm3, %v3848_v36, %v2288_v1 }
 0xebb   :  { %v2297_v23 = vsel %vm2294_vm6, %v2296_v10, %v2292_v18 }
 0xebc   :  { %v4800_v50 = vmul.f32 %v2297_v23, %v2281_v11 }
 0xec8   :  { %v2336_v20 = vpop.xlane.xlu2 %2335 }
 0xec9   :  { %3849 = vrcp.f32 %v2336_v20  ;;  %v2374_v41 = vand.u32 2147483648, %v2336_v20  ;;  %v2372_v13 = vand.u32 2147483647, %v2336_v20  ;;  %vm2368_vm8 = vweird.f32 %v2336_v20 }
 0xecb   :  { %v2375_v0 = vor.u32 1.1754944e-38, %v2374_v41  ;;  %vm2373_vm10 = vcmp.eq.f32.partialorder %v2372_v13, 8.507059e+37 }
 0xecf   :  { %v3850_v39 = vpop.eup %3849 }
 0xed0   :  { %v2364_v35 = vmul.f32 %v3850_v39, %v2336_v20  ;;  %v2494_v40 = vpop.xlane.xlu1 %2493  ;;  %vm2369_vm7 = vweird.f32 %v3850_v39 }
 0xed1   :  { %v2415_v6 = vpop.xlane.xlu2 %2414  ;;  %3851 = vrcp.f32 %v2494_v40  ;;  %vm2370_vm9 = vmor %vm2368_vm8, %vm2369_vm7  ;;  %v2360_v43 = vpop.f32.mrf.mxu0  ;;  %v2532_v48 = vand.u32 2147483648, %v2494_v40  ;;  %v2530_v33 = vand.u32 2147483647, %v2494_v40  ;;  %vm2526_vm13 = vweird.f32 %v2494_v40 }
 0xed2   :  { %v2365_v25 = vsub.f32 1.0, %v2364_v35  ;;  %3853 = vrcp.f32 %v2415_v6  ;;  %v2453_v16 = vand.u32 2147483648, %v2415_v6  ;;  %v2451_v10 = vand.u32 2147483647, %v2415_v6 }
 0xed3   :  { %vm2447_vm14 = vweird.f32 %v2415_v6  ;;  %v2533_v23 = vor.u32 1.1754944e-38, %v2532_v48  ;;  %vm2531_vm6 = vcmp.eq.f32.partialorder %v2530_v33, 8.507059e+37 }
 0xed4   :  { %v2366_v46 = vmul.f32 %v3850_v39, %v2365_v25  ;;  %vm2452_vm7 = vcmp.eq.f32.partialorder %v2451_v10, 8.507059e+37 }
 0xed6   :  { %v2367_v8 = vadd.f32 %v3850_v39, %v2366_v46 }
 0xed7   :  { %v3852_v5 = vpop.eup %3851 }
 0xed8   :  { %v3854_v42 = vpop.eup %3853  ;;  %v2522_v12 = vmul.f32 %v3852_v5, %v2494_v40  ;;  %v2371_v9 = vsel %vm2370_vm9, %v3850_v39, %v2367_v8  ;;  %vm2527_vm11 = vweird.f32 %v3852_v5  ;;  %v2454_v39 = vor.u32 1.1754944e-38, %v2453_v16 }
 0xed9   :  { %v2443_v44 = vmul.f32 %v3854_v42, %v2415_v6  ;;  %v2376_v47 = vsel %vm2373_vm10, %v2375_v0, %v2371_v9  ;;  %v1926_v28 = vpop.xlane.xlu2 %1925  ;;  %vm2448_vm12 = vweird.f32 %v3854_v42  ;;  %vm2528_vm2 = vmor %vm2526_vm13, %vm2527_vm11 }
 0xeda   :  { %v2523_v63 = vsub.f32 1.0, %v2522_v12  ;;  %v2378_v36 = vmul.f32 %v2376_v47, %v2360_v43  ;;  %3855 = vrcp.f32 %v1926_v28  ;;  %vm2449_vm3 = vmor %vm2447_vm14, %vm2448_vm12  ;;  %v1964_v43 = vand.u32 2147483648, %v1926_v28 }
 0xedb   :  { %v2444_v61 = vsub.f32 1.0, %v2443_v44  ;;  %vm1958_vm9 = vweird.f32 %v1926_v28 }
 0xedc   :  { %2538 = vrot.lane.b32.xlu0 %v2378_v36, %s3974_s19  ;;  %v2524_v3 = vmul.f32 %v3852_v5, %v2523_v63  ;;  %v1965_v47 = vor.u32 1.1754944e-38, %v1964_v43 }
 0xedd   :  { %v2445_v1 = vmul.f32 %v3854_v42, %v2444_v61 }
 0xede   :  { %v2525_v18 = vadd.f32 %v3852_v5, %v2524_v3  ;;  %v2216_v3 = vpop.permute.xlu0 %2215 }
 0xedf   :  { %v2446_v11 = vadd.f32 %v3854_v42, %v2445_v1 }
 0xee0   :  { %v3856_v20 = vpop.eup %3855  ;;  %v2529_v35 = vsel %vm2528_vm2, %v3852_v5, %v2525_v18  ;;  %v2439_v13 = vpop.f32.mrf.mxu3  ;;  %v1962_v5 = vand.u32 2147483647, %v1926_v28 }
 0xee1   :  { %v2450_v25 = vsel %vm2449_vm3, %v3854_v42, %v2446_v11  ;;  %v2534_v41 = vsel %vm2531_vm6, %v2533_v23, %v2529_v35  ;;  %v1954_v46 = vmul.f32 %v3856_v20, %v1926_v28  ;;  %vm1959_vm8 = vweird.f32 %v3856_v20 }
 0xee2   :  { %v2455_v8 = vsel %vm2452_vm7, %v2454_v39, %v2450_v25  ;;  %v2518_v0 = vpop.f32.mrf.mxu0  ;;  %vm1960_vm10 = vmor %vm1958_vm9, %vm1959_vm8  ;;  %vm1963_vm11 = vcmp.eq.f32.partialorder %v1962_v5, 8.507059e+37 }
 0xee3   :  { %v2457_v12 = vmul.f32 %v2455_v8, %v2439_v13  ;;  %v2536_v9 = vmul.f32 %v2534_v41, %v2518_v0  ;;  %v1955_v40 = vsub.f32 1.0, %v1954_v46 }
 0xee5   :  { %2542 = vrot.lane.b32.xlu2 %v2457_v12, %s3975_s20  ;;  %2546 = vrot.lane.b32.xlu1 %v2536_v9, %s3973_s1  ;;  %v1956_v6 = vmul.f32 %v3856_v20, %v1955_v40 }
 0xee7   :  { %v1957_v44 = vadd.f32 %v3856_v20, %v1956_v6 }
 0xee8   :  { %v2208_v61 = vpop.permute.xlu1 %2207 }
 0xee9   :  { %v1961_v42 = vsel %vm1960_vm10, %v3856_v20, %v1957_v44 }
 0xeea   :  { %v1966_v63 = vsel %vm1963_vm11, %v1965_v47, %v1961_v42 }
 0xeeb   :  { %v1968_v36 = vmul.f32 %v1966_v63, %v4744_v26 }
 0xeed   :  { %v2218_v48 = vsel %vm161_vm1, %v1968_v36, %v2208_v61 }
 0xefc   :  { %v2212_v16 = vpop.permute.xlu2 %2211 }
 0xefd   :  { %v2219_v33 = vsel %vm488_vm4, %v2218_v48, %v2212_v16 }
 0xefe   :  { %v2220_v1 = vsel %vm490_vm5, %v2219_v33, %v2216_v3 }
 0xeff   :  { %3641 = vmatmul.msk.f32.vlgmr.msrb.gmra.mxu1 %vm84_vm0, %v2220_v1 }
 0xf00   :  { %3661 = vmatpush.xpose.msk.msrb.mxu1 %vm161_vm1, %v4330_v60 }
 0xf04   :  { %3662 = vmatpush.xpose.msk.msrb.mxu1 %vm161_vm1, %v4312_v53 }
 0xf3f   :  { %v2543_v10 = vpop.permute.xlu2 %2542 }
 0xf4e   :  { %v2539_v28 = vpop.permute.xlu0 %2538 }
 0xf4f   :  { %v2549_v26 = vsel %vm161_vm1, %v4800_v50, %v2539_v28 }
 0xf50   :  { %v2550_v11 = vsel %vm488_vm4, %v2549_v26, %v2543_v10 }
 0xf57   :  { %v2547_v18 = vpop.permute.xlu1 %2546 }
 0xf58   :  { %v2551_v23 = vsel %vm490_vm5, %v2550_v11, %v2547_v18 }
 0xf59   :  { %3642 = vmatmul.msk.f32.gmra.mxu1 %vm84_vm0, %v2551_v23 }
 0xf7c   :  { %v2575_v20 = vpop.f32.mrf.mxu1 }
 0xf7d   :  { %v2576_v39 = vadd.f32 %v2575_v20, %v4232_v15 }
 0xf7f   :  { %v2581_v60 = vadd.f32 %v2576_v39, %v4642_v34 }
 0xf81   :  { %v2583_v35 = vsel %vm84_vm0, %v2581_v60, 0.0  ;;  %v2589_v53 = vmul.f32 %v2581_v60, %v2581_v60 }
 0xf82   :  { %2584 = vadd.xlane.f32.xlu0 %v2583_v35 }
 0xf83   :  { %v2591_v25 = vsel %vm84_vm0, %v2589_v53, 0.0 }
 0xf84   :  { %2592 = vadd.xlane.f32.xlu2 %v2591_v25 }
 0xfd6   :  { %v2578_v50 = vpop.f32.mrf.mxu1 }
 0xfd7   :  { %v2579_v41 = vadd.f32 %v2578_v50, %v4232_v15 }
 0xfd9   :  { %v2582_v46 = vadd.f32 %v2579_v41, %v4675_v21 }
 0xfdb   :  { %v2586_v13 = vsel %vm84_vm0, %v2582_v46, 0.0  ;;  %v2590_v8 = vmul.f32 %v2582_v46, %v2582_v46 }
 0xfdc   :  { %2587 = vadd.xlane.f32.xlu1 %v2586_v13 }
 0xfdd   :  { %v2594_v0 = vsel %vm84_vm0, %v2590_v8, 0.0 }
 0xfde   :  { %2595 = vadd.xlane.f32.xlu0 %v2594_v0 }
 0xff5   :  { %v2585_v34 = vpop.xlane.xlu0 %2584 }
 0xff6   :  { %v2597_v12 = vmul.f32 0.03125, %v2585_v34  ;;  %v3923_v34 = vld [vmem:[%s5034_s5 + $0x38] sm:$0xff] }
 0xff7   :  { %v2593_v9 = vpop.xlane.xlu2 %2592 }
 0xff8   :  { %v2601_v40 = vmul.f32 %v2597_v12, %v2597_v12  ;;  %v2599_v6 = vmul.f32 0.03125, %v2593_v9  ;;  %v2605_v36 = vsub.f32 %v2581_v60, %v2597_v12  ;;  %v3924_v12 = vld [vmem:[%s5034_s5 + $0x30] sm:$0xff]  ;;  %v3925_v9 = vld [vmem:[%s5034_s5 + $0x28] sm:$0xff] }
 0xffa   :  { %v2603_v44 = vsub.f32 %v2599_v6, %v2601_v40  ;;  %v3926_v40 = vld [vmem:[%s5034_s5 + $0x20] sm:$0xff]  ;;  %v3927_v6 = vld [vmem:[%s5034_s5 + $0x18] sm:$0xff] }
 0xffc   :  { %v2607_v43 = vadd.f32 1e-05, %v2603_v44  ;;  %v3928_v44 = vld [vmem:[%s5034_s5 + $0x10] sm:$0xff] }
 0xffe   :  { %3857 = vrsqrt.f32 %v2607_v43  ;;  %vm2615_vm13 = vweird.f32 %v2607_v43 }
0x1004   :  { %v3858_v5 = vpop.eup %3857 }
0x1005   :  { %v2610_v42 = vmul.f32 %v3858_v5, %v2607_v43  ;;  %vm2616_vm12 = vweird.f32 %v3858_v5  ;;  %v3929_v43 = vld [vmem:[%s5034_s5 + $0x8] sm:$0xff] }
0x1006   :  { %vm2617_vm14 = vmor %vm2615_vm13, %vm2616_vm12 }
0x1007   :  { %v2611_v15 = vmul.f32 %v3858_v5, %v2610_v42 }
0x1009   :  { %v2612_v47 = vmul.f32 0.5, %v2611_v15 }
0x100b   :  { %v2613_v21 = vsub.f32 1.5, %v2612_v47 }
0x100d   :  { %v2614_v63 = vmul.f32 %v3858_v5, %v2613_v21 }
0x100f   :  { %v2618_v61 = vsel %vm2617_vm14, %v3858_v5, %v2614_v63  ;;  %v3930_v5 = vld [vmem:[%s5034_s5] sm:$0xff] }
0x1010   :  { %v2629_v48 = vmul.f32 %v2618_v61, %v2605_v36 }
0x1012   :  { %v2631_v16 = vmul.f32 %v2629_v48, %v4258_v19 }
0x1014   :  { %v4829_v3 = vadd.f32 %v2631_v16, %v4261_v22 }
0x1016   :  { %3643 = vmatmul.msk.f32.vlgmr.msrb.gmra.mxu3 %vm84_vm0, %v4829_v3 }
0x1017   :  { %3017 = vmatpush.msrb.mxu3 %v3737_v45 }
0x1019   :  { %3018 = vmatpush.msrb.mxu3 %v3738_v32 }
0x104f   :  { %v2588_v33 = vpop.xlane.xlu1 %2587 }
0x1050   :  { %v2598_v1 = vmul.f32 0.03125, %v2588_v33 }
0x1051   :  { %v2596_v28 = vpop.xlane.xlu0 %2595 }
0x1052   :  { %v2602_v26 = vmul.f32 %v2598_v1, %v2598_v1  ;;  %v2600_v10 = vmul.f32 0.03125, %v2596_v28  ;;  %v2606_v45 = vsub.f32 %v2582_v46, %v2598_v1 }
0x1054   :  { %v2604_v18 = vsub.f32 %v2600_v10, %v2602_v26 }
0x1056   :  { %v2608_v11 = vadd.f32 1e-05, %v2604_v18  ;;  %v5044_v18 = vunpack.i.h.bf16 %v4397_v49 }
0x1058   :  { %3859 = vrsqrt.f32 %v2608_v11  ;;  %vm2625_vm3 = vweird.f32 %v2608_v11 }
0x105e   :  { %v3860_v23 = vpop.eup %3859 }
0x105f   :  { %v2620_v20 = vmul.f32 %v3860_v23, %v2608_v11  ;;  %vm2626_vm2 = vweird.f32 %v3860_v23 }
0x1060   :  { %vm2627_vm6 = vmor %vm2625_vm3, %vm2626_vm2 }
0x1061   :  { %v2621_v39 = vmul.f32 %v3860_v23, %v2620_v20 }
0x1063   :  { %v2622_v60 = vmul.f32 0.5, %v2621_v39 }
0x1065   :  { %v2623_v35 = vsub.f32 1.5, %v2622_v60 }
0x1067   :  { %v2624_v53 = vmul.f32 %v3860_v23, %v2623_v35 }
0x1069   :  { %v2628_v51 = vsel %vm2627_vm6, %v3860_v23, %v2624_v53 }
0x106a   :  { %v2630_v32 = vmul.f32 %v2628_v51, %v2606_v45 }
0x106c   :  { %v2632_v25 = vmul.f32 %v2630_v32, %v4258_v19  ;;  %v5045_v32 = vunpack.i.l.bf16 %v4451_v57 }
0x106e   :  { %v4839_v50 = vadd.f32 %v2632_v25, %v4261_v22  ;;  %v5046_v25 = vunpack.i.h.bf16 %v4451_v57  ;;  %v5047_v57 = vunpack.i.l.bf16 %v4504_v30 }
0x1070   :  { %3644 = vmatmul.msk.f32.gmra.mxu3 %vm84_vm0, %v4839_v50 }
0x1099   :  { %v2658_v41 = vpop.f32.mrf.mxu3 }
0x109a   :  { %v2659_v13 = vadd.f32 %v2658_v41, %v4247_v62 }
0x109c   :  { %v2664_v8 = vmul.f32 0.35355338, %v2659_v13 }
0x109e   :  { %2737 = vrot.lane.b32.xlu2 %v2664_v8, %s3964_s23  ;;  %3647 = vmatmul.msk.f32.vlgmr.msrb.gmra.mxu2 %vm161_vm1, %v2664_v8 }
0x109f   :  { %3657 = vmatpush.xpose.msk.msrb.mxu2 %vm161_vm1, %v4306_v52  ;;  %2881 = vrot.lane.b32.xlu0 %v2664_v8, %s3968_s29 }
0x10a0   :  { %2809 = vrot.lane.b32.xlu1 %v2664_v8, %s3969_s30 }
0x10a3   :  { %3658 = vmatpush.xpose.msk.msrb.mxu2 %vm161_vm1, %v4314_v54 }
0x10f3   :  { %v2661_v19 = vpop.f32.mrf.mxu3 }
0x10f4   :  { %v2662_v22 = vadd.f32 %v2661_v19, %v4247_v62  ;;  %v3919_v62 = vld [vmem:[%s5032_s3 + $0x38] sm:$0xff] }
0x10f6   :  { %v2665_v46 = vmul.f32 0.35355338, %v2662_v22 }
0x10f8   :  { %v2738_v0 = vpop.permute.xlu2 %2737  ;;  %3183 = vrot.lane.b32.xlu1 %v2665_v46, %s3968_s29  ;;  %3111 = vrot.lane.b32.xlu0 %v2665_v46, %s3969_s30 }
0x10f9   :  { %3039 = vrot.lane.b32.xlu2 %v2665_v46, %s3964_s23  ;;  %3651 = vmatmul.msk.f32.vlgmr.msra.gmra.mxu2 %vm161_vm1, %v2738_v0 }
0x10fa   :  { %3665 = vmatpush.xpose.msk.msra.mxu2 %vm161_vm1, %v4363_v31  ;;  %v3921_v31 = vld [vmem:[%s5032_s3 + $0x28] sm:$0xff] }
0x10fe   :  { %3666 = vmatpush.xpose.msk.msra.mxu2 %vm161_vm1, %v4342_v38  ;;  %v3920_v38 = vld [vmem:[%s5032_s3 + $0x30] sm:$0xff] }
0x1111   :  { %v2882_v52 = vpop.permute.xlu0 %2881 }
0x1112   :  { %v2810_v54 = vpop.permute.xlu1 %2809  ;;  %3659 = vmatmul.msk.f32.vlgmr.msrb.gmra.mxu2 %vm161_vm1, %v2882_v52 }
0x1113   :  { %3655 = vmatmul.msk.f32.vlgmr.msra.gmra.mxu1 %vm161_vm1, %v2810_v54  ;;  %3673 = vmatpush.xpose.msk.msrb.mxu2 %vm161_vm1, %v4399_v58 }
0x1114   :  { %3669 = vmatpush.xpose.msk.msra.mxu1 %vm161_vm1, %v4417_v27  ;;  %v3922_v27 = vld [vmem:[%s5032_s3 + $0x20] sm:$0xff] }
0x1117   :  { %3674 = vmatpush.xpose.msk.msrb.mxu2 %vm161_vm1, %v4409_v37 }
0x1118   :  { %3670 = vmatpush.xpose.msk.msra.mxu1 %vm161_vm1, %v4434_v4 }
0x111b   :  { %3663 = vmatmul.msk.f32.vlgmr.msrb.gmra.mxu1 %vm161_vm1, %v2665_v46 }
0x111c   :  { %3288 = vmatpush.msrb.mxu1 %v3919_v62 }
0x111e   :  { %3289 = vmatpush.msrb.mxu1 %v3920_v38 }
0x1120   :  { %3290 = vmatpush.msrb.mxu1 %v3921_v31  ;;  %v5048_v31 = vunpack.i.h.bf16 %v4504_v30  ;;  %v3931_v30 = vld [vmem:[%s5033_s4 + $0x18] sm:$0xff] }
0x1121   :  { %v2686_v58 = vpop.f32.mrf.mxu2 }
0x1122   :  { %v2689_v37 = vsel %vm488_vm4, %v2686_v58, -inf  ;;  %3291 = vmatpush.msrb.mxu1 %v3922_v27  ;;  %v5049_v27 = vunpack.i.l.bf16 %v4520_v55 }
0x1123   :  { %2690 = vmax.xlane.f32.xlu2 %v2689_v37 }
0x1153   :  { %v3040_v4 = vpop.permute.xlu2 %3039 }
0x1154   :  { %3667 = vmatmul.msk.f32.vlgmr.msra.gmra.mxu2 %vm161_vm1, %v3040_v4 }
0x1155   :  { %3398 = vmatpush.msra.mxu2 %v3923_v34  ;;  %v5050_v34 = vunpack.i.h.bf16 %v4520_v55  ;;  %v3934_v55 = vld [vmem:[%s5033_s4] sm:$0xff] }
0x1157   :  { %3399 = vmatpush.msra.mxu2 %v3924_v12  ;;  %v3932_v12 = vld [vmem:[%s5033_s4 + $0x10] sm:$0xff] }
0x1159   :  { %3400 = vmatpush.msra.mxu2 %v3925_v9  ;;  %v3933_v9 = vld [vmem:[%s5033_s4 + $0x8] sm:$0xff] }
0x115b   :  { %3401 = vmatpush.msra.mxu2 %v3926_v40 }
0x115d   :  { %3402 = vmatpush.msra.mxu2 %v3927_v6 }
0x115f   :  { %3403 = vmatpush.msra.mxu2 %v3928_v44 }
0x1161   :  { %3404 = vmatpush.msra.mxu2 %v3929_v43 }
0x1163   :  { %3405 = vmatpush.msra.mxu2 %v3930_v5 }
0x116a   :  { %v3112_v42 = vpop.permute.xlu0 %3111  ;;  %v3184_v15 = vpop.permute.xlu1 %3183 }
0x116b   :  { %3671 = vmatmul.msk.f32.vlgmr.msra.gmra.mxu1 %vm161_vm1, %v3112_v42  ;;  %3675 = vmatmul.msk.f32.vlgmr.msrb.gmra.mxu2 %vm161_vm1, %v3184_v15 }
0x117c   :  { %v2758_v47 = vpop.f32.mrf.mxu2 }
0x117d   :  { %v2761_v21 = vsel %vm488_vm4, %v2758_v47, -inf }
0x117e   :  { %2762 = vmax.xlane.f32.xlu0 %v2761_v21 }
0x1190   :  { %v2830_v63 = vpop.f32.mrf.mxu1 }
0x1191   :  { %v2833_v36 = vsel %vm488_vm4, %v2830_v63, -inf }
0x1192   :  { %2834 = vmax.xlane.f32.xlu1 %v2833_v36 }
0x1195   :  { %v2902_v61 = vpop.f32.mrf.mxu2 }
0x1196   :  { %v2905_v48 = vsel %vm488_vm4, %v2902_v61, -inf  ;;  %v2691_v16 = vpop.xlane.xlu2 %2690 }
0x1197   :  { %2906 = vmax.xlane.f32.xlu2 %v2905_v48  ;;  %v2692_v33 = vsub.f32 %v2686_v58, %v2691_v16 }
0x1198   :  { %v2988_v1 = vpop.f32.mrf.mxu1 }
0x1199   :  { %v2693_v28 = vmul.f32 1.442695, %v2692_v33  ;;  %v2991_v26 = vsel %vm488_vm4, %v2988_v1, -inf }
0x119a   :  { %2992 = vmax.xlane.f32.xlu0 %v2991_v26 }
0x119b   :  { %3861 = vpow2.f32 %v2693_v28 }
0x11a1   :  { %v4916_v10 = vpop.eup %3861 }
0x11a2   :  { %3648 = vmatmul.msk.f32.vlgmr.msrb.gmra.mxu0 %vm488_vm4, %v4916_v10  ;;  %v2695_v21 = vsel %vm488_vm4, %v4916_v10, 0.0 }
0x11a3   :  { %2931 = vmatpush.msrb.mxu0 %v3722_v56 }
0x11a5   :  { %2932 = vmatpush.msrb.mxu0 %v5044_v18 }
0x11d7   :  { %v3060_v11 = vpop.f32.mrf.mxu2 }
0x11d8   :  { %v3063_v23 = vsel %vm488_vm4, %v3060_v11, -inf }
0x11d9   :  { %3064 = vmax.xlane.f32.xlu1 %v3063_v23 }
0x11e8   :  { %v3132_v20 = vpop.f32.mrf.mxu1 }
0x11e9   :  { %v3135_v39 = vsel %vm488_vm4, %v3132_v20, -inf }
0x11ea   :  { %3136 = vmax.xlane.f32.xlu2 %v3135_v39 }
0x11ee   :  { %v4926_v60 = vpop.f32.mrf.mxu2 }
0x11ef   :  { %v3207_v35 = vsel %vm488_vm4, %v4926_v60, -inf }
0x11f0   :  { %3208 = vmax.xlane.f32.xlu0 %v3207_v35 }
0x11f1   :  { %v2763_v53 = vpop.xlane.xlu0 %2762 }
0x11f2   :  { %v2764_v45 = vsub.f32 %v2758_v47, %v2763_v53 }
0x11f4   :  { %v2765_v56 = vmul.f32 1.442695, %v2764_v45 }
0x11f6   :  { %3863 = vpow2.f32 %v2765_v56 }
0x11fc   :  { %v3864_v49 = vpop.eup %3863 }
0x11fd   :  { %3652 = vmatmul.msk.f32.vlgmr.msra.gmra.mxu0 %vm488_vm4, %v3864_v49  ;;  %v2767_v51 = vsel %vm488_vm4, %v3864_v49, 0.0 }
0x11fe   :  { %3089 = vmatpush.msra.mxu0 %v5045_v32  ;;  %2768 = vadd.xlane.f32.xlu1 %v2767_v51 }
0x1200   :  { %3090 = vmatpush.msra.mxu0 %v5046_v25 }
0x1205   :  { %v2835_v41 = vpop.xlane.xlu1 %2834 }
0x1206   :  { %v2836_v13 = vsub.f32 %v2830_v63, %v2835_v41 }
0x1208   :  { %v2837_v8 = vmul.f32 1.442695, %v2836_v13 }
0x120a   :  { %3865 = vpow2.f32 %v2837_v8  ;;  %v2907_v19 = vpop.xlane.xlu2 %2906 }
0x120b   :  { %v2908_v22 = vsub.f32 %v2902_v61, %v2907_v19 }
0x120d   :  { %v2909_v46 = vmul.f32 1.442695, %v2908_v22  ;;  %v2993_v0 = vpop.xlane.xlu0 %2992 }
0x120e   :  { %v2994_v52 = vsub.f32 %v2988_v1, %v2993_v0 }
0x120f   :  { %3867 = vpow2.f32 %v2909_v46 }
0x1210   :  { %v3866_v54 = vpop.eup %3865  ;;  %v2995_v62 = vmul.f32 1.442695, %v2994_v52 }
0x1211   :  { %3656 = vmatmul.msk.f32.vlgmr.msra.gmra.mxu3 %vm488_vm4, %v3866_v54  ;;  %v2839_v38 = vsel %vm488_vm4, %v3866_v54, 0.0 }
0x1212   :  { %3869 = vpow2.f32 %v2995_v62  ;;  %3161 = vmatpush.msra.mxu3 %v5047_v57  ;;  %2840 = vadd.xlane.f32.xlu2 %v2839_v38 }
0x1214   :  { %3162 = vmatpush.msra.mxu3 %v5048_v31 }
0x1215   :  { %v3868_v58 = vpop.eup %3867 }
0x1216   :  { %3660 = vmatmul.msk.f32.vlgmr.msrb.gmra.mxu0 %vm488_vm4, %v3868_v58  ;;  %v2911_v37 = vsel %vm488_vm4, %v3868_v58, 0.0 }
0x1217   :  { %3233 = vmatpush.msrb.mxu0 %v5049_v27  ;;  %2912 = vadd.xlane.f32.xlu0 %v2911_v37 }
0x1218   :  { %v3870_v4 = vpop.eup %3869 }
0x1219   :  { %3664 = vmatmul.msk.f32.vlgmr.msrb.gmra.mxu3 %vm488_vm4, %v3870_v4  ;;  %3234 = vmatpush.msrb.mxu0 %v5050_v34  ;;  %v2997_v26 = vsel %vm488_vm4, %v3870_v4, 0.0 }
0x121a   :  { %3371 = vmatpush.msrb.mxu3 %v3931_v30 }
0x121c   :  { %3372 = vmatpush.msrb.mxu3 %v3932_v12 }
0x121e   :  { %3373 = vmatpush.msrb.mxu3 %v3933_v9 }
0x1220   :  { %3374 = vmatpush.msrb.mxu3 %v3934_v55 }
0x124c   :  { %v3065_v40 = vpop.xlane.xlu1 %3064 }
0x124d   :  { %v3066_v6 = vsub.f32 %v3060_v11, %v3065_v40  ;;  %v4971_v11 = vpop.f32.mrf.mxu0 }
0x124f   :  { %v3067_v44 = vmul.f32 1.442695, %v3066_v6 }
0x1251   :  { %3871 = vpow2.f32 %v3067_v44 }
0x1257   :  { %v3872_v43 = vpop.eup %3871 }
0x1258   :  { %3668 = vmatmul.msk.f32.vlgmr.msra.gmra.mxu0 %vm488_vm4, %v3872_v43  ;;  %v3069_v5 = vsel %vm488_vm4, %v3872_v43, 0.0 }
0x1259   :  { %3070 = vadd.xlane.f32.xlu1 %v3069_v5 }
0x125d   :  { %v3137_v42 = vpop.xlane.xlu2 %3136 }
0x125e   :  { %v3138_v15 = vsub.f32 %v3132_v20, %v3137_v42 }
0x1260   :  { %v3139_v47 = vmul.f32 1.442695, %v3138_v15 }
0x1261   :  { %2696 = vadd.xlane.f32.xlu1 %v2695_v21 }
0x1262   :  { %3873 = vpow2.f32 %v3139_v47 }
0x1263   :  { %v3209_v63 = vpop.xlane.xlu0 %3208 }
0x1264   :  { %v3210_v36 = vsub.f32 %v4926_v60, %v3209_v63 }
0x1266   :  { %v3211_v61 = vmul.f32 1.442695, %v3210_v36 }
0x1268   :  { %v3874_v48 = vpop.eup %3873  ;;  %3875 = vpow2.f32 %v3211_v61 }
0x1269   :  { %3672 = vmatmul.msk.f32.vlgmr.msra.gmra.mxu3 %vm488_vm4, %v3874_v48  ;;  %v3141_v16 = vsel %vm488_vm4, %v3874_v48, 0.0 }
0x126a   :  { %3142 = vadd.xlane.f32.xlu2 %v3141_v16 }
0x126e   :  { %v3876_v33 = vpop.eup %3875 }
0x126f   :  { %3676 = vmatmul.msk.f32.vlgmr.msrb.gmra.mxu0 %vm488_vm4, %v3876_v33  ;;  %v3213_v1 = vsel %vm488_vm4, %v3876_v33, 0.0 }
0x1270   :  { %3214 = vadd.xlane.f32.xlu0 %v3213_v1 }
0x1271   :  { %v2769_v28 = vpop.xlane.xlu1 %2768 }
0x1272   :  { %3877 = vrcp.f32 %v2769_v28  ;;  %2998 = vadd.xlane.f32.xlu2 %v2997_v26  ;;  %v2804_v20 = vand.u32 2147483648, %v2769_v28  ;;  %v2802_v60 = vand.u32 2147483647, %v2769_v28  ;;  %vm2798_vm8 = vweird.f32 %v2769_v28 }
0x1274   :  { %v2805_v53 = vor.u32 1.1754944e-38, %v2804_v20  ;;  %vm2803_vm10 = vcmp.eq.f32.partialorder %v2802_v60, 8.507059e+37 }
0x1278   :  { %v3878_v10 = vpop.eup %3877 }
0x1279   :  { %v2794_v18 = vmul.f32 %v3878_v10, %v2769_v28  ;;  %vm2799_vm7 = vweird.f32 %v3878_v10 }
0x127a   :  { %vm2800_vm9 = vmor %vm2798_vm8, %vm2799_vm7  ;;  %v2790_v56 = vpop.f32.mrf.mxu0 }
0x127b   :  { %v2795_v23 = vsub.f32 1.0, %v2794_v18 }
0x127d   :  { %v2796_v39 = vmul.f32 %v3878_v10, %v2795_v23 }
0x127f   :  { %v2797_v35 = vadd.f32 %v3878_v10, %v2796_v39 }
0x1281   :  { %v2801_v45 = vsel %vm2800_vm9, %v3878_v10, %v2797_v35 }
0x1282   :  { %v2806_v49 = vsel %vm2803_vm10, %v2805_v53, %v2801_v45 }
0x1283   :  { %v2808_v51 = vmul.f32 %v2806_v49, %v2790_v56 }
0x1285   :  { %v2841_v32 = vpop.xlane.xlu2 %2840  ;;  %2954 = vrot.lane.b32.xlu0 %v2808_v51, %s3974_s19 }
0x1286   :  { %3879 = vrcp.f32 %v2841_v32  ;;  %v2876_v19 = vand.u32 2147483648, %v2841_v32  ;;  %v2874_v0 = vand.u32 2147483647, %v2841_v32  ;;  %vm2870_vm12 = vweird.f32 %v2841_v32 }
0x1288   :  { %v2877_v38 = vor.u32 1.1754944e-38, %v2876_v19  ;;  %vm2875_vm14 = vcmp.eq.f32.partialorder %v2874_v0, 8.507059e+37 }
0x128a   :  { %v2913_v25 = vpop.xlane.xlu0 %2912 }
0x128b   :  { %3881 = vrcp.f32 %v2913_v25  ;;  %v2948_v31 = vand.u32 2147483648, %v2913_v25  ;;  %v2946_v4 = vand.u32 2147483647, %v2913_v25  ;;  %vm2942_vm3 = vweird.f32 %v2913_v25 }
0x128c   :  { %v3880_v41 = vpop.eup %3879 }
0x128d   :  { %v2866_v13 = vmul.f32 %v3880_v41, %v2841_v32  ;;  %vm2871_vm11 = vweird.f32 %v3880_v41  ;;  %v2949_v12 = vor.u32 1.1754944e-38, %v2948_v31  ;;  %vm2947_vm7 = vcmp.eq.f32.partialorder %v2946_v4, 8.507059e+37 }
0x128e   :  { %vm2872_vm13 = vmor %vm2870_vm12, %vm2871_vm11 }
0x128f   :  { %v2867_v8 = vsub.f32 1.0, %v2866_v13 }
0x1291   :  { %v3882_v22 = vpop.eup %3881  ;;  %v2868_v46 = vmul.f32 %v3880_v41, %v2867_v8 }
0x1292   :  { %v2938_v52 = vmul.f32 %v3882_v22, %v2913_v25  ;;  %vm2943_vm2 = vweird.f32 %v3882_v22 }
0x1293   :  { %v2869_v54 = vadd.f32 %v3880_v41, %v2868_v46  ;;  %vm2944_vm6 = vmor %vm2942_vm3, %vm2943_vm2  ;;  %v2934_v55 = vpop.f32.mrf.mxu0 }
0x1294   :  { %v2939_v62 = vsub.f32 1.0, %v2938_v52  ;;  %v2862_v58 = vpop.f32.mrf.mxu3 }
0x1295   :  { %v2873_v57 = vsel %vm2872_vm13, %v3880_v41, %v2869_v54 }
0x1296   :  { %v2878_v37 = vsel %vm2875_vm14, %v2877_v38, %v2873_v57  ;;  %v2940_v27 = vmul.f32 %v3882_v22, %v2939_v62 }
0x1297   :  { %v2880_v34 = vmul.f32 %v2878_v37, %v2862_v58 }
0x1298   :  { %v2941_v30 = vadd.f32 %v3882_v22, %v2940_v27 }
0x1299   :  { %2958 = vrot.lane.b32.xlu1 %v2880_v34, %s3975_s20 }
0x129a   :  { %v2945_v9 = vsel %vm2944_vm6, %v3882_v22, %v2941_v30 }
0x129b   :  { %v2950_v40 = vsel %vm2947_vm7, %v2949_v12, %v2945_v9 }
0x129c   :  { %v2952_v6 = vmul.f32 %v2950_v40, %v2934_v55  ;;  %v3020_v23 = vpop.f32.mrf.mxu3 }
0x129e   :  { %2962 = vrot.lane.b32.xlu2 %v2952_v6, %s3973_s1 }
0x12cc   :  { %v3071_v44 = vpop.xlane.xlu1 %3070 }
0x12cd   :  { %3883 = vrcp.f32 %v3071_v44  ;;  %v3106_v15 = vand.u32 2147483648, %v3071_v44  ;;  %v3104_v21 = vand.u32 2147483647, %v3071_v44  ;;  %vm3100_vm9 = vweird.f32 %v3071_v44 }
0x12cf   :  { %v3107_v36 = vor.u32 1.1754944e-38, %v3106_v15  ;;  %vm3105_vm11 = vcmp.eq.f32.partialorder %v3104_v21, 8.507059e+37 }
0x12d3   :  { %v3884_v43 = vpop.eup %3883 }
0x12d4   :  { %v3096_v5 = vmul.f32 %v3884_v43, %v3071_v44  ;;  %vm3101_vm8 = vweird.f32 %v3884_v43  ;;  %v2697_v20 = vpop.xlane.xlu1 %2696 }
0x12d5   :  { %vm3102_vm10 = vmor %vm3100_vm9, %vm3101_vm8  ;;  %v3092_v48 = vpop.f32.mrf.mxu0  ;;  %v2732_v15 = vand.u32 2147483648, %v2697_v20 }
0x12d6   :  { %v3097_v42 = vsub.f32 1.0, %v3096_v5 }
0x12d8   :  { %v3098_v47 = vmul.f32 %v3884_v43, %v3097_v42 }
0x12da   :  { %v3099_v63 = vadd.f32 %v3884_v43, %v3098_v47  ;;  %v2730_v47 = vand.u32 2147483647, %v2697_v20 }
0x12dc   :  { %v3103_v61 = vsel %vm3102_vm10, %v3884_v43, %v3099_v63  ;;  %v2733_v63 = vor.u32 1.1754944e-38, %v2732_v15 }
0x12dd   :  { %v3108_v16 = vsel %vm3105_vm11, %v3107_v36, %v3103_v61  ;;  %v3143_v33 = vpop.xlane.xlu2 %3142 }
0x12de   :  { %v3110_v1 = vmul.f32 %v3108_v16, %v3092_v48  ;;  %3885 = vrcp.f32 %v3143_v33  ;;  %v3178_v60 = vand.u32 2147483648, %v3143_v33  ;;  %v3176_v53 = vand.u32 2147483647, %v3143_v33 }
0x12df   :  { %vm3172_vm13 = vweird.f32 %v3143_v33 }
0x12e0   :  { %3256 = vrot.lane.b32.xlu0 %v3110_v1, %s3974_s19  ;;  %v3179_v32 = vor.u32 1.1754944e-38, %v3178_v60  ;;  %vm3177_vm2 = vcmp.eq.f32.partialorder %v3176_v53, 8.507059e+37 }
0x12e3   :  { %v3215_v28 = vpop.xlane.xlu0 %3214 }
0x12e4   :  { %v3886_v26 = vpop.eup %3885  ;;  %3887 = vrcp.f32 %v3215_v28  ;;  %v3248_v22 = vand.u32 2147483647, %v3215_v28  ;;  %v3250_v46 = vand.u32 2147483648, %v3215_v28  ;;  %vm3244_vm6 = vweird.f32 %v3215_v28 }
0x12e5   :  { %v3168_v10 = vmul.f32 %v3886_v26, %v3143_v33  ;;  %v2999_v18 = vpop.xlane.xlu2 %2998  ;;  %vm3173_vm12 = vweird.f32 %v3886_v26 }
0x12e6   :  { %3889 = vrcp.f32 %v2999_v18  ;;  %vm3174_vm14 = vmor %vm3172_vm13, %vm3173_vm12  ;;  %v3034_v38 = vand.u32 2147483648, %v2999_v18  ;;  %v3032_v31 = vand.u32 2147483647, %v2999_v18  ;;  %v3251_v27 = vor.u32 1.1754944e-38, %v3250_v46 }
0x12e7   :  { %v3169_v39 = vsub.f32 1.0, %v3168_v10  ;;  %3891 = vrcp.f32 %v2697_v20  ;;  %vm3028_vm9 = vweird.f32 %v2999_v18  ;;  %vm3249_vm10 = vcmp.eq.f32.partialorder %v3248_v22, 8.507059e+37 }
0x12e8   :  { %v3035_v30 = vor.u32 1.1754944e-38, %v3034_v38  ;;  %vm3033_vm12 = vcmp.eq.f32.partialorder %v3032_v31, 8.507059e+37 }
0x12e9   :  { %v3170_v35 = vmul.f32 %v3886_v26, %v3169_v39 }
0x12ea   :  { %v3888_v45 = vpop.eup %3887 }
0x12eb   :  { %v3240_v56 = vmul.f32 %v3888_v45, %v3215_v28  ;;  %v3171_v49 = vadd.f32 %v3886_v26, %v3170_v35  ;;  %vm3245_vm3 = vweird.f32 %v3888_v45 }
0x12ec   :  { %v3890_v51 = vpop.eup %3889  ;;  %v3164_v8 = vpop.f32.mrf.mxu3  ;;  %vm3246_vm8 = vmor %vm3244_vm6, %vm3245_vm3  ;;  %vm2731_vm3 = vcmp.eq.f32.partialorder %v2730_v47, 8.507059e+37 }
0x12ed   :  { %v3241_v25 = vsub.f32 1.0, %v3240_v56  ;;  %v3024_v41 = vmul.f32 %v3890_v51, %v2999_v18  ;;  %v3175_v13 = vsel %vm3174_vm14, %v3886_v26, %v3171_v49  ;;  %v3892_v0 = vpop.eup %3891  ;;  %vm3029_vm7 = vweird.f32 %v3890_v51  ;;  %v3236_v12 = vpop.f32.mrf.mxu0 }
0x12ee   :  { %v3180_v19 = vsel %vm3177_vm2, %v3179_v32, %v3175_v13  ;;  %v2722_v37 = vmul.f32 %v3892_v0, %v2697_v20  ;;  %vm3030_vm11 = vmor %vm3028_vm9, %vm3029_vm7  ;;  %vm2727_vm13 = vweird.f32 %v3892_v0  ;;  %vm2726_vm14 = vweird.f32 %v2697_v20 }
0x12ef   :  { %v3025_v52 = vsub.f32 1.0, %v3024_v41  ;;  %v3182_v54 = vmul.f32 %v3180_v19, %v3164_v8  ;;  %v3242_v62 = vmul.f32 %v3888_v45, %v3241_v25  ;;  %vm2728_vm2 = vmor %vm2726_vm14, %vm2727_vm13 }
0x12f0   :  { %v2723_v44 = vsub.f32 1.0, %v2722_v37 }
0x12f1   :  { %v3026_v57 = vmul.f32 %v3890_v51, %v3025_v52  ;;  %v3243_v58 = vadd.f32 %v3888_v45, %v3242_v62  ;;  %3260 = vrot.lane.b32.xlu1 %v3182_v54, %s3975_s20 }
0x12f2   :  { %v2724_v5 = vmul.f32 %v3892_v0, %v2723_v44 }
0x12f3   :  { %v3027_v4 = vadd.f32 %v3890_v51, %v3026_v57  ;;  %v3247_v34 = vsel %vm3246_vm8, %v3888_v45, %v3243_v58 }
0x12f4   :  { %v3252_v9 = vsel %vm3249_vm10, %v3251_v27, %v3247_v34  ;;  %v2725_v42 = vadd.f32 %v3892_v0, %v2724_v5 }
0x12f5   :  { %v3254_v55 = vmul.f32 %v3252_v9, %v3236_v12  ;;  %v3031_v40 = vsel %vm3030_vm11, %v3890_v51, %v3027_v4 }
0x12f6   :  { %v3036_v6 = vsel %vm3033_vm12, %v3035_v30, %v3031_v40  ;;  %v2729_v21 = vsel %vm2728_vm2, %v3892_v0, %v2725_v42 }
0x12f7   :  { %3264 = vrot.lane.b32.xlu0 %v3254_v55, %s3973_s1  ;;  %v3038_v43 = vmul.f32 %v3036_v6, %v3020_v23  ;;  %v2734_v36 = vsel %vm2731_vm3, %v2733_v63, %v2729_v21  ;;  %v2955_v61 = vpop.permute.xlu0 %2954 }
0x12f8   :  { %v2736_v48 = vmul.f32 %v2734_v36, %v4971_v11  ;;  %v2963_v1 = vpop.permute.xlu2 %2962 }
0x12fa   :  { %v2965_v16 = vsel %vm161_vm1, %v2736_v48, %v2955_v61 }
0x130b   :  { %v2959_v33 = vpop.permute.xlu1 %2958 }
0x130c   :  { %v2966_v28 = vsel %vm488_vm4, %v2965_v16, %v2959_v33 }
0x130d   :  { %v2967_v26 = vsel %vm490_vm5, %v2966_v28, %v2963_v1 }
0x130e   :  { %3677 = vmatmul.msk.f32.vlgmr.msrb.gmra.mxu1 %vm84_vm0, %v2967_v26 }
0x1352   :  { %v3257_v10 = vpop.permute.xlu0 %3256 }
0x1353   :  { %v3267_v23 = vsel %vm161_vm1, %v3038_v43, %v3257_v10 }
0x1363   :  { %v3261_v18 = vpop.permute.xlu1 %3260 }
0x1364   :  { %v3268_v20 = vsel %vm488_vm4, %v3267_v23, %v3261_v18 }
0x1369   :  { %v3265_v39 = vpop.permute.xlu0 %3264 }
0x136a   :  { %v3269_v60 = vsel %vm490_vm5, %v3268_v20, %v3265_v39 }
0x136b   :  { %3678 = vmatmul.msk.f32.gmra.mxu1 %vm84_vm0, %v3269_v60 }
0x138b   :  { %v3293_v11 = vpop.f32.mrf.mxu1 }
0x138c   :  { %v3294_v35 = vadd.f32 %v3293_v11, %v4548_v29 }
0x138e   :  { %v3299_v53 = vadd.f32 %v3294_v35, %v4829_v3 }
0x1390   :  { %v3301_v45 = vsel %vm84_vm0, %v3299_v53, 0.0  ;;  %v3307_v56 = vmul.f32 %v3299_v53, %v3299_v53 }
0x1391   :  { %3302 = vadd.xlane.f32.xlu2 %v3301_v45 }
0x1392   :  { %v3309_v49 = vsel %vm84_vm0, %v3307_v56, 0.0 }
0x1393   :  { %3310 = vadd.xlane.f32.xlu1 %v3309_v49 }
0x13e8   :  { %v3296_v51 = vpop.f32.mrf.mxu1 }
0x13e9   :  { %v3297_v32 = vadd.f32 %v3296_v51, %v4548_v29 }
0x13eb   :  { %v3300_v25 = vadd.f32 %v3297_v32, %v4839_v50 }
0x13ed   :  { %v3304_v41 = vsel %vm84_vm0, %v3300_v25, 0.0  ;;  %v3308_v13 = vmul.f32 %v3300_v25, %v3300_v25 }
0x13ee   :  { %3305 = vadd.xlane.f32.xlu0 %v3304_v41 }
0x13ef   :  { %v3312_v8 = vsel %vm84_vm0, %v3308_v13, 0.0 }
0x13f0   :  { %3313 = vadd.xlane.f32.xlu2 %v3312_v8 }
0x1404   :  { %v3303_v3 = vpop.xlane.xlu2 %3302 }
0x1405   :  { %v3315_v19 = vmul.f32 0.03125, %v3303_v3 }
0x1406   :  { %v3311_v22 = vpop.xlane.xlu1 %3310 }
0x1407   :  { %v3319_v46 = vmul.f32 %v3315_v19, %v3315_v19  ;;  %v3317_v0 = vmul.f32 0.03125, %v3311_v22  ;;  %v3323_v58 = vsub.f32 %v3299_v53, %v3315_v19 }
0x1409   :  { %v3321_v52 = vsub.f32 %v3317_v0, %v3319_v46 }
0x140b   :  { %v3325_v54 = vadd.f32 1e-05, %v3321_v52 }
0x140d   :  { %3893 = vrsqrt.f32 %v3325_v54  ;;  %vm3333_vm4 = vweird.f32 %v3325_v54 }
0x1413   :  { %v3894_v62 = vpop.eup %3893 }
0x1414   :  { %v3328_v38 = vmul.f32 %v3894_v62, %v3325_v54  ;;  %vm3334_vm1 = vweird.f32 %v3894_v62 }
0x1415   :  { %vm3335_vm5 = vmor %vm3333_vm4, %vm3334_vm1 }
0x1416   :  { %v3329_v29 = vmul.f32 %v3894_v62, %v3328_v38 }
0x1418   :  { %v3330_v57 = vmul.f32 0.5, %v3329_v29 }
0x141a   :  { %v3331_v50 = vsub.f32 1.5, %v3330_v57 }
0x141c   :  { %v3332_v31 = vmul.f32 %v3894_v62, %v3331_v50 }
0x141e   :  { %v3336_v37 = vsel %vm3335_vm5, %v3894_v62, %v3332_v31 }
0x141f   :  { %v3347_v27 = vmul.f32 %v3336_v37, %v3323_v58 }
0x1421   :  { %v3349_v4 = vmul.f32 %v3347_v27, %v4578_v59 }
0x1423   :  { %v3351_v34 = vadd.f32 %v3349_v4, %v4581_v7 }
0x1425   :  { %3679 = vmatmul.msk.f32.vlgmr.msrb.gmra.mxu3 %vm84_vm0, %v3351_v34 }
0x1461   :  { %v3306_v30 = vpop.xlane.xlu0 %3305 }
0x1462   :  { %v3316_v12 = vmul.f32 0.03125, %v3306_v30 }
0x1463   :  { %v3314_v9 = vpop.xlane.xlu2 %3313 }
0x1464   :  { %v3320_v55 = vmul.f32 %v3316_v12, %v3316_v12  ;;  %v3318_v40 = vmul.f32 0.03125, %v3314_v9  ;;  %v3324_v63 = vsub.f32 %v3300_v25, %v3316_v12 }
0x1466   :  { %v3322_v6 = vsub.f32 %v3318_v40, %v3320_v55 }
0x1468   :  { %v3326_v44 = vadd.f32 1e-05, %v3322_v6 }
0x146a   :  { %3895 = vrsqrt.f32 %v3326_v44  ;;  %vm3343_vm7 = vweird.f32 %v3326_v44 }
0x1470   :  { %v3896_v43 = vpop.eup %3895 }
0x1471   :  { %v3338_v5 = vmul.f32 %v3896_v43, %v3326_v44  ;;  %vm3344_vm6 = vweird.f32 %v3896_v43 }
0x1472   :  { %vm3345_vm8 = vmor %vm3343_vm7, %vm3344_vm6 }
0x1473   :  { %v3339_v42 = vmul.f32 %v3896_v43, %v3338_v5 }
0x1475   :  { %v3340_v15 = vmul.f32 0.5, %v3339_v42 }
0x1477   :  { %v3341_v47 = vsub.f32 1.5, %v3340_v15 }
0x1479   :  { %v3342_v21 = vmul.f32 %v3896_v43, %v3341_v47 }
0x147b   :  { %v3346_v36 = vsel %vm3345_vm8, %v3896_v43, %v3342_v21 }
0x147c   :  { %v3348_v61 = vmul.f32 %v3346_v36, %v3324_v63 }
0x147e   :  { %v3350_v48 = vmul.f32 %v3348_v61, %v4578_v59 }
0x1480   :  { %v3352_v16 = vadd.f32 %v3350_v48, %v4581_v7 }
0x1482   :  { %3680 = vmatmul.msk.f32.gmra.mxu3 %vm84_vm0, %v3352_v16 }
0x14a8   :  { %v3376_v33 = vpop.f32.mrf.mxu3 }
0x14a9   :  { %v3377_v1 = vadd.f32 %v3376_v33, %v4616_v17 }
0x14ab   :  { %v3382_v28 = vmax.f32 %v3377_v1, 0.0 }
0x14ad   :  { %3681 = vmatmul.msk.f32.vlgmr.msra.gmra.mxu2 %vm1770_vm15, %v3382_v28 }
0x1505   :  { %v3379_v26 = vpop.f32.mrf.mxu3 }
0x1506   :  { %v3380_v10 = vadd.f32 %v3379_v26, %v4616_v17 }
0x1508   :  { %v3383_v18 = vmax.f32 %v3380_v10, 0.0 }
0x150a   :  { %3682 = vmatmul.msk.f32.gmra.mxu2 %vm1770_vm15, %v3383_v18 }
0x1530   :  { %v3407_v23 = vpop.f32.mrf.mxu2 }
0x1531   :  { %v3413_v20 = vadd.f32 %v3407_v23, %v3351_v34 }
0x1533   :  { %v3415_v59 = vadd.f32 %v3413_v20, %v4625_v24 }
0x1535   :  { %v3417_v7 = vsel %vm84_vm0, %v3415_v59, 0.0  ;;  %v3423_v39 = vmul.f32 %v3415_v59, %v3415_v59 }
0x1536   :  { %3418 = vadd.xlane.f32.xlu1 %v3417_v7 }
0x1537   :  { %v3425_v60 = vsel %vm84_vm0, %v3423_v39, 0.0  ;;  %v3935_v39 = vld [vmem:[%s5035_s6 + $0x8] sm:$0x3f] }
0x1538   :  { %3426 = vadd.xlane.f32.xlu2 %v3425_v60  ;;  %v3517_v60 = vperm.slane %v3935_v39, 1 }
0x158d   :  { %v3410_v11 = vpop.f32.mrf.mxu2 }
0x158e   :  { %v3414_v35 = vadd.f32 %v3410_v11, %v3352_v16 }
0x1590   :  { %v3416_v53 = vadd.f32 %v3414_v35, %v4625_v24 }
0x1592   :  { %v3420_v17 = vsel %vm84_vm0, %v3416_v53, 0.0  ;;  %v3424_v45 = vmul.f32 %v3416_v53, %v3416_v53 }
0x1593   :  { %3421 = vadd.xlane.f32.xlu0 %v3420_v17 }
0x1594   :  { %v3428_v56 = vsel %vm84_vm0, %v3424_v45, 0.0 }
0x1595   :  { %3429 = vadd.xlane.f32.xlu1 %v3428_v56 }
0x15a9   :  { %v3419_v49 = vpop.xlane.xlu1 %3418 }
0x15aa   :  { %v3431_v51 = vmul.f32 0.03125, %v3419_v49 }
0x15ab   :  { %v3427_v32 = vpop.xlane.xlu2 %3426 }
0x15ac   :  { %v3435_v25 = vmul.f32 %v3431_v51, %v3431_v51  ;;  %v3433_v41 = vmul.f32 0.03125, %v3427_v32  ;;  %v3439_v52 = vsub.f32 %v3415_v59, %v3431_v51 }
0x15ae   :  { %v3437_v13 = vsub.f32 %v3433_v41, %v3435_v25 }
0x15b0   :  { %v3441_v8 = vadd.f32 1e-05, %v3437_v13 }
0x15b2   :  { %3897 = vrsqrt.f32 %v3441_v8  ;;  %vm3449_vm9 = vweird.f32 %v3441_v8 }
0x15b8   :  { %v3898_v3 = vpop.eup %3897 }
0x15b9   :  { %v3444_v19 = vmul.f32 %v3898_v3, %v3441_v8  ;;  %vm3450_vm15 = vweird.f32 %v3898_v3 }
0x15ba   :  { %vm3451_vm10 = vmor %vm3449_vm9, %vm3450_vm15 }
0x15bb   :  { %v3445_v22 = vmul.f32 %v3898_v3, %v3444_v19 }
0x15bd   :  { %v3446_v46 = vmul.f32 0.5, %v3445_v22 }
0x15bf   :  { %v3447_v24 = vsub.f32 1.5, %v3446_v46 }
0x15c1   :  { %v3448_v0 = vmul.f32 %v3898_v3, %v3447_v24 }
0x15c3   :  { %v3452_v54 = vsel %vm3451_vm10, %v3898_v3, %v3448_v0 }
0x15c4   :  { %v3463_v62 = vmul.f32 %v3452_v54, %v3439_v52 }
0x15c6   :  { %v3465_v38 = vmul.f32 %v3463_v62, %v4636_v2 }
0x15c8   :  { %v3467_v29 = vadd.f32 %v3465_v38, %v4638_v14 }
0x15ca   :  { %v3469_v57 = vsel %vm84_vm0, %v3467_v29, 0.0  ;;  %v3475_v50 = vmul.f32 %v3467_v29, %v3467_v29 }
0x15cb   :  { %3470 = vadd.xlane.f32.xlu0 %v3469_v57 }
0x15cc   :  { %v3477_v31 = vsel %vm84_vm0, %v3475_v50, 0.0 }
0x15cd   :  { %3478 = vadd.xlane.f32.xlu1 %v3477_v31 }
0x1606   :  { %v3422_v58 = vpop.xlane.xlu0 %3421 }
0x1607   :  { %v3432_v37 = vmul.f32 0.03125, %v3422_v58 }
0x1608   :  { %v3430_v27 = vpop.xlane.xlu1 %3429 }
0x1609   :  { %v3436_v4 = vmul.f32 %v3432_v37, %v3432_v37  ;;  %v3434_v34 = vmul.f32 0.03125, %v3430_v27  ;;  %v3440_v5 = vsub.f32 %v3416_v53, %v3432_v37  ;;  %v3520_v53 = vperm.slane %v3935_v39, 5 }
0x160b   :  { %v3438_v30 = vsub.f32 %v3434_v34, %v3436_v4 }
0x160d   :  { %v3442_v12 = vadd.f32 1e-05, %v3438_v30 }
0x160f   :  { %3899 = vrsqrt.f32 %v3442_v12  ;;  %vm3459_vm12 = vweird.f32 %v3442_v12 }
0x1615   :  { %v3900_v9 = vpop.eup %3899 }
0x1616   :  { %v3454_v55 = vmul.f32 %v3900_v9, %v3442_v12  ;;  %vm3460_vm11 = vweird.f32 %v3900_v9 }
0x1617   :  { %vm3461_vm13 = vmor %vm3459_vm12, %vm3460_vm11 }
0x1618   :  { %v3455_v40 = vmul.f32 %v3900_v9, %v3454_v55 }
0x161a   :  { %v3456_v6 = vmul.f32 0.5, %v3455_v40 }
0x161c   :  { %v3457_v44 = vsub.f32 1.5, %v3456_v6 }
0x161e   :  { %v3458_v43 = vmul.f32 %v3900_v9, %v3457_v44 }
0x1620   :  { %v3462_v42 = vsel %vm3461_vm13, %v3900_v9, %v3458_v43 }
0x1621   :  { %v3464_v15 = vmul.f32 %v3462_v42, %v3440_v5 }
0x1623   :  { %v3466_v47 = vmul.f32 %v3464_v15, %v4636_v2 }
0x1625   :  { %v3468_v21 = vadd.f32 %v3466_v47, %v4638_v14 }
0x1627   :  { %v3472_v63 = vsel %vm84_vm0, %v3468_v21, 0.0  ;;  %v3476_v36 = vmul.f32 %v3468_v21, %v3468_v21 }
0x1628   :  { %3473 = vadd.xlane.f32.xlu2 %v3472_v63 }
0x1629   :  { %v3480_v61 = vsel %vm84_vm0, %v3476_v36, 0.0 }
0x162a   :  { %3481 = vadd.xlane.f32.xlu0 %v3480_v61 }
0x163e   :  { %v3471_v48 = vpop.xlane.xlu0 %3470 }
0x163f   :  { %v3483_v16 = vmul.f32 0.03125, %v3471_v48 }
0x1640   :  { %v3479_v33 = vpop.xlane.xlu1 %3478 }
0x1641   :  { %v3487_v1 = vmul.f32 %v3483_v16, %v3483_v16  ;;  %v3485_v28 = vmul.f32 0.03125, %v3479_v33  ;;  %v3491_v7 = vsub.f32 %v3467_v29, %v3483_v16 }
0x1643   :  { %v3489_v26 = vsub.f32 %v3485_v28, %v3487_v1 }
0x1645   :  { %v3493_v10 = vadd.f32 1e-05, %v3489_v26 }
0x1647   :  { %3901 = vrsqrt.f32 %v3493_v10  ;;  %vm3501_vm2 = vweird.f32 %v3493_v10 }
0x164d   :  { %v3902_v18 = vpop.eup %3901 }
0x164e   :  { %v3496_v23 = vmul.f32 %v3902_v18, %v3493_v10  ;;  %vm3502_vm14 = vweird.f32 %v3902_v18 }
0x164f   :  { %vm3503_vm3 = vmor %vm3501_vm2, %vm3502_vm14 }
0x1650   :  { %v3497_v2 = vmul.f32 %v3902_v18, %v3496_v23 }
0x1652   :  { %v3498_v20 = vmul.f32 0.5, %v3497_v2 }
0x1654   :  { %v3499_v14 = vsub.f32 1.5, %v3498_v20 }
0x1656   :  { %v3500_v59 = vmul.f32 %v3902_v18, %v3499_v14 }
0x1658   :  { %v3504_v11 = vsel %vm3503_vm3, %v3902_v18, %v3500_v59 }
0x1659   :  { %v3515_v35 = vmul.f32 %v3504_v11, %v3491_v7 }
0x165b   :  { %v3518_v17 = vmul.f32 %v3517_v60, %v3515_v35 }
0x165d   :  { %v3521_v45 = vadd.f32 %v3520_v53, %v3518_v17 }
0x165f   :  { %3523 = vst.msk [vmem:[#allocation2] sm:$0xff] %vm84_vm0, %v3521_v45 }
0x169b   :  { %v3474_v56 = vpop.xlane.xlu2 %3473 }
0x169c   :  { %v3484_v49 = vmul.f32 0.03125, %v3474_v56 }
0x169d   :  { %v3482_v51 = vpop.xlane.xlu0 %3481 }
0x169e   :  { %v3488_v32 = vmul.f32 %v3484_v49, %v3484_v49  ;;  %v3486_v25 = vmul.f32 0.03125, %v3482_v51  ;;  %v3492_v0 = vsub.f32 %v3468_v21, %v3484_v49 }
0x16a0   :  { %v3490_v41 = vsub.f32 %v3486_v25, %v3488_v32 }
0x16a2   :  { %v3494_v13 = vadd.f32 1e-05, %v3490_v41 }
0x16a4   :  { %3903 = vrsqrt.f32 %v3494_v13  ;;  %vm3511_vm4 = vweird.f32 %v3494_v13 }
0x16aa   :  { %v3904_v8 = vpop.eup %3903 }
0x16ab   :  { %v3506_v3 = vmul.f32 %v3904_v8, %v3494_v13  ;;  %vm3512_vm1 = vweird.f32 %v3904_v8 }
0x16ac   :  { %vm3513_vm5 = vmor %vm3511_vm4, %vm3512_vm1 }
0x16ad   :  { %v3507_v19 = vmul.f32 %v3904_v8, %v3506_v3 }
0x16af   :  { %v3508_v22 = vmul.f32 0.5, %v3507_v19 }
0x16b1   :  { %v3509_v46 = vsub.f32 1.5, %v3508_v22 }
0x16b3   :  { %v3510_v24 = vmul.f32 %v3904_v8, %v3509_v46 }
0x16b5   :  { %v3514_v52 = vsel %vm3513_vm5, %v3904_v8, %v3510_v24 }
0x16b6   :  { %v3516_v54 = vmul.f32 %v3514_v52, %v3492_v0 }
0x16b8   :  { %v3519_v62 = vmul.f32 %v3517_v60, %v3516_v54 }
0x16ba   :  { %v3522_v38 = vadd.f32 %v3520_v53, %v3519_v62 }
0x16bc   :  { %3524 = vst.msk [vmem:[#allocation2 + $0x8] sm:$0xff] %vm84_vm0, %v3522_v38 }
0x16bd   :  { %3537 = dma.vmem_to_hbm [thread:$0]  %s3530_s24, 256, %s3532_s15, [#allocation3], %s3977_s25, %s3977_s25, %s3974_s19  }
0x16be   :  { %3960 = dma.done.wait [#allocation3], 256  }
0x16bf   :  { %3961 = vsyncadd [#allocation3], 4294967040 }
0x16c0   :  { %3542 = vsyncpa [#allocation3], 1 }

</bundles_post_ra>
